<compile_context>
chip_gen: v6e
topology: v6e:2x2x1
jax: 0.10.0
libtpu: 0.0.40
codegen_flags: <defaults>
</compile_context>

<pallas_src>
import jax
import jax.numpy as jnp
from jax import lax
from jax.experimental import pallas as pl
from jax.experimental.pallas import tpu as pltpu


# ----------------------------------------------------------------------------
# Pallas kernels
# ----------------------------------------------------------------------------
def conv_bn_relu_pool_kernel(p_ref, w_ref, sh_ref, o_ref):
    """Fused (conv-as-matmul with folded BN scale) + shift + ReLU + MaxPool2x2.

    p_ref : (4, TP, K)  im2col patches for the 4 pre-pool pixels of each output
                        pixel (K = 9*Cin; W2 already contains dw*pw*bn_scale)
    w_ref : (K, Cout)   folded weight matrix
    sh_ref: (1, Cout)   folded bias + BN shift
    o_ref : (TP, Cout)  pooled output rows
    """
    four, tp, k = p_ref.shape
    # One big MXU call over all 4 pool taps (M = 4*TP).  TP is a multiple of 8,
    # so the leading-dim merge/split reshapes are sublane-tile relabels only.
    z = jnp.dot(p_ref[...].reshape(four * tp, k), w_ref[...],
                preferred_element_type=jnp.float32)
    z = jnp.maximum(z + sh_ref[...], 0.0)
    z = z.reshape(four, tp, -1)
    o_ref[...] = jnp.maximum(jnp.maximum(z[0], z[1]), jnp.maximum(z[2], z[3]))


def final_block_kernel(p_ref, w_ref, sh_ref, pm_ref, fw_ref, fb_ref, o_ref,
                       g_acc):
    """Fused separable conv (folded) + BN + ReLU + GlobalAvgPool + Linear.

    Tiled over pixel rows; GAP is accumulated in a VMEM scratch across grid
    steps, the Linear head runs on the last step only.

    p_ref : (TP, K)      im2col patch tile
    w_ref : (K, Cmid)    folded dw*pw*bn_scale weight
    sh_ref: (1, Cmid)    folded shift
    pm_ref: (N, TP)      averaging-matrix tile (1/(H*W) within each sample,
                         zeros for padded rows)
    fw_ref: (Cmid, ncls), fb_ref: (1, ncls)
    o_ref : (N, ncls)    logits
    g_acc : (N, Cmid)    VMEM GAP accumulator
    """
    i = pl.program_id(0)

    @pl.when(i == 0)
    def _():
        g_acc[...] = jnp.zeros_like(g_acc)

    z = jnp.dot(p_ref[...], w_ref[...], preferred_element_type=jnp.float32)
    z = jnp.maximum(z + sh_ref[...], 0.0)
    g_acc[...] += jnp.dot(pm_ref[...], z, preferred_element_type=jnp.float32)

    @pl.when(i == pl.num_programs(0) - 1)
    def _():
        # TODO(synk): Dropout(p=0.15) is identity in eval mode; not applied.
        o_ref[...] = (jnp.dot(g_acc[...], fw_ref[...],
                              preferred_element_type=jnp.float32) + fb_ref[...])


# ----------------------------------------------------------------------------
# Glue: im2col, pooling grouping, weight/BN folding (plain JAX, trace time)
# ----------------------------------------------------------------------------
def _im2col(x):
    """(N,H,W,C) -> (N,H,W,9,C) 3x3 'same' patches, tap index k = dy*3+dx."""
    N, H, W, C = x.shape
    xp = jnp.pad(x, ((0, 0), (1, 1), (1, 1), (0, 0)))
    cols = [xp[:, dy:dy + H, dx:dx + W, :] for dy in range(3) for dx in range(3)]
    return jnp.stack(cols, axis=3)


def _pool_group(p):
    """(N,H,W,*rest) -> (4, N*(H//2)*(W//2), *rest): group the 2x2 pool taps."""
    N, H, W = p.shape[:3]
    rest = p.shape[3:]
    Ho, Wo = H // 2, W // 2
    p = p.reshape(N, Ho, 2, Wo, 2, *rest)
    p = jnp.moveaxis(p, (2, 4), (0, 1))
    return p.reshape(4, N * Ho * Wo, *rest)


def _round_up(x, m):
    return (x + m - 1) // m * m


def _pick_tile(p, row_bytes, const_bytes, multiple,
               budget_bytes=12 * 1024 * 1024):
    """Pick a row-tile size (multiple of `multiple`) so that the double-buffered
    per-step VMEM footprint (row-dependent + resident weights) stays inside
    `budget_bytes`.  The pixel count is then padded UP to a multiple of the
    tile (padded rows are masked out downstream), so tiles stay large
    regardless of P's factorization."""
    avail = max(budget_bytes - const_bytes, multiple * row_bytes)
    cap = (avail // max(row_bytes, 1)) // multiple * multiple
    cap = max(multiple, cap)
    return min(cap, _round_up(p, multiple))


def _fold_bn_affine(bias, bn):
    scale = bn['gamma'] / jnp.sqrt(bn['var'] + bn['eps'])
    shift = bn['beta'] - bn['mean'] * scale + bias * scale
    return scale.astype(jnp.float32), shift.astype(jnp.float32)


def _fold_first(p):
    """FirstBlock weights -> (W2 (9*Cin,Cout) with BN scale folded, shift)."""
    w_oihw, b, bn = p['w'], p['b'], p['bn']
    cout, cin = w_oihw.shape[0], w_oihw.shape[1]
    w2 = jnp.transpose(w_oihw, (2, 3, 1, 0)).reshape(9 * cin, cout)
    scale, shift = _fold_bn_affine(b, bn)
    return (w2 * scale[None, :]).astype(jnp.float32), shift.reshape(1, cout)


def _fold_sconv(p):
    """Separable conv weights -> (W2 (9*Cin,Cout) with dw*pw*bn_scale, shift)."""
    dw_t, db, pw_t, pb, bn = p['dw'], p['dwb'], p['pw'], p['pwb'], p['bn']
    cin, cout = dw_t.shape[0], pw_t.shape[0]
    dwm = jnp.transpose(dw_t[:, 0, :, :], (1, 2, 0)).reshape(9, cin)   # [k, c]
    pw = jnp.transpose(pw_t[:, :, 0, 0], (1, 0))                       # [c, o]
    w2 = (dwm[:, :, None] * pw[None, :, :]).reshape(9 * cin, cout)
    bias2 = db @ pw + pb
    scale, shift = _fold_bn_affine(bias2, bn)
    return (w2 * scale[None, :]).astype(jnp.float32), shift.reshape(1, cout)


# ----------------------------------------------------------------------------
# Block wrappers calling pallas_call
# ----------------------------------------------------------------------------
def conv_pool_block(x, w2, shift):
    """(Separable)Conv3x3 -> BN -> ReLU -> MaxPool2, as one fused kernel.

    x: (N,H,W,Cin) NHWC; w2: (9*Cin, Cout) folded weights; shift: (1, Cout).
    """
    n, h, w, cin = x.shape
    k, cout = w2.shape
    patches = _im2col(x).reshape(n, h, w, k)
    pg = _pool_group(patches)                                # (4, P, K)
    p = pg.shape[1]

    tp = _pick_tile(p, row_bytes=(4 * k + cout) * 4 * 2,
                    const_bytes=2 * (k * cout + cout) * 4, multiple=8)
    p_pad = _round_up(p, tp)
    if p_pad != p:
        pg = jnp.pad(pg, ((0, 0), (0, p_pad - p), (0, 0)))

    out = pl.pallas_call(
        conv_bn_relu_pool_kernel,
        out_shape=jax.ShapeDtypeStruct((p_pad, cout), jnp.float32),
        grid=(p_pad // tp,),
        in_specs=[pl.BlockSpec((4, tp, k), lambda i: (0, i, 0)),
                  pl.BlockSpec((k, cout), lambda i: (0, 0)),
                  pl.BlockSpec((1, cout), lambda i: (0, 0))],
        out_specs=pl.BlockSpec((tp, cout), lambda i: (i, 0)),
        compiler_params=pltpu.CompilerParams(dimension_semantics=("parallel",)),
    )(pg, w2, shift)
    return out[:p].reshape(n, h // 2, w // 2, cout)


def final_block(x, w2, shift, fc_w, fc_b):
    """FinalBlock: SeparableConv -> BN -> ReLU -> (Dropout) -> GAP -> Linear."""
    n, h, w, cin = x.shape
    k, cmid = w2.shape
    ncls = fc_w.shape[0]
    p = n * h * w
    patches = _im2col(x).reshape(p, k)

    # Lane-dim tile of the averaging matrix must be a multiple of 128.
    tp = _pick_tile(p, row_bytes=(k + n) * 4 * 2,
                    const_bytes=2 * (k * cmid + cmid + cmid * ncls + ncls) * 4,
                    multiple=128)
    p_pad = _round_up(p, tp)
    if p_pad != p:
        patches = jnp.pad(patches, ((0, p_pad - p), (0, 0)))

    # Averaging matrix: 1/(H*W) for a sample's own pixels, 0 for padded rows.
    pm = (jnp.arange(p_pad)[None, :] // (h * w) ==
          jnp.arange(n)[:, None]).astype(jnp.float32) / float(h * w)
    fw = jnp.transpose(fc_w)                                 # (Cmid, ncls)
    fb = fc_b.reshape(1, ncls)

    return pl.pallas_call(
        final_block_kernel,
        out_shape=jax.ShapeDtypeStruct((n, ncls), jnp.float32),
        grid=(p_pad // tp,),
        in_specs=[pl.BlockSpec((tp, k), lambda i: (i, 0)),
                  pl.BlockSpec((k, cmid), lambda i: (0, 0)),
                  pl.BlockSpec((1, cmid), lambda i: (0, 0)),
                  pl.BlockSpec((n, tp), lambda i: (0, i)),
                  pl.BlockSpec((cmid, ncls), lambda i: (0, 0)),
                  pl.BlockSpec((1, ncls), lambda i: (0, 0))],
        out_specs=pl.BlockSpec((n, ncls), lambda i: (0, 0)),
        scratch_shapes=[pltpu.VMEM((n, cmid), jnp.float32)],
        compiler_params=pltpu.CompilerParams(
            dimension_semantics=("arbitrary",)),
    )(patches, w2, shift, pm, fw, fb)


def glyphnet_forward(params, x_nchw):
    x = jnp.transpose(x_nchw, (0, 2, 3, 1))                  # NCHW -> NHWC
    w2, sh = _fold_first(params['first'])
    x = conv_pool_block(x, w2, sh)
    for p in params['inner']:
        w2, sh = _fold_sconv(p)
        x = conv_pool_block(x, w2, sh)
    pf = params['final']
    w2, sh = _fold_sconv(pf)
    return final_block(x, w2, sh, pf['fc_w'], pf['fc_b'])


# ----------------------------------------------------------------------------
# Deterministic parameter init (PyTorch layer shapes, eval-mode BatchNorm)
# ----------------------------------------------------------------------------
def init_params(key, in_channels, num_classes, first_conv_out,
                sconv_seq_outs, last_sconv_out):
    keys = list(jax.random.split(key, 32))
    kit = iter(keys)

    def nrm(shape, fan_in):
        return jax.random.normal(next(kit), shape, jnp.float32) * jnp.sqrt(2.0 / fan_in)

    def bn(c):
        return dict(gamma=jnp.ones((c,), jnp.float32), beta=jnp.zeros((c,), jnp.float32),
                    mean=jnp.zeros((c,), jnp.float32), var=jnp.ones((c,), jnp.float32),
                    eps=1e-5)

    params = {'first': dict(w=nrm((first_conv_out, in_channels, 3, 3), 9 * in_channels),
                            b=nrm((first_conv_out,), first_conv_out),
                            bn=bn(first_conv_out))}
    inner = []
    cins = [first_conv_out] + list(sconv_seq_outs)
    for ci, co in zip(cins, sconv_seq_outs):
        inner.append(dict(dw=nrm((ci, 1, 3, 3), 9), dwb=nrm((ci,), ci),
                          pw=nrm((co, ci, 1, 1), ci), pwb=nrm((co,), co),
                          bn=bn(co)))
    params['inner'] = inner
    ci = cins[-1]
    params['final'] = dict(dw=nrm((ci, 1, 3, 3), 9), dwb=nrm((ci,), ci),
                           pw=nrm((last_sconv_out, ci, 1, 1), ci),
                           pwb=nrm((last_sconv_out,), last_sconv_out),
                           bn=bn(last_sconv_out),
                           fc_w=nrm((num_classes, last_sconv_out), last_sconv_out),
                           fc_b=nrm((num_classes,), num_classes))
    return params


# ----------------------------------------------------------------------------
# Pure-JAX reference (XLA convs) for validation
# ----------------------------------------------------------------------------
def _bn_ref(z, bn):
    return (z - bn['mean']) * bn['gamma'] / jnp.sqrt(bn['var'] + bn['eps']) + bn['beta']


def _conv_ref(x, w_oihw, b):
    w = jnp.transpose(w_oihw, (2, 3, 1, 0))
    z = lax.conv_general_dilated(x, w, (1, 1), 'SAME',
                                 dimension_numbers=('NHWC', 'HWIO', 'NHWC'),
                                 precision=lax.Precision.HIGHEST)
    return z + b


def _dwconv_ref(x, dw_t, b):
    cin = x.shape[-1]
    w = jnp.transpose(dw_t, (2, 3, 1, 0))                    # (3,3,1,Cin)
    z = lax.conv_general_dilated(x, w, (1, 1), 'SAME',
                                 dimension_numbers=('NHWC', 'HWIO', 'NHWC'),
                                 feature_group_count=cin,
                                 precision=lax.Precision.HIGHEST)
    return z + b


def _maxpool_ref(x):
    return lax.reduce_window(x, -jnp.inf, lax.max, (1, 2, 2, 1), (1, 2, 2, 1), 'VALID')


def _pointwise_ref(z, pw_t, pb):
    pw = jnp.transpose(pw_t[:, :, 0, 0], (1, 0))
    return jnp.einsum('nhwc,cd->nhwd', z, pw, precision=lax.Precision.HIGHEST) + pb


def glyphnet_ref(params, x_nchw):
    x = jnp.transpose(x_nchw, (0, 2, 3, 1))
    p = params['first']
    x = _maxpool_ref(jax.nn.relu(_bn_ref(_conv_ref(x, p['w'], p['b']), p['bn'])))
    for p in params['inner']:
        z = _pointwise_ref(_dwconv_ref(x, p['dw'], p['dwb']), p['pw'], p['pwb'])
        x = _maxpool_ref(jax.nn.relu(_bn_ref(z, p['bn'])))
    p = params['final']
    z = _pointwise_ref(_dwconv_ref(x, p['dw'], p['dwb']), p['pw'], p['pwb'])
    z = jax.nn.relu(_bn_ref(z, p['bn']))
    g = jnp.mean(z, axis=(1, 2))
    return jnp.einsum('nc,kc->nk', g, p['fc_w'],
                      precision=lax.Precision.HIGHEST) + p['fc_b']


# ----------------------------------------------------------------------------
if __name__ == "__main__":
    key = jax.random.PRNGKey(0)
    kp, kx = jax.random.split(key)

    # Small, consistent hyper-parameters (constructor args of Glyphnet).
    N, IN_CH, H, W = 2, 1, 32, 32
    NUM_CLASSES = 20
    params = init_params(kp, in_channels=IN_CH, num_classes=NUM_CLASSES,
                         first_conv_out=16, sconv_seq_outs=(16, 16, 32, 32),
                         last_sconv_out=64)

    x = jax.random.normal(kx, (N, IN_CH, H, W), jnp.float32)   # NCHW, like PyTorch

    fwd = jax.jit(glyphnet_forward)
    out = jax.block_until_ready(fwd(params, x))
    ref = jax.block_until_ready(glyphnet_ref(params, x))

    assert out.shape == (N, NUM_CLASSES), out.shape
    if not bool(jnp.allclose(out, ref, rtol=5e-3, atol=5e-3)):
        raise AssertionError("Pallas GlyphNet output does not match JAX reference")

    print("KERNEL_OK")
</pallas_src>

<mosaic_0001>
module attributes {stable_mosaic.version = 11 : i64} {
  func.func @conv_bn_relu_pool_kernel(%arg0: i32, %arg1: memref<4x512x9xf32, #tpu.memory_space<vmem>>, %arg2: memref<9x16xf32, #tpu.memory_space<vmem>>, %arg3: memref<1x16xf32, #tpu.memory_space<vmem>>, %arg4: memref<512x16xf32, #tpu.memory_space<vmem>>) attributes {dimension_semantics = [#tpu.dimension_semantics<parallel>], iteration_bounds = array<i64: 1>, scalar_prefetch = 0 : i64, scratch_operands = 0 : i64, tpu.core_type = #tpu.core_type<tc>, window_params = [{transform_indices = @transform_0, window_bounds = array<i64: 4, 512, 9>}, {pipeline_mode = #tpu.pipeline_mode<synchronous>, transform_indices = @transform_1, window_bounds = array<i64: 9, 16>}, {pipeline_mode = #tpu.pipeline_mode<synchronous>, transform_indices = @transform_2, window_bounds = array<i64: 1, 16>}, {transform_indices = @transform_3, window_bounds = array<i64: 512, 16>}]} {
    %c0 = arith.constant 0 : index
    %c0_0 = arith.constant 0 : index
    %c0_1 = arith.constant 0 : index
    %0 = vector.load %arg1[%c0, %c0_0, %c0_1] : memref<4x512x9xf32, #tpu.memory_space<vmem>>, vector<4x512x9xf32>
    %1 = vector.shape_cast %0 : vector<4x512x9xf32> to vector<2048x9xf32>
    %c0_2 = arith.constant 0 : index
    %c0_3 = arith.constant 0 : index
    %2 = vector.load %arg2[%c0_2, %c0_3] : memref<9x16xf32, #tpu.memory_space<vmem>>, vector<9x16xf32>
    %cst = arith.constant dense<0.000000e+00> : vector<2048x16xf32>
    %3 = tpu.matmul %1, %2, %cst {dimension_numbers = #tpu.dot_dimension_numbers<[1], [0], [0], [1], [0, 0, 1, 1], [], []>} : vector<2048x9xf32>, vector<9x16xf32>, vector<2048x16xf32> -> vector<2048x16xf32>
    %c0_4 = arith.constant 0 : index
    %c0_5 = arith.constant 0 : index
    %4 = vector.load %arg3[%c0_4, %c0_5] : memref<1x16xf32, #tpu.memory_space<vmem>>, vector<1x16xf32>
    %5 = vector.broadcast %4 : vector<1x16xf32> to vector<2048x16xf32>
    %6 = arith.addf %3, %5 : vector<2048x16xf32>
    %cst_6 = arith.constant 0.000000e+00 : f32
    %7 = vector.broadcast %cst_6 : f32 to vector<2048x16xf32>
    %8 = arith.maximumf %6, %7 : vector<2048x16xf32>
    %9 = vector.shape_cast %8 : vector<2048x16xf32> to vector<4x512x16xf32>
    %10 = vector.extract_strided_slice %9 {offsets = [0, 0, 0], sizes = [1, 512, 16], strides = [1, 1, 1]} : vector<4x512x16xf32> to vector<1x512x16xf32>
    %11 = vector.shape_cast %10 : vector<1x512x16xf32> to vector<512x16xf32>
    %12 = vector.extract_strided_slice %9 {offsets = [1, 0, 0], sizes = [1, 512, 16], strides = [1, 1, 1]} : vector<4x512x16xf32> to vector<1x512x16xf32>
    %13 = vector.shape_cast %12 : vector<1x512x16xf32> to vector<512x16xf32>
    %14 = arith.maximumf %11, %13 : vector<512x16xf32>
    %15 = vector.extract_strided_slice %9 {offsets = [2, 0, 0], sizes = [1, 512, 16], strides = [1, 1, 1]} : vector<4x512x16xf32> to vector<1x512x16xf32>
    %16 = vector.shape_cast %15 : vector<1x512x16xf32> to vector<512x16xf32>
    %17 = vector.extract_strided_slice %9 {offsets = [3, 0, 0], sizes = [1, 512, 16], strides = [1, 1, 1]} : vector<4x512x16xf32> to vector<1x512x16xf32>
    %18 = vector.shape_cast %17 : vector<1x512x16xf32> to vector<512x16xf32>
    %19 = arith.maximumf %16, %18 : vector<512x16xf32>
    %20 = arith.maximumf %14, %19 : vector<512x16xf32>
    %c0_7 = arith.constant 0 : index
    %c0_8 = arith.constant 0 : index
    %21 = vector.load %arg4[%c0_7, %c0_8] : memref<512x16xf32, #tpu.memory_space<vmem>>, vector<512x16xf32>
    tpu.vector_store %arg4[%c0_7, %c0_8], %20 {strides = array<i32>} : memref<512x16xf32, #tpu.memory_space<vmem>>, vector<512x16xf32>,
    return
  }
  func.func @transform_0(%arg0: i32) -> (i32, i32, i32) {
    %c0_i32 = arith.constant 0 : i32
    %c0_i32_0 = arith.constant 0 : i32
    %c0_i32_1 = arith.constant 0 : i32
    return %c0_i32, %arg0, %c0_i32_0 : i32, i32, i32
  }
  func.func @transform_1(%arg0: i32) -> (i32, i32) {
    %c0_i32 = arith.constant 0 : i32
    %c0_i32_0 = arith.constant 0 : i32
    %c0_i32_1 = arith.constant 0 : i32
    return %c0_i32, %c0_i32_0 : i32, i32
  }
  func.func @transform_2(%arg0: i32) -> (i32, i32) {
    %c0_i32 = arith.constant 0 : i32
    %c0_i32_0 = arith.constant 0 : i32
    %c0_i32_1 = arith.constant 0 : i32
    return %c0_i32, %c0_i32_0 : i32, i32
  }
  func.func @transform_3(%arg0: i32) -> (i32, i32) {
    %c0_i32 = arith.constant 0 : i32
    %c0_i32_0 = arith.constant 0 : i32
    return %arg0, %c0_i32 : i32, i32
  }
}

module attributes {stable_mosaic.version = 11 : i64} {
  func.func @conv_bn_relu_pool_kernel(%arg0: i32, %arg1: memref<4x128x144xf32, #tpu.memory_space<vmem>>, %arg2: memref<144x16xf32, #tpu.memory_space<vmem>>, %arg3: memref<1x16xf32, #tpu.memory_space<vmem>>, %arg4: memref<128x16xf32, #tpu.memory_space<vmem>>) attributes {dimension_semantics = [#tpu.dimension_semantics<parallel>], iteration_bounds = array<i64: 1>, scalar_prefetch = 0 : i64, scratch_operands = 0 : i64, tpu.core_type = #tpu.core_type<tc>, window_params = [{transform_indices = @transform_0, window_bounds = array<i64: 4, 128, 144>}, {pipeline_mode = #tpu.pipeline_mode<synchronous>, transform_indices = @transform_1, window_bounds = array<i64: 144, 16>}, {pipeline_mode = #tpu.pipeline_mode<synchronous>, transform_indices = @transform_2, window_bounds = array<i64: 1, 16>}, {transform_indices = @transform_3, window_bounds = array<i64: 128, 16>}]} {
    %c0 = arith.constant 0 : index
    %c0_0 = arith.constant 0 : index
    %c0_1 = arith.constant 0 : index
    %0 = vector.load %arg1[%c0, %c0_0, %c0_1] : memref<4x128x144xf32, #tpu.memory_space<vmem>>, vector<4x128x144xf32>
    %1 = vector.shape_cast %0 : vector<4x128x144xf32> to vector<512x144xf32>
    %c0_2 = arith.constant 0 : index
    %c0_3 = arith.constant 0 : index
    %2 = vector.load %arg2[%c0_2, %c0_3] : memref<144x16xf32, #tpu.memory_space<vmem>>, vector<144x16xf32>
    %cst = arith.constant dense<0.000000e+00> : vector<512x16xf32>
    %3 = tpu.matmul %1, %2, %cst {dimension_numbers = #tpu.dot_dimension_numbers<[1], [0], [0], [1], [0, 0, 1, 1], [], []>} : vector<512x144xf32>, vector<144x16xf32>, vector<512x16xf32> -> vector<512x16xf32>
    %c0_4 = arith.constant 0 : index
    %c0_5 = arith.constant 0 : index
    %4 = vector.load %arg3[%c0_4, %c0_5] : memref<1x16xf32, #tpu.memory_space<vmem>>, vector<1x16xf32>
    %5 = vector.broadcast %4 : vector<1x16xf32> to vector<512x16xf32>
    %6 = arith.addf %3, %5 : vector<512x16xf32>
    %cst_6 = arith.constant 0.000000e+00 : f32
    %7 = vector.broadcast %cst_6 : f32 to vector<512x16xf32>
    %8 = arith.maximumf %6, %7 : vector<512x16xf32>
    %9 = vector.shape_cast %8 : vector<512x16xf32> to vector<4x128x16xf32>
    %10 = vector.extract_strided_slice %9 {offsets = [0, 0, 0], sizes = [1, 128, 16], strides = [1, 1, 1]} : vector<4x128x16xf32> to vector<1x128x16xf32>
    %11 = vector.shape_cast %10 : vector<1x128x16xf32> to vector<128x16xf32>
    %12 = vector.extract_strided_slice %9 {offsets = [1, 0, 0], sizes = [1, 128, 16], strides = [1, 1, 1]} : vector<4x128x16xf32> to vector<1x128x16xf32>
    %13 = vector.shape_cast %12 : vector<1x128x16xf32> to vector<128x16xf32>
    %14 = arith.maximumf %11, %13 : vector<128x16xf32>
    %15 = vector.extract_strided_slice %9 {offsets = [2, 0, 0], sizes = [1, 128, 16], strides = [1, 1, 1]} : vector<4x128x16xf32> to vector<1x128x16xf32>
    %16 = vector.shape_cast %15 : vector<1x128x16xf32> to vector<128x16xf32>
    %17 = vector.extract_strided_slice %9 {offsets = [3, 0, 0], sizes = [1, 128, 16], strides = [1, 1, 1]} : vector<4x128x16xf32> to vector<1x128x16xf32>
    %18 = vector.shape_cast %17 : vector<1x128x16xf32> to vector<128x16xf32>
    %19 = arith.maximumf %16, %18 : vector<128x16xf32>
    %20 = arith.maximumf %14, %19 : vector<128x16xf32>
    %c0_7 = arith.constant 0 : index
    %c0_8 = arith.constant 0 : index
    %21 = vector.load %arg4[%c0_7, %c0_8] : memref<128x16xf32, #tpu.memory_space<vmem>>, vector<128x16xf32>
    tpu.vector_store %arg4[%c0_7, %c0_8], %20 {strides = array<i32>} : memref<128x16xf32, #tpu.memory_space<vmem>>, vector<128x16xf32>,
    return
  }
  func.func @transform_0(%arg0: i32) -> (i32, i32, i32) {
    %c0_i32 = arith.constant 0 : i32
    %c0_i32_0 = arith.constant 0 : i32
    %c0_i32_1 = arith.constant 0 : i32
    return %c0_i32, %arg0, %c0_i32_0 : i32, i32, i32
  }
  func.func @transform_1(%arg0: i32) -> (i32, i32) {
    %c0_i32 = arith.constant 0 : i32
    %c0_i32_0 = arith.constant 0 : i32
    %c0_i32_1 = arith.constant 0 : i32
    return %c0_i32, %c0_i32_0 : i32, i32
  }
  func.func @transform_2(%arg0: i32) -> (i32, i32) {
    %c0_i32 = arith.constant 0 : i32
    %c0_i32_0 = arith.constant 0 : i32
    %c0_i32_1 = arith.constant 0 : i32
    return %c0_i32, %c0_i32_0 : i32, i32
  }
  func.func @transform_3(%arg0: i32) -> (i32, i32) {
    %c0_i32 = arith.constant 0 : i32
    %c0_i32_0 = arith.constant 0 : i32
    return %arg0, %c0_i32 : i32, i32
  }
}

module attributes {stable_mosaic.version = 11 : i64} {
  func.func @conv_bn_relu_pool_kernel(%arg0: i32, %arg1: memref<4x32x144xf32, #tpu.memory_space<vmem>>, %arg2: memref<144x16xf32, #tpu.memory_space<vmem>>, %arg3: memref<1x16xf32, #tpu.memory_space<vmem>>, %arg4: memref<32x16xf32, #tpu.memory_space<vmem>>) attributes {dimension_semantics = [#tpu.dimension_semantics<parallel>], iteration_bounds = array<i64: 1>, scalar_prefetch = 0 : i64, scratch_operands = 0 : i64, tpu.core_type = #tpu.core_type<tc>, window_params = [{transform_indices = @transform_0, window_bounds = array<i64: 4, 32, 144>}, {pipeline_mode = #tpu.pipeline_mode<synchronous>, transform_indices = @transform_1, window_bounds = array<i64: 144, 16>}, {pipeline_mode = #tpu.pipeline_mode<synchronous>, transform_indices = @transform_2, window_bounds = array<i64: 1, 16>}, {transform_indices = @transform_3, window_bounds = array<i64: 32, 16>}]} {
    %c0 = arith.constant 0 : index
    %c0_0 = arith.constant 0 : index
    %c0_1 = arith.constant 0 : index
    %0 = vector.load %arg1[%c0, %c0_0, %c0_1] : memref<4x32x144xf32, #tpu.memory_space<vmem>>, vector<4x32x144xf32>
    %1 = vector.shape_cast %0 : vector<4x32x144xf32> to vector<128x144xf32>
    %c0_2 = arith.constant 0 : index
    %c0_3 = arith.constant 0 : index
    %2 = vector.load %arg2[%c0_2, %c0_3] : memref<144x16xf32, #tpu.memory_space<vmem>>, vector<144x16xf32>
    %cst = arith.constant dense<0.000000e+00> : vector<128x16xf32>
    %3 = tpu.matmul %1, %2, %cst {dimension_numbers = #tpu.dot_dimension_numbers<[1], [0], [0], [1], [0, 0, 1, 1], [], []>} : vector<128x144xf32>, vector<144x16xf32>, vector<128x16xf32> -> vector<128x16xf32>
    %c0_4 = arith.constant 0 : index
    %c0_5 = arith.constant 0 : index
    %4 = vector.load %arg3[%c0_4, %c0_5] : memref<1x16xf32, #tpu.memory_space<vmem>>, vector<1x16xf32>
    %5 = vector.broadcast %4 : vector<1x16xf32> to vector<128x16xf32>
    %6 = arith.addf %3, %5 : vector<128x16xf32>
    %cst_6 = arith.constant 0.000000e+00 : f32
    %7 = vector.broadcast %cst_6 : f32 to vector<128x16xf32>
    %8 = arith.maximumf %6, %7 : vector<128x16xf32>
    %9 = vector.shape_cast %8 : vector<128x16xf32> to vector<4x32x16xf32>
    %10 = vector.extract_strided_slice %9 {offsets = [0, 0, 0], sizes = [1, 32, 16], strides = [1, 1, 1]} : vector<4x32x16xf32> to vector<1x32x16xf32>
    %11 = vector.shape_cast %10 : vector<1x32x16xf32> to vector<32x16xf32>
    %12 = vector.extract_strided_slice %9 {offsets = [1, 0, 0], sizes = [1, 32, 16], strides = [1, 1, 1]} : vector<4x32x16xf32> to vector<1x32x16xf32>
    %13 = vector.shape_cast %12 : vector<1x32x16xf32> to vector<32x16xf32>
    %14 = arith.maximumf %11, %13 : vector<32x16xf32>
    %15 = vector.extract_strided_slice %9 {offsets = [2, 0, 0], sizes = [1, 32, 16], strides = [1, 1, 1]} : vector<4x32x16xf32> to vector<1x32x16xf32>
    %16 = vector.shape_cast %15 : vector<1x32x16xf32> to vector<32x16xf32>
    %17 = vector.extract_strided_slice %9 {offsets = [3, 0, 0], sizes = [1, 32, 16], strides = [1, 1, 1]} : vector<4x32x16xf32> to vector<1x32x16xf32>
    %18 = vector.shape_cast %17 : vector<1x32x16xf32> to vector<32x16xf32>
    %19 = arith.maximumf %16, %18 : vector<32x16xf32>
    %20 = arith.maximumf %14, %19 : vector<32x16xf32>
    %c0_7 = arith.constant 0 : index
    %c0_8 = arith.constant 0 : index
    %21 = vector.load %arg4[%c0_7, %c0_8] : memref<32x16xf32, #tpu.memory_space<vmem>>, vector<32x16xf32>
    tpu.vector_store %arg4[%c0_7, %c0_8], %20 {strides = array<i32>} : memref<32x16xf32, #tpu.memory_space<vmem>>, vector<32x16xf32>,
    return
  }
  func.func @transform_0(%arg0: i32) -> (i32, i32, i32) {
    %c0_i32 = arith.constant 0 : i32
    %c0_i32_0 = arith.constant 0 : i32
    %c0_i32_1 = arith.constant 0 : i32
    return %c0_i32, %arg0, %c0_i32_0 : i32, i32, i32
  }
  func.func @transform_1(%arg0: i32) -> (i32, i32) {
    %c0_i32 = arith.constant 0 : i32
    %c0_i32_0 = arith.constant 0 : i32
    %c0_i32_1 = arith.constant 0 : i32
    return %c0_i32, %c0_i32_0 : i32, i32
  }
  func.func @transform_2(%arg0: i32) -> (i32, i32) {
    %c0_i32 = arith.constant 0 : i32
    %c0_i32_0 = arith.constant 0 : i32
    %c0_i32_1 = arith.constant 0 : i32
    return %c0_i32, %c0_i32_0 : i32, i32
  }
  func.func @transform_3(%arg0: i32) -> (i32, i32) {
    %c0_i32 = arith.constant 0 : i32
    %c0_i32_0 = arith.constant 0 : i32
    return %arg0, %c0_i32 : i32, i32
  }
}

module attributes {stable_mosaic.version = 11 : i64} {
  func.func @conv_bn_relu_pool_kernel(%arg0: i32, %arg1: memref<4x8x144xf32, #tpu.memory_space<vmem>>, %arg2: memref<144x32xf32, #tpu.memory_space<vmem>>, %arg3: memref<1x32xf32, #tpu.memory_space<vmem>>, %arg4: memref<8x32xf32, #tpu.memory_space<vmem>>) attributes {dimension_semantics = [#tpu.dimension_semantics<parallel>], iteration_bounds = array<i64: 1>, scalar_prefetch = 0 : i64, scratch_operands = 0 : i64, tpu.core_type = #tpu.core_type<tc>, window_params = [{transform_indices = @transform_0, window_bounds = array<i64: 4, 8, 144>}, {pipeline_mode = #tpu.pipeline_mode<synchronous>, transform_indices = @transform_1, window_bounds = array<i64: 144, 32>}, {pipeline_mode = #tpu.pipeline_mode<synchronous>, transform_indices = @transform_2, window_bounds = array<i64: 1, 32>}, {transform_indices = @transform_3, window_bounds = array<i64: 8, 32>}]} {
    %c0 = arith.constant 0 : index
    %c0_0 = arith.constant 0 : index
    %c0_1 = arith.constant 0 : index
    %0 = vector.load %arg1[%c0, %c0_0, %c0_1] : memref<4x8x144xf32, #tpu.memory_space<vmem>>, vector<4x8x144xf32>
    %1 = vector.shape_cast %0 : vector<4x8x144xf32> to vector<32x144xf32>
    %c0_2 = arith.constant 0 : index
    %c0_3 = arith.constant 0 : index
    %2 = vector.load %arg2[%c0_2, %c0_3] : memref<144x32xf32, #tpu.memory_space<vmem>>, vector<144x32xf32>
    %cst = arith.constant dense<0.000000e+00> : vector<32x32xf32>
    %3 = tpu.matmul %1, %2, %cst {dimension_numbers = #tpu.dot_dimension_numbers<[1], [0], [0], [1], [0, 0, 1, 1], [], []>} : vector<32x144xf32>, vector<144x32xf32>, vector<32x32xf32> -> vector<32x32xf32>
    %c0_4 = arith.constant 0 : index
    %c0_5 = arith.constant 0 : index
    %4 = vector.load %arg3[%c0_4, %c0_5] : memref<1x32xf32, #tpu.memory_space<vmem>>, vector<1x32xf32>
    %5 = vector.broadcast %4 : vector<1x32xf32> to vector<32x32xf32>
    %6 = arith.addf %3, %5 : vector<32x32xf32>
    %cst_6 = arith.constant 0.000000e+00 : f32
    %7 = vector.broadcast %cst_6 : f32 to vector<32x32xf32>
    %8 = arith.maximumf %6, %7 : vector<32x32xf32>
    %9 = vector.shape_cast %8 : vector<32x32xf32> to vector<4x8x32xf32>
    %10 = vector.extract_strided_slice %9 {offsets = [0, 0, 0], sizes = [1, 8, 32], strides = [1, 1, 1]} : vector<4x8x32xf32> to vector<1x8x32xf32>
    %11 = vector.shape_cast %10 : vector<1x8x32xf32> to vector<8x32xf32>
    %12 = vector.extract_strided_slice %9 {offsets = [1, 0, 0], sizes = [1, 8, 32], strides = [1, 1, 1]} : vector<4x8x32xf32> to vector<1x8x32xf32>
    %13 = vector.shape_cast %12 : vector<1x8x32xf32> to vector<8x32xf32>
    %14 = arith.maximumf %11, %13 : vector<8x32xf32>
    %15 = vector.extract_strided_slice %9 {offsets = [2, 0, 0], sizes = [1, 8, 32], strides = [1, 1, 1]} : vector<4x8x32xf32> to vector<1x8x32xf32>
    %16 = vector.shape_cast %15 : vector<1x8x32xf32> to vector<8x32xf32>
    %17 = vector.extract_strided_slice %9 {offsets = [3, 0, 0], sizes = [1, 8, 32], strides = [1, 1, 1]} : vector<4x8x32xf32> to vector<1x8x32xf32>
    %18 = vector.shape_cast %17 : vector<1x8x32xf32> to vector<8x32xf32>
    %19 = arith.maximumf %16, %18 : vector<8x32xf32>
    %20 = arith.maximumf %14, %19 : vector<8x32xf32>
    %c0_7 = arith.constant 0 : index
    %c0_8 = arith.constant 0 : index
    %21 = vector.load %arg4[%c0_7, %c0_8] : memref<8x32xf32, #tpu.memory_space<vmem>>, vector<8x32xf32>
    tpu.vector_store %arg4[%c0_7, %c0_8], %20 {strides = array<i32>} : memref<8x32xf32, #tpu.memory_space<vmem>>, vector<8x32xf32>,
    return
  }
  func.func @transform_0(%arg0: i32) -> (i32, i32, i32) {
    %c0_i32 = arith.constant 0 : i32
    %c0_i32_0 = arith.constant 0 : i32
    %c0_i32_1 = arith.constant 0 : i32
    return %c0_i32, %arg0, %c0_i32_0 : i32, i32, i32
  }
  func.func @transform_1(%arg0: i32) -> (i32, i32) {
    %c0_i32 = arith.constant 0 : i32
    %c0_i32_0 = arith.constant 0 : i32
    %c0_i32_1 = arith.constant 0 : i32
    return %c0_i32, %c0_i32_0 : i32, i32
  }
  func.func @transform_2(%arg0: i32) -> (i32, i32) {
    %c0_i32 = arith.constant 0 : i32
    %c0_i32_0 = arith.constant 0 : i32
    %c0_i32_1 = arith.constant 0 : i32
    return %c0_i32, %c0_i32_0 : i32, i32
  }
  func.func @transform_3(%arg0: i32) -> (i32, i32) {
    %c0_i32 = arith.constant 0 : i32
    %c0_i32_0 = arith.constant 0 : i32
    return %arg0, %c0_i32 : i32, i32
  }
}

module attributes {stable_mosaic.version = 11 : i64} {
  func.func @conv_bn_relu_pool_kernel(%arg0: i32, %arg1: memref<4x8x288xf32, #tpu.memory_space<vmem>>, %arg2: memref<288x32xf32, #tpu.memory_space<vmem>>, %arg3: memref<1x32xf32, #tpu.memory_space<vmem>>, %arg4: memref<8x32xf32, #tpu.memory_space<vmem>>) attributes {dimension_semantics = [#tpu.dimension_semantics<parallel>], iteration_bounds = array<i64: 1>, scalar_prefetch = 0 : i64, scratch_operands = 0 : i64, tpu.core_type = #tpu.core_type<tc>, window_params = [{transform_indices = @transform_0, window_bounds = array<i64: 4, 8, 288>}, {pipeline_mode = #tpu.pipeline_mode<synchronous>, transform_indices = @transform_1, window_bounds = array<i64: 288, 32>}, {pipeline_mode = #tpu.pipeline_mode<synchronous>, transform_indices = @transform_2, window_bounds = array<i64: 1, 32>}, {transform_indices = @transform_3, window_bounds = array<i64: 8, 32>}]} {
    %c0 = arith.constant 0 : index
    %c0_0 = arith.constant 0 : index
    %c0_1 = arith.constant 0 : index
    %0 = vector.load %arg1[%c0, %c0_0, %c0_1] : memref<4x8x288xf32, #tpu.memory_space<vmem>>, vector<4x8x288xf32>
    %1 = vector.shape_cast %0 : vector<4x8x288xf32> to vector<32x288xf32>
    %c0_2 = arith.constant 0 : index
    %c0_3 = arith.constant 0 : index
    %2 = vector.load %arg2[%c0_2, %c0_3] : memref<288x32xf32, #tpu.memory_space<vmem>>, vector<288x32xf32>
    %cst = arith.constant dense<0.000000e+00> : vector<32x32xf32>
    %3 = tpu.matmul %1, %2, %cst {dimension_numbers = #tpu.dot_dimension_numbers<[1], [0], [0], [1], [0, 0, 1, 1], [], []>} : vector<32x288xf32>, vector<288x32xf32>, vector<32x32xf32> -> vector<32x32xf32>
    %c0_4 = arith.constant 0 : index
    %c0_5 = arith.constant 0 : index
    %4 = vector.load %arg3[%c0_4, %c0_5] : memref<1x32xf32, #tpu.memory_space<vmem>>, vector<1x32xf32>
    %5 = vector.broadcast %4 : vector<1x32xf32> to vector<32x32xf32>
    %6 = arith.addf %3, %5 : vector<32x32xf32>
    %cst_6 = arith.constant 0.000000e+00 : f32
    %7 = vector.broadcast %cst_6 : f32 to vector<32x32xf32>
    %8 = arith.maximumf %6, %7 : vector<32x32xf32>
    %9 = vector.shape_cast %8 : vector<32x32xf32> to vector<4x8x32xf32>
    %10 = vector.extract_strided_slice %9 {offsets = [0, 0, 0], sizes = [1, 8, 32], strides = [1, 1, 1]} : vector<4x8x32xf32> to vector<1x8x32xf32>
    %11 = vector.shape_cast %10 : vector<1x8x32xf32> to vector<8x32xf32>
    %12 = vector.extract_strided_slice %9 {offsets = [1, 0, 0], sizes = [1, 8, 32], strides = [1, 1, 1]} : vector<4x8x32xf32> to vector<1x8x32xf32>
    %13 = vector.shape_cast %12 : vector<1x8x32xf32> to vector<8x32xf32>
    %14 = arith.maximumf %11, %13 : vector<8x32xf32>
    %15 = vector.extract_strided_slice %9 {offsets = [2, 0, 0], sizes = [1, 8, 32], strides = [1, 1, 1]} : vector<4x8x32xf32> to vector<1x8x32xf32>
    %16 = vector.shape_cast %15 : vector<1x8x32xf32> to vector<8x32xf32>
    %17 = vector.extract_strided_slice %9 {offsets = [3, 0, 0], sizes = [1, 8, 32], strides = [1, 1, 1]} : vector<4x8x32xf32> to vector<1x8x32xf32>
    %18 = vector.shape_cast %17 : vector<1x8x32xf32> to vector<8x32xf32>
    %19 = arith.maximumf %16, %18 : vector<8x32xf32>
    %20 = arith.maximumf %14, %19 : vector<8x32xf32>
    %c0_7 = arith.constant 0 : index
    %c0_8 = arith.constant 0 : index
    %21 = vector.load %arg4[%c0_7, %c0_8] : memref<8x32xf32, #tpu.memory_space<vmem>>, vector<8x32xf32>
    tpu.vector_store %arg4[%c0_7, %c0_8], %20 {strides = array<i32>} : memref<8x32xf32, #tpu.memory_space<vmem>>, vector<8x32xf32>,
    return
  }
  func.func @transform_0(%arg0: i32) -> (i32, i32, i32) {
    %c0_i32 = arith.constant 0 : i32
    %c0_i32_0 = arith.constant 0 : i32
    %c0_i32_1 = arith.constant 0 : i32
    return %c0_i32, %arg0, %c0_i32_0 : i32, i32, i32
  }
  func.func @transform_1(%arg0: i32) -> (i32, i32) {
    %c0_i32 = arith.constant 0 : i32
    %c0_i32_0 = arith.constant 0 : i32
    %c0_i32_1 = arith.constant 0 : i32
    return %c0_i32, %c0_i32_0 : i32, i32
  }
  func.func @transform_2(%arg0: i32) -> (i32, i32) {
    %c0_i32 = arith.constant 0 : i32
    %c0_i32_0 = arith.constant 0 : i32
    %c0_i32_1 = arith.constant 0 : i32
    return %c0_i32, %c0_i32_0 : i32, i32
  }
  func.func @transform_3(%arg0: i32) -> (i32, i32) {
    %c0_i32 = arith.constant 0 : i32
    %c0_i32_0 = arith.constant 0 : i32
    return %arg0, %c0_i32 : i32, i32
  }
}

module attributes {stable_mosaic.version = 11 : i64} {
  func.func @final_block_kernel(%arg0: i32, %arg1: memref<128x288xf32, #tpu.memory_space<vmem>>, %arg2: memref<288x64xf32, #tpu.memory_space<vmem>>, %arg3: memref<1x64xf32, #tpu.memory_space<vmem>>, %arg4: memref<2x128xf32, #tpu.memory_space<vmem>>, %arg5: memref<64x20xf32, #tpu.memory_space<vmem>>, %arg6: memref<1x20xf32, #tpu.memory_space<vmem>>, %arg7: memref<2x20xf32, #tpu.memory_space<vmem>>, %arg8: memref<2x64xf32, #tpu.memory_space<vmem>>) attributes {dimension_semantics = [#tpu.dimension_semantics<arbitrary>], iteration_bounds = array<i64: 1>, scalar_prefetch = 0 : i64, scratch_operands = 1 : i64, tpu.core_type = #tpu.core_type<tc>, window_params = [{transform_indices = @transform_0, window_bounds = array<i64: 128, 288>}, {pipeline_mode = #tpu.pipeline_mode<synchronous>, transform_indices = @transform_1, window_bounds = array<i64: 288, 64>}, {pipeline_mode = #tpu.pipeline_mode<synchronous>, transform_indices = @transform_2, window_bounds = array<i64: 1, 64>}, {transform_indices = @transform_3, window_bounds = array<i64: 2, 128>}, {pipeline_mode = #tpu.pipeline_mode<synchronous>, transform_indices = @transform_4, window_bounds = array<i64: 64, 20>}, {pipeline_mode = #tpu.pipeline_mode<synchronous>, transform_indices = @transform_5, window_bounds = array<i64: 1, 20>}, {pipeline_mode = #tpu.pipeline_mode<synchronous>, transform_indices = @transform_6, window_bounds = array<i64: 2, 20>}]} {
    %c0_i32 = arith.constant 0 : i32
    %0 = arith.cmpi eq, %arg0, %c0_i32 : i32
    %1 = arith.extui %0 : i1 to i32
    %c0_i32_0 = arith.constant 0 : i32
    %2 = arith.cmpi ne, %1, %c0_i32_0 : i32
    scf.if %2 {
      %cst_16 = arith.constant 0.000000e+00 : f32
      %19 = vector.broadcast %cst_16 : f32 to vector<2x64xf32>
      %c0_17 = arith.constant 0 : index
      %c0_18 = arith.constant 0 : index
      %20 = vector.load %arg8[%c0_17, %c0_18] : memref<2x64xf32, #tpu.memory_space<vmem>>, vector<2x64xf32>
      tpu.vector_store %arg8[%c0_17, %c0_18], %19 {strides = array<i32>} : memref<2x64xf32, #tpu.memory_space<vmem>>, vector<2x64xf32>,
    } else {
    }
    %c0 = arith.constant 0 : index
    %c0_1 = arith.constant 0 : index
    %3 = vector.load %arg1[%c0, %c0_1] : memref<128x288xf32, #tpu.memory_space<vmem>>, vector<128x288xf32>
    %c0_2 = arith.constant 0 : index
    %c0_3 = arith.constant 0 : index
    %4 = vector.load %arg2[%c0_2, %c0_3] : memref<288x64xf32, #tpu.memory_space<vmem>>, vector<288x64xf32>
    %cst = arith.constant dense<0.000000e+00> : vector<128x64xf32>
    %5 = tpu.matmul %3, %4, %cst {dimension_numbers = #tpu.dot_dimension_numbers<[1], [0], [0], [1], [0, 0, 1, 1], [], []>} : vector<128x288xf32>, vector<288x64xf32>, vector<128x64xf32> -> vector<128x64xf32>
    %c0_4 = arith.constant 0 : index
    %c0_5 = arith.constant 0 : index
    %6 = vector.load %arg3[%c0_4, %c0_5] : memref<1x64xf32, #tpu.memory_space<vmem>>, vector<1x64xf32>
    %7 = vector.broadcast %6 : vector<1x64xf32> to vector<128x64xf32>
    %8 = arith.addf %5, %7 : vector<128x64xf32>
    %cst_6 = arith.constant 0.000000e+00 : f32
    %9 = vector.broadcast %cst_6 : f32 to vector<128x64xf32>
    %10 = arith.maximumf %8, %9 : vector<128x64xf32>
    %c0_7 = arith.constant 0 : index
    %c0_8 = arith.constant 0 : index
    %11 = vector.load %arg8[%c0_7, %c0_8] : memref<2x64xf32, #tpu.memory_space<vmem>>, vector<2x64xf32>
    %c0_9 = arith.constant 0 : index
    %c0_10 = arith.constant 0 : index
    %12 = vector.load %arg4[%c0_9, %c0_10] : memref<2x128xf32, #tpu.memory_space<vmem>>, vector<2x128xf32>
    %cst_11 = arith.constant dense<0.000000e+00> : vector<2x64xf32>
    %13 = tpu.matmul %12, %10, %cst_11 {dimension_numbers = #tpu.dot_dimension_numbers<[1], [0], [0], [1], [0, 0, 1, 1], [], []>} : vector<2x128xf32>, vector<128x64xf32>, vector<2x64xf32> -> vector<2x64xf32>
    %14 = arith.addf %11, %13 : vector<2x64xf32>
    %c0_12 = arith.constant 0 : index
    %c0_13 = arith.constant 0 : index
    %15 = vector.load %arg8[%c0_12, %c0_13] : memref<2x64xf32, #tpu.memory_space<vmem>>, vector<2x64xf32>
    tpu.vector_store %arg8[%c0_12, %c0_13], %14 {strides = array<i32>} : memref<2x64xf32, #tpu.memory_space<vmem>>, vector<2x64xf32>,
    %c0_i32_14 = arith.constant 0 : i32
    %16 = arith.cmpi eq, %arg0, %c0_i32_14 : i32
    %17 = arith.extui %16 : i1 to i32
    %c0_i32_15 = arith.constant 0 : i32
    %18 = arith.cmpi ne, %17, %c0_i32_15 : i32
    scf.if %18 {
      %c0_16 = arith.constant 0 : index
      %c0_17 = arith.constant 0 : index
      %19 = vector.load %arg8[%c0_16, %c0_17] : memref<2x64xf32, #tpu.memory_space<vmem>>, vector<2x64xf32>
      %c0_18 = arith.constant 0 : index
      %c0_19 = arith.constant 0 : index
      %20 = vector.load %arg5[%c0_18, %c0_19] : memref<64x20xf32, #tpu.memory_space<vmem>>, vector<64x20xf32>
      %cst_20 = arith.constant dense<0.000000e+00> : vector<2x20xf32>
      %21 = tpu.matmul %19, %20, %cst_20 {dimension_numbers = #tpu.dot_dimension_numbers<[1], [0], [0], [1], [0, 0, 1, 1], [], []>} : vector<2x64xf32>, vector<64x20xf32>, vector<2x20xf32> -> vector<2x20xf32>
      %c0_21 = arith.constant 0 : index
      %c0_22 = arith.constant 0 : index
      %22 = vector.load %arg6[%c0_21, %c0_22] : memref<1x20xf32, #tpu.memory_space<vmem>>, vector<1x20xf32>
      %23 = vector.broadcast %22 : vector<1x20xf32> to vector<2x20xf32>
      %24 = arith.addf %21, %23 : vector<2x20xf32>
      %c0_23 = arith.constant 0 : index
      %c0_24 = arith.constant 0 : index
      %25 = vector.load %arg7[%c0_23, %c0_24] : memref<2x20xf32, #tpu.memory_space<vmem>>, vector<2x20xf32>
      tpu.vector_store %arg7[%c0_23, %c0_24], %24 {strides = array<i32>} : memref<2x20xf32, #tpu.memory_space<vmem>>, vector<2x20xf32>,
    } else {
    }
    return
  }
  func.func @transform_0(%arg0: i32) -> (i32, i32) {
    %c0_i32 = arith.constant 0 : i32
    %c0_i32_0 = arith.constant 0 : i32
    return %arg0, %c0_i32 : i32, i32
  }
  func.func @transform_1(%arg0: i32) -> (i32, i32) {
    %c0_i32 = arith.constant 0 : i32
    %c0_i32_0 = arith.constant 0 : i32
    %c0_i32_1 = arith.constant 0 : i32
    return %c0_i32, %c0_i32_0 : i32, i32
  }
  func.func @transform_2(%arg0: i32) -> (i32, i32) {
    %c0_i32 = arith.constant 0 : i32
    %c0_i32_0 = arith.constant 0 : i32
    %c0_i32_1 = arith.constant 0 : i32
    return %c0_i32, %c0_i32_0 : i32, i32
  }
  func.func @transform_3(%arg0: i32) -> (i32, i32) {
    %c0_i32 = arith.constant 0 : i32
    %c0_i32_0 = arith.constant 0 : i32
    return %c0_i32, %arg0 : i32, i32
  }
  func.func @transform_4(%arg0: i32) -> (i32, i32) {
    %c0_i32 = arith.constant 0 : i32
    %c0_i32_0 = arith.constant 0 : i32
    %c0_i32_1 = arith.constant 0 : i32
    return %c0_i32, %c0_i32_0 : i32, i32
  }
  func.func @transform_5(%arg0: i32) -> (i32, i32) {
    %c0_i32 = arith.constant 0 : i32
    %c0_i32_0 = arith.constant 0 : i32
    %c0_i32_1 = arith.constant 0 : i32
    return %c0_i32, %c0_i32_0 : i32, i32
  }
  func.func @transform_6(%arg0: i32) -> (i32, i32) {
    %c0_i32 = arith.constant 0 : i32
    %c0_i32_0 = arith.constant 0 : i32
    %c0_i32_1 = arith.constant 0 : i32
    return %c0_i32, %c0_i32_0 : i32, i32
  }
}

</mosaic_0001>

<bundles_post_ra>
// kernel: glyphnet_forward.6
= control target key start
LH: loop header
LB: loop body
LE: loop exit
PB: predicated region body
PF: predicated region fallthrough
CT: control target
= control target key end

     0   :  { %vm1048_vm0 = vcmask 1040384   ;;  %vm279_vm1 = vcmask 72704   ;;  %vm2845_vm2 = vcmask 130048   ;;  %s6402_s1 = inlined_call_operand.vmem [shape: f32[9,16], index: 1, kind: input, shape index: {}]   ;;  %s6403_s0 = inlined_call_operand.vmem [shape: f32[4,512,9], index: 0, kind: input, shape index: {}]   ;;  %s6404_s2 = inlined_call_operand.vmem [shape: f32[1,16], index: 2, kind: input, shape index: {}]   ;;  %s6405_s3 = inlined_call_operand.vmem [shape: f32[512,16], index: 3, kind: output, shape index: {}]  }
   0x1   :  { %v271_v0 = vld [vmem:[%s6402_s1 + $0x8] sm:$0x1]  ;;  %v270_v1 = vld [vmem:[%s6402_s1] sm:$0xff]  ;;  %v16_v6 = vld [vmem:[%s6403_s0 + $0x10] sm:$0xff] }
   0x2   :  { %3430 = vmatprep.subr.msk.mxu0 %vm1048_vm0, %v271_v0  ;;  %3818 = vmatprep.subr.msk.mxu1 %vm1048_vm0, %v271_v0  ;;  %v14_v2 = vld [vmem:[%s6403_s0] sm:$0xff]  ;;  %v15_v4 = vld [vmem:[%s6403_s0 + $0x8] sm:$0xff]  ;;  %v144_v7 = vld [vmem:[%s6403_s0 + $0x410] sm:$0xff] }
   0x3   :  { %3431 = vmatpush3.msk.msra.mxu0 %vm1048_vm0, %v271_v0  ;;  %3820 = vmatpush3.msk.msra.mxu1 %vm1048_vm0, %v271_v0  ;;  %v142_v3 = vld [vmem:[%s6403_s0 + $0x400] sm:$0xff]  ;;  %v143_v5 = vld [vmem:[%s6403_s0 + $0x408] sm:$0xff]  ;;  %v17_v8 = vld [vmem:[%s6403_s0 + $0x18] sm:$0xff] }
   0x4   :  { %3432 = vmatprep.subr.mxu0 %v270_v1  ;;  %3819 = vmatprep.subr.mxu1 %v270_v1  ;;  %v145_v9 = vld [vmem:[%s6403_s0 + $0x418] sm:$0xff]  ;;  %v18_v10 = vld [vmem:[%s6403_s0 + $0x20] sm:$0xff]  ;;  %v19_v12 = vld [vmem:[%s6403_s0 + $0x28] sm:$0xff] }
   0x5   :  { %3433 = vmatpush3.msra.mxu0 %v270_v1  ;;  %3821 = vmatpush3.msra.mxu1 %v270_v1  ;;  %v146_v11 = vld [vmem:[%s6403_s0 + $0x420] sm:$0xff]  ;;  %v147_v13 = vld [vmem:[%s6403_s0 + $0x428] sm:$0xff]  ;;  %v20_v14 = vld [vmem:[%s6403_s0 + $0x30] sm:$0xff] }
   0x6   :  { %3434 = vmatprep.mubr.msk.f32.mxu0 %vm279_vm1, %v14_v2  ;;  %3626 = vmatprep.mubr.msk.f32.mxu1 %vm279_vm1, %v142_v3  ;;  %v148_v15 = vld [vmem:[%s6403_s0 + $0x430] sm:$0xff]  ;;  %v21_v16 = vld [vmem:[%s6403_s0 + $0x38] sm:$0xff]  ;;  %v22_v18 = vld [vmem:[%s6403_s0 + $0x40] sm:$0xff] }
   0x7   :  { %3435 = vmatmul.mubr.msk.f32.vlgmr.msra.gmra.mxu0 %vm279_vm1, %v15_v4  ;;  %3627 = vmatmul.mubr.msk.f32.vlgmr.msra.gmra.mxu1 %vm279_vm1, %v143_v5  ;;  %v149_v17 = vld [vmem:[%s6403_s0 + $0x438] sm:$0xff]  ;;  %v150_v19 = vld [vmem:[%s6403_s0 + $0x440] sm:$0xff]  ;;  %v23_v20 = vld [vmem:[%s6403_s0 + $0x48] sm:$0xff] }
   0x8   :  { %3437 = vmatprep.mubr.msk.f32.mxu0 %vm279_vm1, %v16_v6  ;;  %3629 = vmatprep.mubr.msk.f32.mxu1 %vm279_vm1, %v144_v7  ;;  %v151_v21 = vld [vmem:[%s6403_s0 + $0x448] sm:$0xff]  ;;  %v24_v22 = vld [vmem:[%s6403_s0 + $0x50] sm:$0xff]  ;;  %v25_v24 = vld [vmem:[%s6403_s0 + $0x58] sm:$0xff] }
   0x9   :  { %v152_v23 = vld [vmem:[%s6403_s0 + $0x450] sm:$0xff]  ;;  %v153_v25 = vld [vmem:[%s6403_s0 + $0x458] sm:$0xff]  ;;  %v26_v26 = vld [vmem:[%s6403_s0 + $0x60] sm:$0xff] }
   0xa   :  { %v154_v27 = vld [vmem:[%s6403_s0 + $0x460] sm:$0xff]  ;;  %v27_v28 = vld [vmem:[%s6403_s0 + $0x68] sm:$0xff]  ;;  %v28_v30 = vld [vmem:[%s6403_s0 + $0x70] sm:$0xff] }
   0xb   :  { %3438 = vmatmul.mubr.msk.f32.gmra.mxu0 %vm279_vm1, %v17_v8  ;;  %3630 = vmatmul.mubr.msk.f32.gmra.mxu1 %vm279_vm1, %v145_v9  ;;  %v155_v29 = vld [vmem:[%s6403_s0 + $0x468] sm:$0xff]  ;;  %v156_v31 = vld [vmem:[%s6403_s0 + $0x470] sm:$0xff]  ;;  %v29_v32 = vld [vmem:[%s6403_s0 + $0x78] sm:$0xff] }
   0xc   :  { %3440 = vmatprep.mubr.msk.f32.mxu0 %vm279_vm1, %v18_v10  ;;  %3632 = vmatprep.mubr.msk.f32.mxu1 %vm279_vm1, %v146_v11  ;;  %v157_v33 = vld [vmem:[%s6403_s0 + $0x478] sm:$0xff]  ;;  %v30_v34 = vld [vmem:[%s6403_s0 + $0x80] sm:$0xff]  ;;  %v31_v36 = vld [vmem:[%s6403_s0 + $0x88] sm:$0xff] }
   0xd   :  { %v158_v35 = vld [vmem:[%s6403_s0 + $0x480] sm:$0xff]  ;;  %v159_v37 = vld [vmem:[%s6403_s0 + $0x488] sm:$0xff]  ;;  %v32_v38 = vld [vmem:[%s6403_s0 + $0x90] sm:$0xff] }
   0xe   :  { %v160_v39 = vld [vmem:[%s6403_s0 + $0x490] sm:$0xff]  ;;  %v33_v40 = vld [vmem:[%s6403_s0 + $0x98] sm:$0xff]  ;;  %v34_v42 = vld [vmem:[%s6403_s0 + $0xa0] sm:$0xff] }
   0xf   :  { %3441 = vmatmul.mubr.msk.f32.gmra.mxu0 %vm279_vm1, %v19_v12  ;;  %3633 = vmatmul.mubr.msk.f32.gmra.mxu1 %vm279_vm1, %v147_v13  ;;  %v161_v41 = vld [vmem:[%s6403_s0 + $0x498] sm:$0xff]  ;;  %v162_v43 = vld [vmem:[%s6403_s0 + $0x4a0] sm:$0xff]  ;;  %v35_v44 = vld [vmem:[%s6403_s0 + $0xa8] sm:$0xff] }
  0x10   :  { %3443 = vmatprep.mubr.msk.f32.mxu0 %vm279_vm1, %v20_v14  ;;  %3635 = vmatprep.mubr.msk.f32.mxu1 %vm279_vm1, %v148_v15  ;;  %v163_v45 = vld [vmem:[%s6403_s0 + $0x4a8] sm:$0xff]  ;;  %v36_v46 = vld [vmem:[%s6403_s0 + $0xb0] sm:$0xff]  ;;  %v37_v48 = vld [vmem:[%s6403_s0 + $0xb8] sm:$0xff] }
  0x11   :  { %v164_v47 = vld [vmem:[%s6403_s0 + $0x4b0] sm:$0xff]  ;;  %v165_v49 = vld [vmem:[%s6403_s0 + $0x4b8] sm:$0xff]  ;;  %v38_v50 = vld [vmem:[%s6403_s0 + $0xc0] sm:$0xff] }
  0x12   :  { %v166_v51 = vld [vmem:[%s6403_s0 + $0x4c0] sm:$0xff]  ;;  %v39_v52 = vld [vmem:[%s6403_s0 + $0xc8] sm:$0xff]  ;;  %v40_v54 = vld [vmem:[%s6403_s0 + $0xd0] sm:$0xff] }
  0x13   :  { %3444 = vmatmul.mubr.msk.f32.gmra.mxu0 %vm279_vm1, %v21_v16  ;;  %3636 = vmatmul.mubr.msk.f32.gmra.mxu1 %vm279_vm1, %v149_v17  ;;  %v167_v53 = vld [vmem:[%s6403_s0 + $0x4c8] sm:$0xff]  ;;  %v168_v55 = vld [vmem:[%s6403_s0 + $0x4d0] sm:$0xff]  ;;  %v41_v56 = vld [vmem:[%s6403_s0 + $0xd8] sm:$0xff] }
  0x14   :  { %3446 = vmatprep.mubr.msk.f32.mxu0 %vm279_vm1, %v22_v18  ;;  %3638 = vmatprep.mubr.msk.f32.mxu1 %vm279_vm1, %v150_v19  ;;  %v169_v57 = vld [vmem:[%s6403_s0 + $0x4d8] sm:$0xff]  ;;  %v42_v58 = vld [vmem:[%s6403_s0 + $0xe0] sm:$0xff]  ;;  %v43_v60 = vld [vmem:[%s6403_s0 + $0xe8] sm:$0xff] }
  0x15   :  { %v170_v59 = vld [vmem:[%s6403_s0 + $0x4e0] sm:$0xff]  ;;  %v171_v61 = vld [vmem:[%s6403_s0 + $0x4e8] sm:$0xff]  ;;  %v44_v62 = vld [vmem:[%s6403_s0 + $0xf0] sm:$0xff] }
  0x16   :  { %v172_v63 = vld [vmem:[%s6403_s0 + $0x4f0] sm:$0xff]  ;;  %v45_v0 = vld [vmem:[%s6403_s0 + $0xf8] sm:$0xff]  ;;  %v46_v2 = vld [vmem:[%s6403_s0 + $0x100] sm:$0xff] }
  0x17   :  { %3447 = vmatmul.mubr.msk.f32.gmra.mxu0 %vm279_vm1, %v23_v20  ;;  %3639 = vmatmul.mubr.msk.f32.gmra.mxu1 %vm279_vm1, %v151_v21  ;;  %v173_v1 = vld [vmem:[%s6403_s0 + $0x4f8] sm:$0xff]  ;;  %v174_v3 = vld [vmem:[%s6403_s0 + $0x500] sm:$0xff]  ;;  %v47_v4 = vld [vmem:[%s6403_s0 + $0x108] sm:$0xff] }
  0x18   :  { %3449 = vmatprep.mubr.msk.f32.mxu0 %vm279_vm1, %v24_v22  ;;  %3641 = vmatprep.mubr.msk.f32.mxu1 %vm279_vm1, %v152_v23  ;;  %v175_v5 = vld [vmem:[%s6403_s0 + $0x508] sm:$0xff]  ;;  %v48_v6 = vld [vmem:[%s6403_s0 + $0x110] sm:$0xff]  ;;  %v49_v8 = vld [vmem:[%s6403_s0 + $0x118] sm:$0xff] }
  0x19   :  { %v176_v7 = vld [vmem:[%s6403_s0 + $0x510] sm:$0xff]  ;;  %v177_v9 = vld [vmem:[%s6403_s0 + $0x518] sm:$0xff]  ;;  %v50_v10 = vld [vmem:[%s6403_s0 + $0x120] sm:$0xff] }
  0x1a   :  { %v178_v11 = vld [vmem:[%s6403_s0 + $0x520] sm:$0xff]  ;;  %v51_v12 = vld [vmem:[%s6403_s0 + $0x128] sm:$0xff]  ;;  %v52_v14 = vld [vmem:[%s6403_s0 + $0x130] sm:$0xff] }
  0x1b   :  { %3450 = vmatmul.mubr.msk.f32.gmra.mxu0 %vm279_vm1, %v25_v24  ;;  %3642 = vmatmul.mubr.msk.f32.gmra.mxu1 %vm279_vm1, %v153_v25  ;;  %v179_v13 = vld [vmem:[%s6403_s0 + $0x528] sm:$0xff]  ;;  %v180_v15 = vld [vmem:[%s6403_s0 + $0x530] sm:$0xff]  ;;  %v53_v16 = vld [vmem:[%s6403_s0 + $0x138] sm:$0xff] }
  0x1c   :  { %3452 = vmatprep.mubr.msk.f32.mxu0 %vm279_vm1, %v26_v26  ;;  %3644 = vmatprep.mubr.msk.f32.mxu1 %vm279_vm1, %v154_v27  ;;  %v181_v17 = vld [vmem:[%s6403_s0 + $0x538] sm:$0xff]  ;;  %v54_v18 = vld [vmem:[%s6403_s0 + $0x140] sm:$0xff]  ;;  %v55_v20 = vld [vmem:[%s6403_s0 + $0x148] sm:$0xff] }
  0x1d   :  { %v182_v19 = vld [vmem:[%s6403_s0 + $0x540] sm:$0xff]  ;;  %v183_v21 = vld [vmem:[%s6403_s0 + $0x548] sm:$0xff]  ;;  %v56_v22 = vld [vmem:[%s6403_s0 + $0x150] sm:$0xff] }
  0x1e   :  { %v184_v23 = vld [vmem:[%s6403_s0 + $0x550] sm:$0xff]  ;;  %v57_v24 = vld [vmem:[%s6403_s0 + $0x158] sm:$0xff]  ;;  %v58_v26 = vld [vmem:[%s6403_s0 + $0x160] sm:$0xff] }
  0x1f   :  { %3453 = vmatmul.mubr.msk.f32.gmra.mxu0 %vm279_vm1, %v27_v28  ;;  %3645 = vmatmul.mubr.msk.f32.gmra.mxu1 %vm279_vm1, %v155_v29  ;;  %v185_v25 = vld [vmem:[%s6403_s0 + $0x558] sm:$0xff]  ;;  %v186_v27 = vld [vmem:[%s6403_s0 + $0x560] sm:$0xff]  ;;  %v59_v28 = vld [vmem:[%s6403_s0 + $0x168] sm:$0xff] }
  0x20   :  { %3455 = vmatprep.mubr.msk.f32.mxu0 %vm279_vm1, %v28_v30  ;;  %3647 = vmatprep.mubr.msk.f32.mxu1 %vm279_vm1, %v156_v31  ;;  %v187_v29 = vld [vmem:[%s6403_s0 + $0x568] sm:$0xff]  ;;  %v60_v30 = vld [vmem:[%s6403_s0 + $0x170] sm:$0xff] }
  0x21   :  { %v188_v31 = vld [vmem:[%s6403_s0 + $0x570] sm:$0xff] }
  0x23   :  { %3456 = vmatmul.mubr.msk.f32.gmra.mxu0 %vm279_vm1, %v29_v32  ;;  %3648 = vmatmul.mubr.msk.f32.gmra.mxu1 %vm279_vm1, %v157_v33  ;;  %v61_v32 = vld [vmem:[%s6403_s0 + $0x178] sm:$0xff] }
  0x24   :  { %3458 = vmatprep.mubr.msk.f32.mxu0 %vm279_vm1, %v30_v34  ;;  %3650 = vmatprep.mubr.msk.f32.mxu1 %vm279_vm1, %v158_v35  ;;  %v189_v33 = vld [vmem:[%s6403_s0 + $0x578] sm:$0xff]  ;;  %v62_v34 = vld [vmem:[%s6403_s0 + $0x180] sm:$0xff] }
  0x25   :  { %v190_v35 = vld [vmem:[%s6403_s0 + $0x580] sm:$0xff] }
  0x27   :  { %3459 = vmatmul.mubr.msk.f32.gmra.mxu0 %vm279_vm1, %v31_v36  ;;  %3651 = vmatmul.mubr.msk.f32.gmra.mxu1 %vm279_vm1, %v159_v37  ;;  %v63_v36 = vld [vmem:[%s6403_s0 + $0x188] sm:$0xff] }
  0x28   :  { %3461 = vmatprep.mubr.msk.f32.mxu0 %vm279_vm1, %v32_v38  ;;  %3653 = vmatprep.mubr.msk.f32.mxu1 %vm279_vm1, %v160_v39  ;;  %v191_v37 = vld [vmem:[%s6403_s0 + $0x588] sm:$0xff]  ;;  %v64_v38 = vld [vmem:[%s6403_s0 + $0x190] sm:$0xff] }
  0x29   :  { %v192_v39 = vld [vmem:[%s6403_s0 + $0x590] sm:$0xff] }
  0x2b   :  { %3462 = vmatmul.mubr.msk.f32.gmra.mxu0 %vm279_vm1, %v33_v40  ;;  %3654 = vmatmul.mubr.msk.f32.gmra.mxu1 %vm279_vm1, %v161_v41  ;;  %v65_v40 = vld [vmem:[%s6403_s0 + $0x198] sm:$0xff] }
  0x2c   :  { %3464 = vmatprep.mubr.msk.f32.mxu0 %vm279_vm1, %v34_v42  ;;  %3656 = vmatprep.mubr.msk.f32.mxu1 %vm279_vm1, %v162_v43  ;;  %v193_v41 = vld [vmem:[%s6403_s0 + $0x598] sm:$0xff]  ;;  %v66_v42 = vld [vmem:[%s6403_s0 + $0x1a0] sm:$0xff] }
  0x2d   :  { %v194_v43 = vld [vmem:[%s6403_s0 + $0x5a0] sm:$0xff] }
  0x2f   :  { %3465 = vmatmul.mubr.msk.f32.gmra.mxu0 %vm279_vm1, %v35_v44  ;;  %3657 = vmatmul.mubr.msk.f32.gmra.mxu1 %vm279_vm1, %v163_v45  ;;  %v67_v44 = vld [vmem:[%s6403_s0 + $0x1a8] sm:$0xff] }
  0x30   :  { %3467 = vmatprep.mubr.msk.f32.mxu0 %vm279_vm1, %v36_v46  ;;  %3659 = vmatprep.mubr.msk.f32.mxu1 %vm279_vm1, %v164_v47  ;;  %v195_v45 = vld [vmem:[%s6403_s0 + $0x5a8] sm:$0xff]  ;;  %v68_v46 = vld [vmem:[%s6403_s0 + $0x1b0] sm:$0xff] }
  0x31   :  { %v196_v47 = vld [vmem:[%s6403_s0 + $0x5b0] sm:$0xff] }
  0x33   :  { %3468 = vmatmul.mubr.msk.f32.gmra.mxu0 %vm279_vm1, %v37_v48  ;;  %3660 = vmatmul.mubr.msk.f32.gmra.mxu1 %vm279_vm1, %v165_v49  ;;  %v69_v48 = vld [vmem:[%s6403_s0 + $0x1b8] sm:$0xff] }
  0x34   :  { %3470 = vmatprep.mubr.msk.f32.mxu0 %vm279_vm1, %v38_v50  ;;  %3662 = vmatprep.mubr.msk.f32.mxu1 %vm279_vm1, %v166_v51  ;;  %v197_v49 = vld [vmem:[%s6403_s0 + $0x5b8] sm:$0xff]  ;;  %v70_v50 = vld [vmem:[%s6403_s0 + $0x1c0] sm:$0xff] }
  0x35   :  { %v198_v51 = vld [vmem:[%s6403_s0 + $0x5c0] sm:$0xff] }
  0x37   :  { %3471 = vmatmul.mubr.msk.f32.gmra.mxu0 %vm279_vm1, %v39_v52  ;;  %3663 = vmatmul.mubr.msk.f32.gmra.mxu1 %vm279_vm1, %v167_v53  ;;  %v71_v52 = vld [vmem:[%s6403_s0 + $0x1c8] sm:$0xff] }
  0x38   :  { %3473 = vmatprep.mubr.msk.f32.mxu0 %vm279_vm1, %v40_v54  ;;  %3665 = vmatprep.mubr.msk.f32.mxu1 %vm279_vm1, %v168_v55  ;;  %v199_v53 = vld [vmem:[%s6403_s0 + $0x5c8] sm:$0xff]  ;;  %v72_v54 = vld [vmem:[%s6403_s0 + $0x1d0] sm:$0xff] }
  0x39   :  { %v200_v55 = vld [vmem:[%s6403_s0 + $0x5d0] sm:$0xff] }
  0x3b   :  { %3474 = vmatmul.mubr.msk.f32.gmra.mxu0 %vm279_vm1, %v41_v56  ;;  %3666 = vmatmul.mubr.msk.f32.gmra.mxu1 %vm279_vm1, %v169_v57  ;;  %v73_v56 = vld [vmem:[%s6403_s0 + $0x1d8] sm:$0xff] }
  0x3c   :  { %3476 = vmatprep.mubr.msk.f32.mxu0 %vm279_vm1, %v42_v58  ;;  %3668 = vmatprep.mubr.msk.f32.mxu1 %vm279_vm1, %v170_v59  ;;  %v201_v57 = vld [vmem:[%s6403_s0 + $0x5d8] sm:$0xff]  ;;  %v74_v58 = vld [vmem:[%s6403_s0 + $0x1e0] sm:$0xff] }
  0x3d   :  { %v202_v59 = vld [vmem:[%s6403_s0 + $0x5e0] sm:$0xff] }
  0x3f   :  { %3477 = vmatmul.mubr.msk.f32.gmra.mxu0 %vm279_vm1, %v43_v60  ;;  %3669 = vmatmul.mubr.msk.f32.gmra.mxu1 %vm279_vm1, %v171_v61  ;;  %v75_v60 = vld [vmem:[%s6403_s0 + $0x1e8] sm:$0xff] }
  0x40   :  { %3479 = vmatprep.mubr.msk.f32.mxu0 %vm279_vm1, %v44_v62  ;;  %3671 = vmatprep.mubr.msk.f32.mxu1 %vm279_vm1, %v172_v63  ;;  %v203_v61 = vld [vmem:[%s6403_s0 + $0x5e8] sm:$0xff]  ;;  %v76_v62 = vld [vmem:[%s6403_s0 + $0x1f0] sm:$0xff] }
  0x41   :  { %v204_v63 = vld [vmem:[%s6403_s0 + $0x5f0] sm:$0xff] }
  0x43   :  { %3480 = vmatmul.mubr.msk.f32.gmra.mxu0 %vm279_vm1, %v45_v0  ;;  %3672 = vmatmul.mubr.msk.f32.gmra.mxu1 %vm279_vm1, %v173_v1  ;;  %v77_v0 = vld [vmem:[%s6403_s0 + $0x1f8] sm:$0xff] }
  0x44   :  { %3482 = vmatprep.mubr.msk.f32.mxu0 %vm279_vm1, %v46_v2  ;;  %3674 = vmatprep.mubr.msk.f32.mxu1 %vm279_vm1, %v174_v3  ;;  %v205_v1 = vld [vmem:[%s6403_s0 + $0x5f8] sm:$0xff]  ;;  %v78_v2 = vld [vmem:[%s6403_s0 + $0x200] sm:$0xff] }
  0x45   :  { %v206_v3 = vld [vmem:[%s6403_s0 + $0x600] sm:$0xff] }
  0x47   :  { %3483 = vmatmul.mubr.msk.f32.gmra.mxu0 %vm279_vm1, %v47_v4  ;;  %3675 = vmatmul.mubr.msk.f32.gmra.mxu1 %vm279_vm1, %v175_v5  ;;  %v79_v4 = vld [vmem:[%s6403_s0 + $0x208] sm:$0xff] }
  0x48   :  { %3485 = vmatprep.mubr.msk.f32.mxu0 %vm279_vm1, %v48_v6  ;;  %3677 = vmatprep.mubr.msk.f32.mxu1 %vm279_vm1, %v176_v7  ;;  %v207_v5 = vld [vmem:[%s6403_s0 + $0x608] sm:$0xff]  ;;  %v80_v6 = vld [vmem:[%s6403_s0 + $0x210] sm:$0xff] }
  0x49   :  { %v208_v7 = vld [vmem:[%s6403_s0 + $0x610] sm:$0xff] }
  0x4b   :  { %3486 = vmatmul.mubr.msk.f32.gmra.mxu0 %vm279_vm1, %v49_v8  ;;  %3678 = vmatmul.mubr.msk.f32.gmra.mxu1 %vm279_vm1, %v177_v9  ;;  %v81_v8 = vld [vmem:[%s6403_s0 + $0x218] sm:$0xff] }
  0x4c   :  { %3488 = vmatprep.mubr.msk.f32.mxu0 %vm279_vm1, %v50_v10  ;;  %3680 = vmatprep.mubr.msk.f32.mxu1 %vm279_vm1, %v178_v11  ;;  %v209_v9 = vld [vmem:[%s6403_s0 + $0x618] sm:$0xff]  ;;  %v82_v10 = vld [vmem:[%s6403_s0 + $0x220] sm:$0xff] }
  0x4d   :  { %v210_v11 = vld [vmem:[%s6403_s0 + $0x620] sm:$0xff] }
  0x4f   :  { %3489 = vmatmul.mubr.msk.f32.gmra.mxu0 %vm279_vm1, %v51_v12  ;;  %3681 = vmatmul.mubr.msk.f32.gmra.mxu1 %vm279_vm1, %v179_v13  ;;  %v83_v12 = vld [vmem:[%s6403_s0 + $0x228] sm:$0xff] }
  0x50   :  { %3491 = vmatprep.mubr.msk.f32.mxu0 %vm279_vm1, %v52_v14  ;;  %3683 = vmatprep.mubr.msk.f32.mxu1 %vm279_vm1, %v180_v15  ;;  %v211_v13 = vld [vmem:[%s6403_s0 + $0x628] sm:$0xff]  ;;  %v84_v14 = vld [vmem:[%s6403_s0 + $0x230] sm:$0xff] }
  0x51   :  { %v212_v15 = vld [vmem:[%s6403_s0 + $0x630] sm:$0xff] }
  0x53   :  { %3492 = vmatmul.mubr.msk.f32.gmra.mxu0 %vm279_vm1, %v53_v16  ;;  %3684 = vmatmul.mubr.msk.f32.gmra.mxu1 %vm279_vm1, %v181_v17  ;;  %v85_v16 = vld [vmem:[%s6403_s0 + $0x238] sm:$0xff] }
  0x54   :  { %3494 = vmatprep.mubr.msk.f32.mxu0 %vm279_vm1, %v54_v18  ;;  %3686 = vmatprep.mubr.msk.f32.mxu1 %vm279_vm1, %v182_v19  ;;  %v213_v17 = vld [vmem:[%s6403_s0 + $0x638] sm:$0xff]  ;;  %v86_v18 = vld [vmem:[%s6403_s0 + $0x240] sm:$0xff] }
  0x55   :  { %v214_v19 = vld [vmem:[%s6403_s0 + $0x640] sm:$0xff] }
  0x57   :  { %3495 = vmatmul.mubr.msk.f32.gmra.mxu0 %vm279_vm1, %v55_v20  ;;  %3687 = vmatmul.mubr.msk.f32.gmra.mxu1 %vm279_vm1, %v183_v21  ;;  %v87_v20 = vld [vmem:[%s6403_s0 + $0x248] sm:$0xff] }
  0x58   :  { %3497 = vmatprep.mubr.msk.f32.mxu0 %vm279_vm1, %v56_v22  ;;  %3689 = vmatprep.mubr.msk.f32.mxu1 %vm279_vm1, %v184_v23  ;;  %v215_v21 = vld [vmem:[%s6403_s0 + $0x648] sm:$0xff]  ;;  %v88_v22 = vld [vmem:[%s6403_s0 + $0x250] sm:$0xff] }
  0x59   :  { %v216_v23 = vld [vmem:[%s6403_s0 + $0x650] sm:$0xff] }
  0x5b   :  { %3498 = vmatmul.mubr.msk.f32.gmra.mxu0 %vm279_vm1, %v57_v24  ;;  %3690 = vmatmul.mubr.msk.f32.gmra.mxu1 %vm279_vm1, %v185_v25  ;;  %v89_v24 = vld [vmem:[%s6403_s0 + $0x258] sm:$0xff] }
  0x5c   :  { %3500 = vmatprep.mubr.msk.f32.mxu0 %vm279_vm1, %v58_v26  ;;  %3692 = vmatprep.mubr.msk.f32.mxu1 %vm279_vm1, %v186_v27  ;;  %v217_v25 = vld [vmem:[%s6403_s0 + $0x658] sm:$0xff]  ;;  %v90_v26 = vld [vmem:[%s6403_s0 + $0x260] sm:$0xff] }
  0x5d   :  { %v218_v27 = vld [vmem:[%s6403_s0 + $0x660] sm:$0xff] }
  0x5f   :  { %3501 = vmatmul.mubr.msk.f32.gmra.mxu0 %vm279_vm1, %v59_v28  ;;  %3693 = vmatmul.mubr.msk.f32.gmra.mxu1 %vm279_vm1, %v187_v29  ;;  %v91_v28 = vld [vmem:[%s6403_s0 + $0x268] sm:$0xff] }
  0x60   :  { %3503 = vmatprep.mubr.msk.f32.mxu0 %vm279_vm1, %v60_v30  ;;  %3695 = vmatprep.mubr.msk.f32.mxu1 %vm279_vm1, %v188_v31  ;;  %v219_v29 = vld [vmem:[%s6403_s0 + $0x668] sm:$0xff]  ;;  %v92_v30 = vld [vmem:[%s6403_s0 + $0x270] sm:$0xff] }
  0x61   :  { %v220_v31 = vld [vmem:[%s6403_s0 + $0x670] sm:$0xff] }
  0x63   :  { %3504 = vmatmul.mubr.msk.f32.gmra.mxu0 %vm279_vm1, %v61_v32  ;;  %3696 = vmatmul.mubr.msk.f32.gmra.mxu1 %vm279_vm1, %v189_v33  ;;  %v93_v32 = vld [vmem:[%s6403_s0 + $0x278] sm:$0xff] }
  0x64   :  { %3506 = vmatprep.mubr.msk.f32.mxu0 %vm279_vm1, %v62_v34  ;;  %3698 = vmatprep.mubr.msk.f32.mxu1 %vm279_vm1, %v190_v35  ;;  %v221_v33 = vld [vmem:[%s6403_s0 + $0x678] sm:$0xff]  ;;  %v94_v34 = vld [vmem:[%s6403_s0 + $0x280] sm:$0xff] }
  0x65   :  { %v222_v35 = vld [vmem:[%s6403_s0 + $0x680] sm:$0xff] }
  0x67   :  { %3507 = vmatmul.mubr.msk.f32.gmra.mxu0 %vm279_vm1, %v63_v36  ;;  %3699 = vmatmul.mubr.msk.f32.gmra.mxu1 %vm279_vm1, %v191_v37  ;;  %v95_v36 = vld [vmem:[%s6403_s0 + $0x288] sm:$0xff] }
  0x68   :  { %3509 = vmatprep.mubr.msk.f32.mxu0 %vm279_vm1, %v64_v38  ;;  %3701 = vmatprep.mubr.msk.f32.mxu1 %vm279_vm1, %v192_v39  ;;  %v223_v37 = vld [vmem:[%s6403_s0 + $0x688] sm:$0xff]  ;;  %v96_v38 = vld [vmem:[%s6403_s0 + $0x290] sm:$0xff] }
  0x69   :  { %v224_v39 = vld [vmem:[%s6403_s0 + $0x690] sm:$0xff] }
  0x6b   :  { %3510 = vmatmul.mubr.msk.f32.gmra.mxu0 %vm279_vm1, %v65_v40  ;;  %3702 = vmatmul.mubr.msk.f32.gmra.mxu1 %vm279_vm1, %v193_v41  ;;  %v97_v40 = vld [vmem:[%s6403_s0 + $0x298] sm:$0xff] }
  0x6c   :  { %3512 = vmatprep.mubr.msk.f32.mxu0 %vm279_vm1, %v66_v42  ;;  %3704 = vmatprep.mubr.msk.f32.mxu1 %vm279_vm1, %v194_v43  ;;  %v225_v41 = vld [vmem:[%s6403_s0 + $0x698] sm:$0xff]  ;;  %v98_v42 = vld [vmem:[%s6403_s0 + $0x2a0] sm:$0xff] }
  0x6d   :  { %v226_v43 = vld [vmem:[%s6403_s0 + $0x6a0] sm:$0xff] }
  0x6f   :  { %3513 = vmatmul.mubr.msk.f32.gmra.mxu0 %vm279_vm1, %v67_v44  ;;  %3705 = vmatmul.mubr.msk.f32.gmra.mxu1 %vm279_vm1, %v195_v45  ;;  %v99_v44 = vld [vmem:[%s6403_s0 + $0x2a8] sm:$0xff] }
  0x70   :  { %3515 = vmatprep.mubr.msk.f32.mxu0 %vm279_vm1, %v68_v46  ;;  %3707 = vmatprep.mubr.msk.f32.mxu1 %vm279_vm1, %v196_v47  ;;  %v227_v45 = vld [vmem:[%s6403_s0 + $0x6a8] sm:$0xff]  ;;  %v100_v46 = vld [vmem:[%s6403_s0 + $0x2b0] sm:$0xff] }
  0x71   :  { %v228_v47 = vld [vmem:[%s6403_s0 + $0x6b0] sm:$0xff] }
  0x73   :  { %3516 = vmatmul.mubr.msk.f32.gmra.mxu0 %vm279_vm1, %v69_v48  ;;  %3708 = vmatmul.mubr.msk.f32.gmra.mxu1 %vm279_vm1, %v197_v49  ;;  %v101_v48 = vld [vmem:[%s6403_s0 + $0x2b8] sm:$0xff] }
  0x74   :  { %3518 = vmatprep.mubr.msk.f32.mxu0 %vm279_vm1, %v70_v50  ;;  %3710 = vmatprep.mubr.msk.f32.mxu1 %vm279_vm1, %v198_v51  ;;  %v229_v49 = vld [vmem:[%s6403_s0 + $0x6b8] sm:$0xff]  ;;  %v102_v50 = vld [vmem:[%s6403_s0 + $0x2c0] sm:$0xff] }
  0x75   :  { %v230_v51 = vld [vmem:[%s6403_s0 + $0x6c0] sm:$0xff] }
  0x77   :  { %3519 = vmatmul.mubr.msk.f32.gmra.mxu0 %vm279_vm1, %v71_v52  ;;  %3711 = vmatmul.mubr.msk.f32.gmra.mxu1 %vm279_vm1, %v199_v53  ;;  %v103_v52 = vld [vmem:[%s6403_s0 + $0x2c8] sm:$0xff] }
  0x78   :  { %3521 = vmatprep.mubr.msk.f32.mxu0 %vm279_vm1, %v72_v54  ;;  %3713 = vmatprep.mubr.msk.f32.mxu1 %vm279_vm1, %v200_v55  ;;  %v231_v53 = vld [vmem:[%s6403_s0 + $0x6c8] sm:$0xff]  ;;  %v104_v54 = vld [vmem:[%s6403_s0 + $0x2d0] sm:$0xff] }
  0x79   :  { %v232_v55 = vld [vmem:[%s6403_s0 + $0x6d0] sm:$0xff] }
  0x7b   :  { %3522 = vmatmul.mubr.msk.f32.gmra.mxu0 %vm279_vm1, %v73_v56  ;;  %3714 = vmatmul.mubr.msk.f32.gmra.mxu1 %vm279_vm1, %v201_v57  ;;  %v105_v56 = vld [vmem:[%s6403_s0 + $0x2d8] sm:$0xff] }
  0x7c   :  { %3524 = vmatprep.mubr.msk.f32.mxu0 %vm279_vm1, %v74_v58  ;;  %3716 = vmatprep.mubr.msk.f32.mxu1 %vm279_vm1, %v202_v59  ;;  %v233_v57 = vld [vmem:[%s6403_s0 + $0x6d8] sm:$0xff]  ;;  %v106_v58 = vld [vmem:[%s6403_s0 + $0x2e0] sm:$0xff] }
  0x7d   :  { %v234_v59 = vld [vmem:[%s6403_s0 + $0x6e0] sm:$0xff] }
  0x7f   :  { %3525 = vmatmul.mubr.msk.f32.gmra.mxu0 %vm279_vm1, %v75_v60  ;;  %3717 = vmatmul.mubr.msk.f32.gmra.mxu1 %vm279_vm1, %v203_v61  ;;  %v107_v60 = vld [vmem:[%s6403_s0 + $0x2e8] sm:$0xff] }
  0x80   :  { %3527 = vmatprep.mubr.msk.f32.mxu0 %vm279_vm1, %v76_v62  ;;  %3719 = vmatprep.mubr.msk.f32.mxu1 %vm279_vm1, %v204_v63  ;;  %v235_v61 = vld [vmem:[%s6403_s0 + $0x6e8] sm:$0xff]  ;;  %v108_v62 = vld [vmem:[%s6403_s0 + $0x2f0] sm:$0xff] }
  0x81   :  { %v236_v63 = vld [vmem:[%s6403_s0 + $0x6f0] sm:$0xff] }
  0x83   :  { %3528 = vmatmul.mubr.msk.f32.gmra.mxu0 %vm279_vm1, %v77_v0  ;;  %3720 = vmatmul.mubr.msk.f32.gmra.mxu1 %vm279_vm1, %v205_v1  ;;  %v109_v0 = vld [vmem:[%s6403_s0 + $0x2f8] sm:$0xff] }
  0x84   :  { %3530 = vmatprep.mubr.msk.f32.mxu0 %vm279_vm1, %v78_v2  ;;  %3722 = vmatprep.mubr.msk.f32.mxu1 %vm279_vm1, %v206_v3  ;;  %v237_v1 = vld [vmem:[%s6403_s0 + $0x6f8] sm:$0xff]  ;;  %v110_v2 = vld [vmem:[%s6403_s0 + $0x300] sm:$0xff] }
  0x85   :  { %v238_v3 = vld [vmem:[%s6403_s0 + $0x700] sm:$0xff] }
  0x87   :  { %3531 = vmatmul.mubr.msk.f32.gmra.mxu0 %vm279_vm1, %v79_v4  ;;  %3723 = vmatmul.mubr.msk.f32.gmra.mxu1 %vm279_vm1, %v207_v5  ;;  %v111_v4 = vld [vmem:[%s6403_s0 + $0x308] sm:$0xff] }
  0x88   :  { %3533 = vmatprep.mubr.msk.f32.mxu0 %vm279_vm1, %v80_v6  ;;  %3725 = vmatprep.mubr.msk.f32.mxu1 %vm279_vm1, %v208_v7  ;;  %v239_v5 = vld [vmem:[%s6403_s0 + $0x708] sm:$0xff]  ;;  %v112_v6 = vld [vmem:[%s6403_s0 + $0x310] sm:$0xff] }
  0x89   :  { %v240_v7 = vld [vmem:[%s6403_s0 + $0x710] sm:$0xff] }
  0x8b   :  { %3534 = vmatmul.mubr.msk.f32.gmra.mxu0 %vm279_vm1, %v81_v8  ;;  %3726 = vmatmul.mubr.msk.f32.gmra.mxu1 %vm279_vm1, %v209_v9 }
  0x8c   :  { %3536 = vmatprep.mubr.msk.f32.mxu0 %vm279_vm1, %v82_v10  ;;  %3728 = vmatprep.mubr.msk.f32.mxu1 %vm279_vm1, %v210_v11  ;;  %v113_v10 = vld [vmem:[%s6403_s0 + $0x318] sm:$0xff] }
  0x8d   :  { %v241_v11 = vld [vmem:[%s6403_s0 + $0x718] sm:$0xff] }
  0x8f   :  { %3537 = vmatmul.mubr.msk.f32.gmra.mxu0 %vm279_vm1, %v83_v12  ;;  %3729 = vmatmul.mubr.msk.f32.gmra.mxu1 %vm279_vm1, %v211_v13 }
  0x90   :  { %3539 = vmatprep.mubr.msk.f32.mxu0 %vm279_vm1, %v84_v14  ;;  %3731 = vmatprep.mubr.msk.f32.mxu1 %vm279_vm1, %v212_v15  ;;  %v114_v14 = vld [vmem:[%s6403_s0 + $0x320] sm:$0xff] }
  0x91   :  { %v242_v15 = vld [vmem:[%s6403_s0 + $0x720] sm:$0xff] }
  0x93   :  { %3540 = vmatmul.mubr.msk.f32.gmra.mxu0 %vm279_vm1, %v85_v16  ;;  %3732 = vmatmul.mubr.msk.f32.gmra.mxu1 %vm279_vm1, %v213_v17 }
  0x94   :  { %3542 = vmatprep.mubr.msk.f32.mxu0 %vm279_vm1, %v86_v18  ;;  %3734 = vmatprep.mubr.msk.f32.mxu1 %vm279_vm1, %v214_v19  ;;  %v115_v18 = vld [vmem:[%s6403_s0 + $0x328] sm:$0xff] }
  0x95   :  { %v243_v19 = vld [vmem:[%s6403_s0 + $0x728] sm:$0xff] }
  0x97   :  { %3543 = vmatmul.mubr.msk.f32.gmra.mxu0 %vm279_vm1, %v87_v20  ;;  %3735 = vmatmul.mubr.msk.f32.gmra.mxu1 %vm279_vm1, %v215_v21 }
  0x98   :  { %3545 = vmatprep.mubr.msk.f32.mxu0 %vm279_vm1, %v88_v22  ;;  %3737 = vmatprep.mubr.msk.f32.mxu1 %vm279_vm1, %v216_v23  ;;  %v116_v22 = vld [vmem:[%s6403_s0 + $0x330] sm:$0xff] }
  0x99   :  { %v244_v23 = vld [vmem:[%s6403_s0 + $0x730] sm:$0xff] }
  0x9b   :  { %3546 = vmatmul.mubr.msk.f32.gmra.mxu0 %vm279_vm1, %v89_v24  ;;  %3738 = vmatmul.mubr.msk.f32.gmra.mxu1 %vm279_vm1, %v217_v25 }
  0x9c   :  { %3548 = vmatprep.mubr.msk.f32.mxu0 %vm279_vm1, %v90_v26  ;;  %3740 = vmatprep.mubr.msk.f32.mxu1 %vm279_vm1, %v218_v27  ;;  %v117_v26 = vld [vmem:[%s6403_s0 + $0x338] sm:$0xff] }
  0x9d   :  { %v245_v27 = vld [vmem:[%s6403_s0 + $0x738] sm:$0xff] }
  0x9f   :  { %3549 = vmatmul.mubr.msk.f32.gmra.mxu0 %vm279_vm1, %v91_v28  ;;  %3741 = vmatmul.mubr.msk.f32.gmra.mxu1 %vm279_vm1, %v219_v29 }
  0xa0   :  { %3551 = vmatprep.mubr.msk.f32.mxu0 %vm279_vm1, %v92_v30  ;;  %3743 = vmatprep.mubr.msk.f32.mxu1 %vm279_vm1, %v220_v31  ;;  %v118_v30 = vld [vmem:[%s6403_s0 + $0x340] sm:$0xff] }
  0xa1   :  { %v246_v31 = vld [vmem:[%s6403_s0 + $0x740] sm:$0xff] }
  0xa3   :  { %3552 = vmatmul.mubr.msk.f32.gmra.mxu0 %vm279_vm1, %v93_v32  ;;  %3744 = vmatmul.mubr.msk.f32.gmra.mxu1 %vm279_vm1, %v221_v33 }
  0xa4   :  { %3554 = vmatprep.mubr.msk.f32.mxu0 %vm279_vm1, %v94_v34  ;;  %3746 = vmatprep.mubr.msk.f32.mxu1 %vm279_vm1, %v222_v35  ;;  %v119_v34 = vld [vmem:[%s6403_s0 + $0x348] sm:$0xff] }
  0xa5   :  { %v247_v35 = vld [vmem:[%s6403_s0 + $0x748] sm:$0xff] }
  0xa7   :  { %3555 = vmatmul.mubr.msk.f32.gmra.mxu0 %vm279_vm1, %v95_v36  ;;  %3747 = vmatmul.mubr.msk.f32.gmra.mxu1 %vm279_vm1, %v223_v37 }
  0xa8   :  { %3557 = vmatprep.mubr.msk.f32.mxu0 %vm279_vm1, %v96_v38  ;;  %3749 = vmatprep.mubr.msk.f32.mxu1 %vm279_vm1, %v224_v39  ;;  %v120_v38 = vld [vmem:[%s6403_s0 + $0x350] sm:$0xff] }
  0xa9   :  { %v248_v39 = vld [vmem:[%s6403_s0 + $0x750] sm:$0xff] }
  0xab   :  { %3558 = vmatmul.mubr.msk.f32.gmra.mxu0 %vm279_vm1, %v97_v40  ;;  %3750 = vmatmul.mubr.msk.f32.gmra.mxu1 %vm279_vm1, %v225_v41 }
  0xac   :  { %3560 = vmatprep.mubr.msk.f32.mxu0 %vm279_vm1, %v98_v42  ;;  %3752 = vmatprep.mubr.msk.f32.mxu1 %vm279_vm1, %v226_v43  ;;  %v121_v42 = vld [vmem:[%s6403_s0 + $0x358] sm:$0xff] }
  0xad   :  { %v249_v43 = vld [vmem:[%s6403_s0 + $0x758] sm:$0xff] }
  0xaf   :  { %3561 = vmatmul.mubr.msk.f32.gmra.mxu0 %vm279_vm1, %v99_v44  ;;  %3753 = vmatmul.mubr.msk.f32.gmra.mxu1 %vm279_vm1, %v227_v45 }
  0xb0   :  { %3563 = vmatprep.mubr.msk.f32.mxu0 %vm279_vm1, %v100_v46  ;;  %3755 = vmatprep.mubr.msk.f32.mxu1 %vm279_vm1, %v228_v47  ;;  %v122_v46 = vld [vmem:[%s6403_s0 + $0x360] sm:$0xff] }
  0xb1   :  { %v250_v47 = vld [vmem:[%s6403_s0 + $0x760] sm:$0xff] }
  0xb3   :  { %3564 = vmatmul.mubr.msk.f32.gmra.mxu0 %vm279_vm1, %v101_v48  ;;  %3756 = vmatmul.mubr.msk.f32.gmra.mxu1 %vm279_vm1, %v229_v49 }
  0xb4   :  { %3566 = vmatprep.mubr.msk.f32.mxu0 %vm279_vm1, %v102_v50  ;;  %3758 = vmatprep.mubr.msk.f32.mxu1 %vm279_vm1, %v230_v51  ;;  %v123_v50 = vld [vmem:[%s6403_s0 + $0x368] sm:$0xff] }
  0xb5   :  { %v251_v51 = vld [vmem:[%s6403_s0 + $0x768] sm:$0xff] }
  0xb7   :  { %3567 = vmatmul.mubr.msk.f32.gmra.mxu0 %vm279_vm1, %v103_v52  ;;  %3759 = vmatmul.mubr.msk.f32.gmra.mxu1 %vm279_vm1, %v231_v53 }
  0xb8   :  { %3569 = vmatprep.mubr.msk.f32.mxu0 %vm279_vm1, %v104_v54  ;;  %3761 = vmatprep.mubr.msk.f32.mxu1 %vm279_vm1, %v232_v55  ;;  %v124_v54 = vld [vmem:[%s6403_s0 + $0x370] sm:$0xff] }
  0xb9   :  { %v252_v55 = vld [vmem:[%s6403_s0 + $0x770] sm:$0xff] }
  0xbb   :  { %3570 = vmatmul.mubr.msk.f32.gmra.mxu0 %vm279_vm1, %v105_v56  ;;  %3762 = vmatmul.mubr.msk.f32.gmra.mxu1 %vm279_vm1, %v233_v57 }
  0xbc   :  { %3572 = vmatprep.mubr.msk.f32.mxu0 %vm279_vm1, %v106_v58  ;;  %3764 = vmatprep.mubr.msk.f32.mxu1 %vm279_vm1, %v234_v59  ;;  %v125_v58 = vld [vmem:[%s6403_s0 + $0x378] sm:$0xff] }
  0xbd   :  { %v253_v59 = vld [vmem:[%s6403_s0 + $0x778] sm:$0xff] }
  0xbf   :  { %3573 = vmatmul.mubr.msk.f32.gmra.mxu0 %vm279_vm1, %v107_v60  ;;  %3765 = vmatmul.mubr.msk.f32.gmra.mxu1 %vm279_vm1, %v235_v61 }
  0xc0   :  { %3575 = vmatprep.mubr.msk.f32.mxu0 %vm279_vm1, %v108_v62  ;;  %3767 = vmatprep.mubr.msk.f32.mxu1 %vm279_vm1, %v236_v63  ;;  %v126_v62 = vld [vmem:[%s6403_s0 + $0x380] sm:$0xff] }
  0xc1   :  { %v254_v63 = vld [vmem:[%s6403_s0 + $0x780] sm:$0xff] }
  0xc3   :  { %3576 = vmatmul.mubr.msk.f32.gmra.mxu0 %vm279_vm1, %v109_v0  ;;  %3768 = vmatmul.mubr.msk.f32.gmra.mxu1 %vm279_vm1, %v237_v1 }
  0xc4   :  { %3578 = vmatprep.mubr.msk.f32.mxu0 %vm279_vm1, %v110_v2  ;;  %3770 = vmatprep.mubr.msk.f32.mxu1 %vm279_vm1, %v238_v3  ;;  %v127_v2 = vld [vmem:[%s6403_s0 + $0x388] sm:$0xff] }
  0xc5   :  { %v255_v3 = vld [vmem:[%s6403_s0 + $0x788] sm:$0xff] }
  0xc7   :  { %v4637_v8 = vpop.f32.mrf.mxu0  ;;  %3579 = vmatmul.mubr.msk.f32.gmra.mxu0 %vm279_vm1, %v111_v4  ;;  %v4640_v9 = vpop.f32.mrf.mxu1  ;;  %3771 = vmatmul.mubr.msk.f32.gmra.mxu1 %vm279_vm1, %v239_v5 }
  0xc8   :  { %3581 = vmatprep.mubr.msk.f32.mxu0 %vm279_vm1, %v112_v6  ;;  %3773 = vmatprep.mubr.msk.f32.mxu1 %vm279_vm1, %v240_v7  ;;  %v128_v6 = vld [vmem:[%s6403_s0 + $0x390] sm:$0xff] }
  0xc9   :  { %v4651_v12 = vpop.f32.mrf.mxu0  ;;  %v4653_v13 = vpop.f32.mrf.mxu1  ;;  %v256_v7 = vld [vmem:[%s6403_s0 + $0x790] sm:$0xff] }
  0xcb   :  { %v4661_v16 = vpop.f32.mrf.mxu0  ;;  %3582 = vmatmul.mubr.msk.f32.gmra.mxu0 %vm279_vm1, %v113_v10  ;;  %v4664_v17 = vpop.f32.mrf.mxu1  ;;  %3774 = vmatmul.mubr.msk.f32.gmra.mxu1 %vm279_vm1, %v241_v11 }
  0xcc   :  { %3584 = vmatprep.mubr.msk.f32.mxu0 %vm279_vm1, %v114_v14  ;;  %3776 = vmatprep.mubr.msk.f32.mxu1 %vm279_vm1, %v242_v15  ;;  %v129_v14 = vld [vmem:[%s6403_s0 + $0x398] sm:$0xff] }
  0xcd   :  { %v4675_v20 = vpop.f32.mrf.mxu0  ;;  %v4677_v21 = vpop.f32.mrf.mxu1  ;;  %v257_v15 = vld [vmem:[%s6403_s0 + $0x798] sm:$0xff] }
  0xcf   :  { %v4685_v24 = vpop.f32.mrf.mxu0  ;;  %3585 = vmatmul.mubr.msk.f32.gmra.mxu0 %vm279_vm1, %v115_v18  ;;  %v4688_v25 = vpop.f32.mrf.mxu1  ;;  %3777 = vmatmul.mubr.msk.f32.gmra.mxu1 %vm279_vm1, %v243_v19 }
  0xd0   :  { %3587 = vmatprep.mubr.msk.f32.mxu0 %vm279_vm1, %v116_v22  ;;  %3779 = vmatprep.mubr.msk.f32.mxu1 %vm279_vm1, %v244_v23  ;;  %v130_v22 = vld [vmem:[%s6403_s0 + $0x3a0] sm:$0xff] }
  0xd1   :  { %v4699_v28 = vpop.f32.mrf.mxu0  ;;  %v4701_v29 = vpop.f32.mrf.mxu1  ;;  %v258_v23 = vld [vmem:[%s6403_s0 + $0x7a0] sm:$0xff] }
  0xd3   :  { %v4709_v32 = vpop.f32.mrf.mxu0  ;;  %3588 = vmatmul.mubr.msk.f32.gmra.mxu0 %vm279_vm1, %v117_v26  ;;  %v4712_v33 = vpop.f32.mrf.mxu1  ;;  %3780 = vmatmul.mubr.msk.f32.gmra.mxu1 %vm279_vm1, %v245_v27 }
  0xd4   :  { %3590 = vmatprep.mubr.msk.f32.mxu0 %vm279_vm1, %v118_v30  ;;  %3782 = vmatprep.mubr.msk.f32.mxu1 %vm279_vm1, %v246_v31  ;;  %v131_v30 = vld [vmem:[%s6403_s0 + $0x3a8] sm:$0xff] }
  0xd5   :  { %v4723_v36 = vpop.f32.mrf.mxu0  ;;  %v4725_v37 = vpop.f32.mrf.mxu1  ;;  %v259_v31 = vld [vmem:[%s6403_s0 + $0x7a8] sm:$0xff] }
  0xd7   :  { %v4733_v40 = vpop.f32.mrf.mxu0  ;;  %3591 = vmatmul.mubr.msk.f32.gmra.mxu0 %vm279_vm1, %v119_v34  ;;  %v4736_v41 = vpop.f32.mrf.mxu1  ;;  %3783 = vmatmul.mubr.msk.f32.gmra.mxu1 %vm279_vm1, %v247_v35 }
  0xd8   :  { %3593 = vmatprep.mubr.msk.f32.mxu0 %vm279_vm1, %v120_v38  ;;  %3785 = vmatprep.mubr.msk.f32.mxu1 %vm279_vm1, %v248_v39  ;;  %v132_v38 = vld [vmem:[%s6403_s0 + $0x3b0] sm:$0xff] }
  0xd9   :  { %v4747_v44 = vpop.f32.mrf.mxu0  ;;  %v4749_v45 = vpop.f32.mrf.mxu1  ;;  %v260_v39 = vld [vmem:[%s6403_s0 + $0x7b0] sm:$0xff] }
  0xdb   :  { %v4757_v48 = vpop.f32.mrf.mxu0  ;;  %3594 = vmatmul.mubr.msk.f32.gmra.mxu0 %vm279_vm1, %v121_v42  ;;  %v4760_v49 = vpop.f32.mrf.mxu1  ;;  %3786 = vmatmul.mubr.msk.f32.gmra.mxu1 %vm279_vm1, %v249_v43 }
  0xdc   :  { %3596 = vmatprep.mubr.msk.f32.mxu0 %vm279_vm1, %v122_v46  ;;  %3788 = vmatprep.mubr.msk.f32.mxu1 %vm279_vm1, %v250_v47  ;;  %v133_v46 = vld [vmem:[%s6403_s0 + $0x3b8] sm:$0xff] }
  0xdd   :  { %v4771_v52 = vpop.f32.mrf.mxu0  ;;  %v4773_v53 = vpop.f32.mrf.mxu1  ;;  %v261_v47 = vld [vmem:[%s6403_s0 + $0x7b8] sm:$0xff] }
  0xdf   :  { %v4781_v56 = vpop.f32.mrf.mxu0  ;;  %3597 = vmatmul.mubr.msk.f32.gmra.mxu0 %vm279_vm1, %v123_v50  ;;  %v4784_v57 = vpop.f32.mrf.mxu1  ;;  %3789 = vmatmul.mubr.msk.f32.gmra.mxu1 %vm279_vm1, %v251_v51 }
  0xe0   :  { %3599 = vmatprep.mubr.msk.f32.mxu0 %vm279_vm1, %v124_v54  ;;  %3791 = vmatprep.mubr.msk.f32.mxu1 %vm279_vm1, %v252_v55  ;;  %v134_v54 = vld [vmem:[%s6403_s0 + $0x3c0] sm:$0xff] }
  0xe1   :  { %v4795_v60 = vpop.f32.mrf.mxu0  ;;  %v4797_v61 = vpop.f32.mrf.mxu1  ;;  %v262_v55 = vld [vmem:[%s6403_s0 + $0x7c0] sm:$0xff] }
  0xe3   :  { %v4805_v0 = vpop.f32.mrf.mxu0  ;;  %3600 = vmatmul.mubr.msk.f32.gmra.mxu0 %vm279_vm1, %v125_v58  ;;  %v4808_v1 = vpop.f32.mrf.mxu1  ;;  %3792 = vmatmul.mubr.msk.f32.gmra.mxu1 %vm279_vm1, %v253_v59 }
  0xe4   :  { %3602 = vmatprep.mubr.msk.f32.mxu0 %vm279_vm1, %v126_v62  ;;  %3794 = vmatprep.mubr.msk.f32.mxu1 %vm279_vm1, %v254_v63  ;;  %v135_v62 = vld [vmem:[%s6403_s0 + $0x3c8] sm:$0xff] }
  0xe5   :  { %v4819_v4 = vpop.f32.mrf.mxu0  ;;  %v4821_v5 = vpop.f32.mrf.mxu1  ;;  %v263_v63 = vld [vmem:[%s6403_s0 + $0x7c8] sm:$0xff] }
  0xe7   :  { %v4829_v10 = vpop.f32.mrf.mxu0  ;;  %3603 = vmatmul.mubr.msk.f32.gmra.mxu0 %vm279_vm1, %v127_v2  ;;  %v4832_v11 = vpop.f32.mrf.mxu1  ;;  %3795 = vmatmul.mubr.msk.f32.gmra.mxu1 %vm279_vm1, %v255_v3 }
  0xe8   :  { %3605 = vmatprep.mubr.msk.f32.mxu0 %vm279_vm1, %v128_v6  ;;  %3797 = vmatprep.mubr.msk.f32.mxu1 %vm279_vm1, %v256_v7  ;;  %v136_v6 = vld [vmem:[%s6403_s0 + $0x3d0] sm:$0xff] }
  0xe9   :  { %v4843_v18 = vpop.f32.mrf.mxu0  ;;  %v4845_v19 = vpop.f32.mrf.mxu1  ;;  %v264_v7 = vld [vmem:[%s6403_s0 + $0x7d0] sm:$0xff] }
  0xeb   :  { %v4853_v26 = vpop.f32.mrf.mxu0  ;;  %3606 = vmatmul.mubr.msk.f32.gmra.mxu0 %vm279_vm1, %v129_v14  ;;  %v4856_v27 = vpop.f32.mrf.mxu1  ;;  %3798 = vmatmul.mubr.msk.f32.gmra.mxu1 %vm279_vm1, %v257_v15 }
  0xec   :  { %3608 = vmatprep.mubr.msk.f32.mxu0 %vm279_vm1, %v130_v22  ;;  %3800 = vmatprep.mubr.msk.f32.mxu1 %vm279_vm1, %v258_v23  ;;  %v137_v22 = vld [vmem:[%s6403_s0 + $0x3d8] sm:$0xff] }
  0xed   :  { %v4867_v34 = vpop.f32.mrf.mxu0  ;;  %v4869_v35 = vpop.f32.mrf.mxu1  ;;  %v265_v23 = vld [vmem:[%s6403_s0 + $0x7d8] sm:$0xff] }
  0xef   :  { %v4877_v42 = vpop.f32.mrf.mxu0  ;;  %3609 = vmatmul.mubr.msk.f32.gmra.mxu0 %vm279_vm1, %v131_v30  ;;  %v4880_v43 = vpop.f32.mrf.mxu1  ;;  %3801 = vmatmul.mubr.msk.f32.gmra.mxu1 %vm279_vm1, %v259_v31 }
  0xf0   :  { %3611 = vmatprep.mubr.msk.f32.mxu0 %vm279_vm1, %v132_v38  ;;  %3803 = vmatprep.mubr.msk.f32.mxu1 %vm279_vm1, %v260_v39  ;;  %v138_v38 = vld [vmem:[%s6403_s0 + $0x3e0] sm:$0xff] }
  0xf1   :  { %v4891_v50 = vpop.f32.mrf.mxu0  ;;  %v4893_v51 = vpop.f32.mrf.mxu1  ;;  %v266_v39 = vld [vmem:[%s6403_s0 + $0x7e0] sm:$0xff] }
  0xf3   :  { %v4901_v58 = vpop.f32.mrf.mxu0  ;;  %3612 = vmatmul.mubr.msk.f32.gmra.mxu0 %vm279_vm1, %v133_v46  ;;  %v4904_v59 = vpop.f32.mrf.mxu1  ;;  %3804 = vmatmul.mubr.msk.f32.gmra.mxu1 %vm279_vm1, %v261_v47 }
  0xf4   :  { %3614 = vmatprep.mubr.msk.f32.mxu0 %vm279_vm1, %v134_v54  ;;  %3806 = vmatprep.mubr.msk.f32.mxu1 %vm279_vm1, %v262_v55  ;;  %v139_v54 = vld [vmem:[%s6403_s0 + $0x3e8] sm:$0xff] }
  0xf5   :  { %v4915_v2 = vpop.f32.mrf.mxu0  ;;  %v4917_v3 = vpop.f32.mrf.mxu1  ;;  %v267_v55 = vld [vmem:[%s6403_s0 + $0x7e8] sm:$0xff] }
  0xf7   :  { %v4925_v14 = vpop.f32.mrf.mxu0  ;;  %3615 = vmatmul.mubr.msk.f32.gmra.mxu0 %vm279_vm1, %v135_v62  ;;  %v4928_v15 = vpop.f32.mrf.mxu1  ;;  %3807 = vmatmul.mubr.msk.f32.gmra.mxu1 %vm279_vm1, %v263_v63 }
  0xf8   :  { %3617 = vmatprep.mubr.msk.f32.mxu0 %vm279_vm1, %v136_v6  ;;  %3809 = vmatprep.mubr.msk.f32.mxu1 %vm279_vm1, %v264_v7  ;;  %v140_v6 = vld [vmem:[%s6403_s0 + $0x3f0] sm:$0xff] }
  0xf9   :  { %v4939_v30 = vpop.f32.mrf.mxu0  ;;  %v4941_v31 = vpop.f32.mrf.mxu1  ;;  %v268_v7 = vld [vmem:[%s6403_s0 + $0x7f0] sm:$0xff] }
  0xfb   :  { %v4949_v46 = vpop.f32.mrf.mxu0  ;;  %3618 = vmatmul.mubr.msk.f32.gmra.mxu0 %vm279_vm1, %v137_v22  ;;  %v4952_v47 = vpop.f32.mrf.mxu1  ;;  %3810 = vmatmul.mubr.msk.f32.gmra.mxu1 %vm279_vm1, %v265_v23 }
  0xfc   :  { %6472 = vst [vmem:[#allocation2_spill] sm:$0xff] %v4952_v47  ;;  %3620 = vmatprep.mubr.msk.f32.mxu0 %vm279_vm1, %v138_v38  ;;  %3812 = vmatprep.mubr.msk.f32.mxu1 %vm279_vm1, %v266_v39  ;;  %v141_v38 = vld [vmem:[%s6403_s0 + $0x3f8] sm:$0xff] }
  0xfd   :  { %v4963_v62 = vpop.f32.mrf.mxu0  ;;  %v4965_v63 = vpop.f32.mrf.mxu1  ;;  %v269_v39 = vld [vmem:[%s6403_s0 + $0x7f8] sm:$0xff] }
  0xfe   :  { %6473 = vst [vmem:[#allocation3_spill] sm:$0xff] %v4963_v62  ;;  %6474 = vst [vmem:[#allocation4_spill] sm:$0xff] %v4965_v63 }
  0xff   :  { %v4973_v22 = vpop.f32.mrf.mxu0  ;;  %3621 = vmatmul.mubr.msk.f32.gmra.mxu0 %vm279_vm1, %v139_v54  ;;  %v4976_v23 = vpop.f32.mrf.mxu1  ;;  %3813 = vmatmul.mubr.msk.f32.gmra.mxu1 %vm279_vm1, %v267_v55 }
 0x100   :  { %6475 = vst [vmem:[#allocation5_spill] sm:$0xff] %v4973_v22  ;;  %6476 = vst [vmem:[#allocation6_spill] sm:$0xff] %v4976_v23  ;;  %3623 = vmatprep.mubr.msk.f32.mxu0 %vm279_vm1, %v140_v6  ;;  %3815 = vmatprep.mubr.msk.f32.mxu1 %vm279_vm1, %v268_v7 }
 0x101   :  { %v4987_v63 = vpop.f32.mrf.mxu0  ;;  %v4989_v22 = vpop.f32.mrf.mxu1 }
 0x102   :  { %6477 = vst [vmem:[#allocation7_spill] sm:$0xff] %v4987_v63  ;;  %6478 = vst [vmem:[#allocation8_spill] sm:$0xff] %v4989_v22 }
 0x103   :  { %v4991_v54 = vpop.f32.mrf.mxu0  ;;  %3624 = vmatmul.mubr.msk.f32.gmra.mxu0 %vm279_vm1, %v141_v38  ;;  %v4994_v55 = vpop.f32.mrf.mxu1  ;;  %3816 = vmatmul.mubr.msk.f32.gmra.mxu1 %vm279_vm1, %v269_v39 }
 0x104   :  { %6479 = vst [vmem:[#allocation9_spill] sm:$0xff] %v4991_v54  ;;  %6480 = vst [vmem:[#allocation10_spill] sm:$0xff] %v4994_v55 }
 0x105   :  { %v4997_v6 = vpop.f32.mrf.mxu0  ;;  %v4999_v7 = vpop.f32.mrf.mxu1 }
 0x106   :  { %6481 = vst [vmem:[#allocation11_spill] sm:$0xff] %v4997_v6  ;;  %6482 = vst [vmem:[#allocation12_spill] sm:$0xff] %v4999_v7 }
 0x107   :  { %v5001_v23 = vpop.f32.mrf.mxu0  ;;  %v5003_v62 = vpop.f32.mrf.mxu1 }
 0x108   :  { %6483 = vst [vmem:[#allocation13_spill] sm:$0xff] %v5001_v23  ;;  %6484 = vst [vmem:[#allocation14_spill] sm:$0xff] %v5003_v62 }
 0x109   :  { %v5005_v47 = vpop.f32.mrf.mxu0  ;;  %v5007_v63 = vpop.f32.mrf.mxu1 }
 0x10a   :  { %6485 = vst [vmem:[#allocation15_spill] sm:$0xff] %v5005_v47 }
 0x10b   :  { %v5009_v22 = vpop.f32.mrf.mxu0  ;;  %v5011_v54 = vpop.f32.mrf.mxu1 }
 0x10c   :  { %6486 = vst [vmem:[#allocation16_spill] sm:$0xff] %v5011_v54  ;;  %v5032_v54 = vld [vmem:[%s6404_s2] ss:$0 sm:$0xff] }
 0x10d   :  { %v5013_v38 = vpop.f32.mrf.mxu0  ;;  %v5015_v55 = vpop.f32.mrf.mxu1 }
 0x10e   :  { %6487 = vst [vmem:[#allocation17_spill] sm:$0xff] %v5013_v38  ;;  %6488 = vst [vmem:[#allocation18_spill] sm:$0xff] %v5015_v55 }
 0x10f   :  { %v5017_v39 = vpop.f32.mrf.mxu0  ;;  %v5019_v6 = vpop.f32.mrf.mxu1 }
 0x110   :  { %6489 = vst [vmem:[#allocation19_spill] sm:$0xff] %v5017_v39  ;;  %6490 = vst [vmem:[#allocation20_spill] sm:$0xff] %v5019_v6 }
 0x111   :  { %v5021_v7 = vpop.f32.mrf.mxu0  ;;  %v5023_v23 = vpop.f32.mrf.mxu1 }
 0x112   :  { %6491 = vst [vmem:[#allocation21_spill] sm:$0xff] %v5021_v7  ;;  %6492 = vst [vmem:[#allocation22_spill] sm:$0xff] %v5023_v23  ;;  %v5044_v23 = vadd.f32 %v4637_v8, %v5032_v54  ;;  %v5064_v8 = vadd.f32 %v4661_v16, %v5032_v54 }
 0x113   :  { %v5025_v62 = vpop.f32.mrf.mxu0  ;;  %v5027_v47 = vpop.f32.mrf.mxu1 }
 0x114   :  { %6493 = vst [vmem:[#allocation23_spill] sm:$0xff] %v5025_v62  ;;  %6494 = vst [vmem:[#allocation24_spill] sm:$0xff] %v5027_v47  ;;  %v5048_v47 = vadd.f32 %v4640_v9, %v5032_v54  ;;  %v5068_v9 = vadd.f32 %v4664_v17, %v5032_v54  ;;  %v5086_v17 = vadd.f32 %v4685_v24, %v5032_v54 }
 0x115   :  { %v5034_v38 = vpop.f32.mrf.mxu0  ;;  %v5036_v55 = vpop.f32.mrf.mxu1  ;;  %6498 = vst [vmem:[#allocation28_spill] sm:$0xff] %v5044_v23  ;;  %6503 = vst [vmem:[#allocation33_spill] sm:$0xff] %v5064_v8  ;;  %v5177_v8 = vadd.f32 %v5032_v54, %v4773_v53  ;;  %v5214_v53 = vadd.f32 %v5032_v54, %v4819_v4  ;;  %v5251_v4 = vadd.f32 %v4853_v26, %v5032_v54 }
 0x116   :  { %6495 = vst [vmem:[#allocation25_spill] sm:$0xff] %v5034_v38  ;;  %6499 = vst [vmem:[#allocation29_spill] sm:$0xff] %v5048_v47  ;;  %v5056_v38 = vadd.f32 %v5032_v54, %v4651_v12  ;;  %v5077_v12 = vadd.f32 %v5032_v54, %v4675_v20  ;;  %v5286_v26 = vadd.f32 %v5032_v54, %v4891_v50 }
 0x117   :  { %v5038_v39 = vpop.f32.mrf.mxu0  ;;  %v5040_v6 = vpop.f32.mrf.mxu1  ;;  %6504 = vst [vmem:[#allocation34_spill] sm:$0xff] %v5068_v9  ;;  %6506 = vst [vmem:[#allocation36_spill] sm:$0xff] %v5086_v17  ;;  %v5186_v9 = vadd.f32 %v4784_v57, %v5032_v54  ;;  %v5202_v57 = vadd.f32 %v5032_v54, %v4797_v61  ;;  %v5302_v50 = vadd.f32 %v4901_v58, %v5032_v54 }
 0x118   :  { %6496 = vst [vmem:[#allocation26_spill] sm:$0xff] %v5038_v39  ;;  %6497 = vst [vmem:[#allocation27_spill] sm:$0xff] %v5040_v6  ;;  %v5060_v39 = vadd.f32 %v5032_v54, %v4653_v13  ;;  %v5081_v13 = vadd.f32 %v5032_v54, %v4677_v21  ;;  %v5118_v21 = vadd.f32 %v5032_v54, %v4723_v36 }
 0x119   :  { %v5050_v62 = vpop.f32.mrf.mxu0  ;;  %v5052_v7 = vpop.f32.mrf.mxu1  ;;  %v5155_v36 = vadd.f32 %v4757_v48, %v5032_v54  ;;  %6516 = vst [vmem:[#allocation46_spill] sm:$0xff] %v5186_v9  ;;  %v5190_v48 = vadd.f32 %v5032_v54, %v4795_v60  ;;  %v5206_v60 = vadd.f32 %v4805_v0, %v5032_v54  ;;  %v5224_v0 = vadd.f32 %v5032_v54, %v4821_v5 }
 0x11a   :  { %6500 = vst [vmem:[#allocation30_spill] sm:$0xff] %v5050_v62  ;;  %6501 = vst [vmem:[#allocation31_spill] sm:$0xff] %v5052_v7  ;;  %v5094_v7 = vadd.f32 %v5032_v54, %v4699_v28  ;;  %v5110_v28 = vadd.f32 %v4709_v32, %v5032_v54  ;;  %v5128_v32 = vadd.f32 %v5032_v54, %v4725_v37 }
 0x11b   :  { %6502 = vst [vmem:[#allocation32_spill] sm:$0xff] %v5060_v39  ;;  %v5070_v6 = vpop.f32.mrf.mxu0  ;;  %v5072_v62 = vpop.f32.mrf.mxu1  ;;  %v5139_v39 = vadd.f32 %v4736_v41, %v5032_v54  ;;  %v5147_v37 = vadd.f32 %v5032_v54, %v4747_v44  ;;  %6513 = vst [vmem:[#allocation43_spill] sm:$0xff] %v5155_v36  ;;  %v5159_v41 = vadd.f32 %v4760_v49, %v5032_v54 }
 0x11c   :  { %6505 = vst [vmem:[#allocation35_spill] sm:$0xff] %v5070_v6  ;;  %v5090_v6 = vadd.f32 %v4688_v25, %v5032_v54  ;;  %6508 = vst [vmem:[#allocation38_spill] sm:$0xff] %v5094_v7  ;;  %v5106_v25 = vadd.f32 %v5032_v54, %v4701_v29  ;;  %v5173_v49 = vadd.f32 %v5032_v54, %v4771_v52 }
 0x11d   :  { %v5096_v20 = vpop.f32.mrf.mxu0  ;;  %v5098_v23 = vpop.f32.mrf.mxu1  ;;  %6511 = vst [vmem:[#allocation41_spill] sm:$0xff] %v5139_v39  ;;  %6514 = vst [vmem:[#allocation44_spill] sm:$0xff] %v5159_v41  ;;  %v5182_v44 = vadd.f32 %v4781_v56, %v5032_v54  ;;  %v5243_v5 = vadd.f32 %v5032_v54, %v4843_v18  ;;  %v5273_v36 = vadd.f32 %v5032_v54, %v4869_v35 }
 0x11e   :  { %6507 = vst [vmem:[#allocation37_spill] sm:$0xff] %v5090_v6  ;;  %6509 = vst [vmem:[#allocation39_spill] sm:$0xff] %v5096_v20  ;;  %v5114_v20 = vadd.f32 %v4712_v33, %v5032_v54  ;;  %v5132_v33 = vadd.f32 %v4733_v40, %v5032_v54  ;;  %v5151_v40 = vadd.f32 %v5032_v54, %v4749_v45 }
 0x11f   :  { %v5120_v16 = vpop.f32.mrf.mxu0  ;;  %v5122_v47 = vpop.f32.mrf.mxu1  ;;  %6515 = vst [vmem:[#allocation45_spill] sm:$0xff] %v5182_v44  ;;  %6517 = vst [vmem:[#allocation47_spill] sm:$0xff] %v5190_v48  ;;  %v5278_v18 = vadd.f32 %v4877_v42, %v5032_v54  ;;  %v5282_v41 = vadd.f32 %v4880_v43, %v5032_v54  ;;  %v5298_v43 = vadd.f32 %v5032_v54, %v4893_v51 }
 0x120   :  { %6510 = vst [vmem:[#allocation40_spill] sm:$0xff] %v5132_v33  ;;  %6512 = vst [vmem:[#allocation42_spill] sm:$0xff] %v5151_v40  ;;  %v5210_v33 = vadd.f32 %v4808_v1, %v5032_v54  ;;  %v5228_v1 = vadd.f32 %v4829_v10, %v5032_v54  ;;  %v5235_v40 = vadd.f32 %v4832_v11, %v5032_v54 }
 0x121   :  { %v5141_v24 = vpop.f32.mrf.mxu0  ;;  %v5143_v29 = vpop.f32.mrf.mxu1  ;;  %v5247_v10 = vadd.f32 %v5032_v54, %v4845_v19  ;;  %6521 = vst [vmem:[#allocation51_spill] sm:$0xff] %v5251_v4  ;;  %v5255_v11 = vadd.f32 %v4856_v27, %v5032_v54  ;;  %v5269_v27 = vadd.f32 %v5032_v54, %v4867_v34  ;;  %6523 = vst [vmem:[#allocation53_spill] sm:$0xff] %v5273_v36  ;;  %v6537_v4 = vld [vmem:[#allocation2_spill] sm:$0xff]  ;;  %v6543_v36 = vld [vmem:[#allocation4_spill] sm:$0xff] }
 0x122   :  { %6518 = vst [vmem:[#allocation48_spill] sm:$0xff] %v5228_v1  ;;  %6519 = vst [vmem:[#allocation49_spill] sm:$0xff] %v5235_v40  ;;  %v5306_v1 = vadd.f32 %v4904_v59, %v5032_v54  ;;  %v5310_v35 = vadd.f32 %v5032_v54, %v4915_v2  ;;  %v5320_v58 = vadd.f32 %v5032_v54, %v4917_v3 }
 0x123   :  { %v5165_v6 = vpop.f32.mrf.mxu0  ;;  %v5167_v45 = vpop.f32.mrf.mxu1  ;;  %6520 = vst [vmem:[#allocation50_spill] sm:$0xff] %v5247_v10  ;;  %6522 = vst [vmem:[#allocation52_spill] sm:$0xff] %v5255_v11  ;;  %v5324_v59 = vadd.f32 %v4925_v14, %v5032_v54  ;;  %v5331_v10 = vadd.f32 %v4928_v15, %v5032_v54  ;;  %v5339_v3 = vadd.f32 %v5032_v54, %v4939_v30  ;;  %v6545_v30 = vld [vmem:[#allocation5_spill] sm:$0xff] }
 0x124   :  { %6524 = vst [vmem:[#allocation54_spill] sm:$0xff] %v5278_v18  ;;  %6525 = vst [vmem:[#allocation55_spill] sm:$0xff] %v5282_v41  ;;  %v5343_v14 = vadd.f32 %v5032_v54, %v4941_v31  ;;  %v5347_v2 = vadd.f32 %v4949_v46, %v5032_v54  ;;  %v5351_v15 = vadd.f32 %v6537_v4, %v5032_v54  ;;  %v6541_v18 = vld [vmem:[#allocation3_spill] sm:$0xff] }
 0x125   :  { %v5192_v52 = vpop.f32.mrf.mxu0  ;;  %v5194_v17 = vpop.f32.mrf.mxu1  ;;  %6526 = vst [vmem:[#allocation56_spill] sm:$0xff] %v5286_v26  ;;  %6527 = vst [vmem:[#allocation57_spill] sm:$0xff] %v5306_v1  ;;  %v5365_v4 = vadd.f32 %v5032_v54, %v6541_v18  ;;  %v5369_v11 = vadd.f32 %v5032_v54, %v6543_v36  ;;  %v6549_v41 = vld [vmem:[#allocation7_spill] sm:$0xff] }
 0x126   :  { %6528 = vst [vmem:[#allocation58_spill] sm:$0xff] %v5310_v35  ;;  %6529 = vst [vmem:[#allocation59_spill] sm:$0xff] %v5320_v58  ;;  %v5382_v46 = vadd.f32 %v5032_v54, %v6549_v41  ;;  %v6553_v58 = vld [vmem:[#allocation8_spill] sm:$0xff]  ;;  %v6554_v35 = vld [vmem:[#allocation9_spill] sm:$0xff] }
 0x127   :  { %v5216_v7 = vpop.f32.mrf.mxu0  ;;  %v5218_v39 = vpop.f32.mrf.mxu1  ;;  %6530 = vst [vmem:[#allocation60_spill] sm:$0xff] %v5324_v59  ;;  %6531 = vst [vmem:[#allocation61_spill] sm:$0xff] %v5331_v10  ;;  %v5398_v41 = vadd.f32 %v6554_v35, %v5032_v54 }
 0x128   :  { %6534 = vst [vmem:[#allocation64_spill] sm:$0xff] %v5339_v3  ;;  %6535 = vst [vmem:[#allocation65_spill] sm:$0xff] %v5343_v14 }
 0x129   :  { %v5237_v56 = vpop.f32.mrf.mxu0  ;;  %v5239_v61 = vpop.f32.mrf.mxu1  ;;  %6536 = vst [vmem:[#allocation66_spill] sm:$0xff] %v5347_v2  ;;  %6538 = vst [vmem:[#allocation2_spill] sm:$0xff] %v5351_v15  ;;  %v6561_v15 = vld [vmem:[#allocation12_spill] sm:$0xff]  ;;  %v6563_v2 = vld [vmem:[#allocation13_spill] sm:$0xff] }
 0x12a   :  { %6542 = vst [vmem:[#allocation3_spill] sm:$0xff] %v5365_v4  ;;  %6544 = vst [vmem:[#allocation4_spill] sm:$0xff] %v5369_v11  ;;  %v5416_v35 = vadd.f32 %v5032_v54, %v6561_v15  ;;  %v6569_v15 = vld [vmem:[#allocation15_spill] sm:$0xff]  ;;  %v6578_v4 = vld [vmem:[#allocation18_spill] sm:$0xff] }
 0x12b   :  { %v5261_v9 = vpop.f32.mrf.mxu0  ;;  %v5263_v19 = vpop.f32.mrf.mxu1  ;;  %6550 = vst [vmem:[#allocation7_spill] sm:$0xff] %v5382_v46  ;;  %v5435_v11 = vadd.f32 %v5032_v54, %v6569_v15  ;;  %v5465_v14 = vadd.f32 %v5032_v54, %v6578_v4  ;;  %v6580_v15 = vld [vmem:[#allocation19_spill] sm:$0xff] }
 0x12c   :  { %6562 = vst [vmem:[#allocation12_spill] sm:$0xff] %v5416_v35  ;;  %v6588_v35 = vld [vmem:[#allocation22_spill] sm:$0xff] }
 0x12d   :  { %v5288_v34 = vpop.f32.mrf.mxu0  ;;  %v5290_v44 = vpop.f32.mrf.mxu1  ;;  %6579 = vst [vmem:[#allocation18_spill] sm:$0xff] %v5465_v14 }
 0x12f   :  { %v5312_v48 = vpop.f32.mrf.mxu0  ;;  %v5314_v40 = vpop.f32.mrf.mxu1 }
 0x131   :  { %v5333_v42 = vpop.f32.mrf.mxu0  ;;  %v5335_v51 = vpop.f32.mrf.mxu1 }
 0x132   :  { %6532 = vst [vmem:[#allocation62_spill] sm:$0xff] %v5333_v42  ;;  %6533 = vst [vmem:[#allocation63_spill] sm:$0xff] %v5335_v51  ;;  %v5374_v51 = vadd.f32 %v6545_v30, %v5032_v54 }
 0x133   :  { %v5357_v42 = vpop.f32.mrf.mxu0  ;;  %v5359_v31 = vpop.f32.mrf.mxu1 }
 0x134   :  { %6539 = vst [vmem:[#allocation67_spill] sm:$0xff] %v5357_v42  ;;  %6540 = vst [vmem:[#allocation68_spill] sm:$0xff] %v5359_v31  ;;  %v6547_v31 = vld [vmem:[#allocation6_spill] sm:$0xff] }
 0x135   :  { %6546 = vst [vmem:[#allocation5_spill] sm:$0xff] %v5374_v51  ;;  %v5378_v42 = vadd.f32 %v6547_v31, %v5032_v54  ;;  %v5384_v18 = vpop.f32.mrf.mxu0  ;;  %v5386_v59 = vpop.f32.mrf.mxu1  ;;  %v5394_v31 = vadd.f32 %v5032_v54, %v6553_v58  ;;  %v6576_v51 = vld [vmem:[#allocation17_spill] sm:$0xff] }
 0x136   :  { %6551 = vst [vmem:[#allocation69_spill] sm:$0xff] %v5384_v18  ;;  %6552 = vst [vmem:[#allocation70_spill] sm:$0xff] %v5386_v59  ;;  %v6555_v18 = vld [vmem:[#allocation10_spill] sm:$0xff]  ;;  %v6557_v59 = vld [vmem:[#allocation11_spill] sm:$0xff] }
 0x137   :  { %6548 = vst [vmem:[#allocation6_spill] sm:$0xff] %v5378_v42  ;;  %v5402_v1 = vadd.f32 %v6555_v18, %v5032_v54  ;;  %v5406_v36 = vadd.f32 %v5032_v54, %v6557_v59  ;;  %v5408_v26 = vpop.f32.mrf.mxu0  ;;  %v5410_v10 = vpop.f32.mrf.mxu1  ;;  %v5420_v18 = vadd.f32 %v6563_v2, %v5032_v54  ;;  %v5439_v2 = vadd.f32 %v5032_v54, %v5007_v63  ;;  %v6584_v42 = vld [vmem:[#allocation21_spill] sm:$0xff] }
 0x138   :  { %6559 = vst [vmem:[#allocation10_spill] sm:$0xff] %v5408_v26  ;;  %6560 = vst [vmem:[#allocation11_spill] sm:$0xff] %v5410_v10  ;;  %v6565_v10 = vld [vmem:[#allocation14_spill] sm:$0xff]  ;;  %v5443_v59 = vadd.f32 %v5009_v22, %v5032_v54  ;;  %v6572_v26 = vld [vmem:[#allocation16_spill] sm:$0xff]  ;;  %v5478_v22 = vadd.f32 %v5032_v54, %v6584_v42 }
 0x139   :  { %6556 = vst [vmem:[#allocation8_spill] sm:$0xff] %v5402_v1  ;;  %6558 = vst [vmem:[#allocation9_spill] sm:$0xff] %v5406_v36  ;;  %v5427_v3 = vadd.f32 %v6565_v10, %v5032_v54  ;;  %v5429_v30 = vpop.f32.mrf.mxu0  ;;  %v5431_v58 = vpop.f32.mrf.mxu1  ;;  %v5447_v10 = vadd.f32 %v6572_v26, %v5032_v54  ;;  %v5461_v26 = vadd.f32 %v5032_v54, %v6576_v51  ;;  %v6589_v36 = vld [vmem:[#allocation23_spill] sm:$0xff] }
 0x13a   :  { %6564 = vst [vmem:[#allocation13_spill] sm:$0xff] %v5420_v18  ;;  %6567 = vst [vmem:[#allocation71_spill] sm:$0xff] %v5429_v30  ;;  %v5494_v42 = vadd.f32 %v6589_v36, %v5032_v54  ;;  %v5512_v36 = vadd.f32 %v5032_v54, %v5036_v55  ;;  %v6599_v55 = vld [vmem:[#allocation30_spill] sm:$0xff] }
 0x13b   :  { %6566 = vst [vmem:[#allocation14_spill] sm:$0xff] %v5427_v3  ;;  %6568 = vst [vmem:[#allocation72_spill] sm:$0xff] %v5431_v58  ;;  %v5453_v46 = vpop.f32.mrf.mxu0  ;;  %v5455_v63 = vpop.f32.mrf.mxu1  ;;  %v5470_v58 = vadd.f32 %v6580_v15, %v5032_v54  ;;  %v5531_v14 = vadd.f32 %v5032_v54, %v6599_v55  ;;  %v5566_v55 = vadd.f32 %v5120_v16, %v5032_v54 }
 0x13c   :  { %6570 = vst [vmem:[#allocation15_spill] sm:$0xff] %v5439_v2  ;;  %6571 = vst [vmem:[#allocation73_spill] sm:$0xff] %v5443_v59 }
 0x13d   :  { %6573 = vst [vmem:[#allocation16_spill] sm:$0xff] %v5447_v10  ;;  %6574 = vst [vmem:[#allocation74_spill] sm:$0xff] %v5453_v46  ;;  %v5480_v51 = vpop.f32.mrf.mxu0  ;;  %v5482_v18 = vpop.f32.mrf.mxu1  ;;  %v6594_v10 = vld [vmem:[#allocation26_spill] sm:$0xff] }
 0x13e   :  { %6575 = vst [vmem:[#allocation75_spill] sm:$0xff] %v5455_v63  ;;  %6577 = vst [vmem:[#allocation17_spill] sm:$0xff] %v5461_v26  ;;  %v6582_v63 = vld [vmem:[#allocation20_spill] sm:$0xff] }
 0x13f   :  { %6581 = vst [vmem:[#allocation19_spill] sm:$0xff] %v5470_v58  ;;  %v5474_v46 = vadd.f32 %v6582_v63, %v5032_v54  ;;  %6585 = vst [vmem:[#allocation21_spill] sm:$0xff] %v5478_v22  ;;  %v5490_v63 = vadd.f32 %v5032_v54, %v6588_v35  ;;  %v5504_v30 = vpop.f32.mrf.mxu0  ;;  %v5506_v3 = vpop.f32.mrf.mxu1  ;;  %v6608_v58 = vld [vmem:[#allocation39_spill] sm:$0xff] }
 0x140   :  { %6586 = vst [vmem:[#allocation76_spill] sm:$0xff] %v5480_v51  ;;  %6587 = vst [vmem:[#allocation77_spill] sm:$0xff] %v5482_v18  ;;  %v6590_v51 = vld [vmem:[#allocation24_spill] sm:$0xff]  ;;  %v6591_v18 = vld [vmem:[#allocation25_spill] sm:$0xff] }
 0x141   :  { %6583 = vst [vmem:[#allocation20_spill] sm:$0xff] %v5474_v46  ;;  %v5498_v1 = vadd.f32 %v6590_v51, %v5032_v54  ;;  %v5502_v4 = vadd.f32 %v5032_v54, %v6591_v18  ;;  %6592 = vst [vmem:[#allocation22_spill] sm:$0xff] %v5504_v30  ;;  %v5516_v51 = vadd.f32 %v6594_v10, %v5032_v54  ;;  %v5525_v15 = vpop.f32.mrf.mxu0  ;;  %v5527_v35 = vpop.f32.mrf.mxu1  ;;  %v6601_v10 = vld [vmem:[#allocation31_spill] sm:$0xff] }
 0x142   :  { %6593 = vst [vmem:[#allocation23_spill] sm:$0xff] %v5506_v3  ;;  %v6595_v3 = vld [vmem:[#allocation27_spill] sm:$0xff]  ;;  %6597 = vst [vmem:[#allocation25_spill] sm:$0xff] %v5525_v15  ;;  %v5535_v26 = vadd.f32 %v5032_v54, %v6601_v10  ;;  %v5561_v30 = vadd.f32 %v5032_v54, %v5098_v23  ;;  %v5598_v23 = vadd.f32 %v5032_v54, %v5192_v52 }
 0x143   :  { %v5523_v2 = vadd.f32 %v6595_v3, %v5032_v54  ;;  %6598 = vst [vmem:[#allocation26_spill] sm:$0xff] %v5527_v35  ;;  %6600 = vst [vmem:[#allocation27_spill] sm:$0xff] %v5531_v14  ;;  %v6603_v18 = vld [vmem:[#allocation35_spill] sm:$0xff]  ;;  %v5543_v3 = vadd.f32 %v5072_v62, %v5032_v54  ;;  %v5549_v22 = vpop.f32.mrf.mxu0  ;;  %v5551_v10 = vpop.f32.mrf.mxu1  ;;  %v5557_v62 = vadd.f32 %v5032_v54, %v6608_v58 }
 0x144   :  { %6602 = vst [vmem:[#allocation30_spill] sm:$0xff] %v5535_v26  ;;  %v5539_v59 = vadd.f32 %v6603_v18, %v5032_v54  ;;  %6606 = vst [vmem:[#allocation78_spill] sm:$0xff] %v5549_v22  ;;  %v5570_v35 = vadd.f32 %v5122_v47, %v5032_v54  ;;  %v5574_v18 = vadd.f32 %v5032_v54, %v5141_v24 }
 0x145   :  { %6596 = vst [vmem:[#allocation24_spill] sm:$0xff] %v5523_v2  ;;  %6605 = vst [vmem:[#allocation35_spill] sm:$0xff] %v5543_v3  ;;  %v5576_v58 = vpop.f32.mrf.mxu0  ;;  %v5578_v46 = vpop.f32.mrf.mxu1  ;;  %v5586_v47 = vadd.f32 %v5032_v54, %v5143_v29  ;;  %v5590_v24 = vadd.f32 %v5165_v6, %v5032_v54  ;;  %v5609_v52 = vadd.f32 %v5032_v54, %v5194_v17  ;;  %v6619_v17 = vld [vmem:[#allocation28_spill] sm:$0xff] }
 0x146   :  { %6604 = vst [vmem:[#allocation31_spill] sm:$0xff] %v5539_v59  ;;  %6607 = vst [vmem:[#allocation79_spill] sm:$0xff] %v5551_v10 }
 0x147   :  { %6609 = vst [vmem:[#allocation39_spill] sm:$0xff] %v5557_v62  ;;  %6610 = vst [vmem:[#allocation80_spill] sm:$0xff] %v5561_v30  ;;  %v3532_v15 = vpop.f32.mrf.mxu0  ;;  %v3724_v16 = vpop.f32.mrf.mxu1  ;;  %v6621_v62 = vld [vmem:[#allocation29_spill] sm:$0xff] }
 0x148   :  { %6611 = vst [vmem:[#allocation81_spill] sm:$0xff] %v5566_v55  ;;  %6612 = vst [vmem:[#allocation82_spill] sm:$0xff] %v5570_v35  ;;  %v1444_v29 = vadd.f32 %v3532_v15, %v5032_v54  ;;  %v2084_v22 = vadd.f32 %v3724_v16, %v5032_v54  ;;  %v6620_v55 = vmax.f32 %v6619_v17, 0.0  ;;  %v5624_v16 = vadd.f32 %v5216_v7, %v5032_v54 }
 0x149   :  { %6613 = vst [vmem:[#allocation83_spill] sm:$0xff] %v5574_v18  ;;  %6614 = vst [vmem:[#allocation84_spill] sm:$0xff] %v5576_v58  ;;  %v1438_v59 = vpop.f32.mrf.mxu0  ;;  %v2078_v26 = vpop.f32.mrf.mxu1  ;;  %v5635_v17 = vadd.f32 %v5218_v39, %v5032_v54 }
 0x14a   :  { %6615 = vst [vmem:[#allocation85_spill] sm:$0xff] %v5578_v46  ;;  %v5594_v46 = vadd.f32 %v5167_v45, %v5032_v54  ;;  %6617 = vst [vmem:[#allocation87_spill] sm:$0xff] %v5598_v23  ;;  %v2462_v14 = vmax.f32 %v1444_v29, 0.0  ;;  %v2590_v10 = vmax.f32 %v2084_v22, 0.0  ;;  %v1439_v58 = vadd.f32 %v5032_v54, %v1438_v59 }
 0x14b   :  { %6618 = vst [vmem:[#allocation88_spill] sm:$0xff] %v5609_v52  ;;  %v2079_v15 = vadd.f32 %v5032_v54, %v2078_v26  ;;  %v3535_v18 = vpop.f32.mrf.mxu0  ;;  %v3727_v35 = vpop.f32.mrf.mxu1  ;;  %v6622_v29 = vmax.f32 %v6621_v62, 0.0  ;;  %6623 = vst [vmem:[#allocation28_spill] sm:$0xff] %v5624_v16  ;;  %v6625_v62 = vld [vmem:[#allocation32_spill] sm:$0xff]  ;;  %v6635_v16 = vld [vmem:[#allocation37_spill] sm:$0xff] }
 0x14c   :  { %6616 = vst [vmem:[#allocation86_spill] sm:$0xff] %v5594_v46  ;;  %v2654_v30 = vmax.f32 %v6620_v55, %v2462_v14  ;;  %v2461_v2 = vmax.f32 %v1439_v58, 0.0  ;;  %v1454_v3 = vadd.f32 %v3535_v18, %v5032_v54  ;;  %v2094_v45 = vadd.f32 %v3727_v35, %v5032_v54 }
 0x14d   :  { %v2718_v22 = vmax.f32 %v6622_v29, %v2590_v10  ;;  %v2589_v59 = vmax.f32 %v2079_v15, 0.0  ;;  %v1448_v6 = vpop.f32.mrf.mxu0  ;;  %v2088_v23 = vpop.f32.mrf.mxu1  ;;  %v6624_v14 = vmax.f32 %v5056_v38, 0.0  ;;  %v6626_v10 = vmax.f32 %v6625_v62, 0.0 }
 0x14e   :  { %v1449_v15 = vadd.f32 %v5032_v54, %v1448_v6  ;;  %v2464_v7 = vmax.f32 %v1454_v3, 0.0  ;;  %v2592_v29 = vmax.f32 %v2094_v45, 0.0  ;;  %v2089_v18 = vadd.f32 %v5032_v54, %v2088_v23 }
 0x14f   :  { %v2782_v46 = vmax.f32 %v2654_v30, %v2718_v22  ;;  %v2653_v55 = vmax.f32 %v6624_v14, %v2461_v2  ;;  %v2717_v58 = vmax.f32 %v6626_v10, %v2589_v59  ;;  %v3538_v35 = vpop.f32.mrf.mxu0  ;;  %v3730_v26 = vpop.f32.mrf.mxu1  ;;  %v6627_v22 = vld [vmem:[#allocation33_spill] sm:$0xff]  ;;  %v6629_v59 = vld [vmem:[#allocation34_spill] sm:$0xff] }
 0x150   :  { %v2463_v30 = vmax.f32 %v1449_v15, 0.0  ;;  %v1464_v2 = vadd.f32 %v3538_v35, %v5032_v54  ;;  %v2104_v6 = vadd.f32 %v3730_v26, %v5032_v54  ;;  %v6628_v3 = vmax.f32 %v6627_v22, 0.0 }
 0x151   :  { %2847 = vst.msk [vmem:[%s6405_s3 + $0x8] sm:$0xff] %vm2845_vm2, %v2782_v46  ;;  %v2781_v38 = vmax.f32 %v2653_v55, %v2717_v58  ;;  %v6630_v23 = vmax.f32 %v6629_v59, 0.0  ;;  %v2591_v62 = vmax.f32 %v2089_v18, 0.0  ;;  %v1458_v10 = vpop.f32.mrf.mxu0  ;;  %v2098_v52 = vpop.f32.mrf.mxu1  ;;  %v6631_v46 = vmax.f32 %v5077_v12, 0.0 }
 0x152   :  { %v2656_v45 = vmax.f32 %v6628_v3, %v2464_v7  ;;  %v2466_v26 = vmax.f32 %v1464_v2, 0.0  ;;  %v2594_v58 = vmax.f32 %v2104_v6, 0.0  ;;  %v1459_v15 = vadd.f32 %v5032_v54, %v1458_v10 }
 0x153   :  { %v2720_v14 = vmax.f32 %v6630_v23, %v2592_v29  ;;  %2846 = vst.msk [vmem:[%s6405_s3] sm:$0xff] %vm2845_vm2, %v2781_v38  ;;  %v2655_v55 = vmax.f32 %v6631_v46, %v2463_v30  ;;  %v2574_v7 = vmax.f32 %v5635_v17, 0.0  ;;  %v6632_v29 = vmax.f32 %v5081_v13, 0.0  ;;  %v3541_v3 = vpop.f32.mrf.mxu0  ;;  %v3733_v59 = vpop.f32.mrf.mxu1  ;;  %v6633_v23 = vld [vmem:[#allocation36_spill] sm:$0xff] }
 0x154   :  { %v2099_v22 = vadd.f32 %v5032_v54, %v2098_v52  ;;  %v6634_v39 = vmax.f32 %v6633_v23, 0.0  ;;  %v6636_v12 = vmax.f32 %v6635_v16, 0.0  ;;  %v2465_v2 = vmax.f32 %v1459_v15, 0.0 }
 0x155   :  { %v2784_v35 = vmax.f32 %v2656_v45, %v2720_v14  ;;  %v2719_v18 = vmax.f32 %v6632_v29, %v2591_v62  ;;  %v1474_v6 = vadd.f32 %v3541_v3, %v5032_v54  ;;  %v5667_v10 = vadd.f32 %v5032_v54, %v5237_v56  ;;  %v2108_v14 = vpop.f32.mrf.mxu1  ;;  %v6637_v62 = vld [vmem:[#allocation38_spill] sm:$0xff] }
 0x156   :  { %v2658_v38 = vmax.f32 %v6634_v39, %v2466_v26  ;;  %v2722_v30 = vmax.f32 %v6636_v12, %v2594_v58  ;;  %v2593_v52 = vmax.f32 %v2099_v22, 0.0  ;;  %v2114_v45 = vadd.f32 %v3733_v59, %v5032_v54  ;;  %v1468_v39 = vpop.f32.mrf.mxu0 }
 0x157   :  { %2849 = vst.msk [vmem:[%s6405_s3 + $0x18] sm:$0xff] %vm2845_vm2, %v2784_v35  ;;  %v2783_v13 = vmax.f32 %v2655_v55, %v2719_v18  ;;  %v6638_v46 = vmax.f32 %v6637_v62, 0.0  ;;  %v2468_v58 = vmax.f32 %v1474_v6, 0.0  ;;  %v1469_v15 = vadd.f32 %v5032_v54, %v1468_v39  ;;  %v3736_v3 = vpop.f32.mrf.mxu1 }
 0x158   :  { %v2786_v16 = vmax.f32 %v2658_v38, %v2722_v30  ;;  %v5679_v56 = vadd.f32 %v5032_v54, %v5239_v61  ;;  %v6639_v55 = vmax.f32 %v5106_v25, 0.0  ;;  %v2596_v29 = vmax.f32 %v2114_v45, 0.0  ;;  %v3544_v22 = vpop.f32.mrf.mxu0 }
 0x159   :  { %v2657_v26 = vmax.f32 %v6638_v46, %v2465_v2  ;;  %2848 = vst.msk [vmem:[%s6405_s3 + $0x10] sm:$0xff] %vm2845_vm2, %v2783_v13  ;;  %v2109_v18 = vadd.f32 %v5032_v54, %v2108_v14  ;;  %v6640_v61 = vmax.f32 %v5110_v28, 0.0  ;;  %v2467_v23 = vmax.f32 %v1469_v15, 0.0  ;;  %v2118_v45 = vpop.f32.mrf.mxu1 }
 0x15a   :  { %v2721_v35 = vmax.f32 %v6639_v55, %v2593_v52  ;;  %2851 = vst.msk [vmem:[%s6405_s3 + $0x28] sm:$0xff] %vm2845_vm2, %v2786_v16  ;;  %v1484_v38 = vadd.f32 %v3544_v22, %v5032_v54  ;;  %v2124_v12 = vadd.f32 %v3736_v3, %v5032_v54  ;;  %v2445_v25 = vmax.f32 %v5667_v10, 0.0  ;;  %v1478_v52 = vpop.f32.mrf.mxu0  ;;  %v6646_v22 = vld [vmem:[#allocation41_spill] sm:$0xff] }
 0x15b   :  { %v2660_v59 = vmax.f32 %v6640_v61, %v2468_v58  ;;  %v6641_v2 = vmax.f32 %v5114_v20, 0.0  ;;  %v2595_v13 = vmax.f32 %v2109_v18, 0.0  ;;  %v6642_v39 = vmax.f32 %v5118_v21, 0.0  ;;  %v3739_v21 = vpop.f32.mrf.mxu1 }
 0x15c   :  { %v2785_v30 = vmax.f32 %v2657_v26, %v2721_v35  ;;  %v2470_v16 = vmax.f32 %v1484_v38, 0.0  ;;  %v2598_v28 = vmax.f32 %v2124_v12, 0.0  ;;  %v1479_v62 = vadd.f32 %v5032_v54, %v1478_v52  ;;  %v3547_v55 = vpop.f32.mrf.mxu0  ;;  %v6644_v35 = vld [vmem:[#allocation40_spill] sm:$0xff] }
 0x15d   :  { %v2724_v6 = vmax.f32 %v6641_v2, %v2596_v29  ;;  %v2659_v14 = vmax.f32 %v6642_v39, %v2467_v23  ;;  %v2573_v46 = vmax.f32 %v5679_v56, 0.0  ;;  %v6643_v20 = vmax.f32 %v5128_v32, 0.0 }
 0x15e   :  { %2850 = vst.msk [vmem:[%s6405_s3 + $0x20] sm:$0xff] %vm2845_vm2, %v2785_v30  ;;  %v2119_v15 = vadd.f32 %v5032_v54, %v2118_v45  ;;  %v6645_v29 = vmax.f32 %v6644_v35, 0.0  ;;  %v6647_v3 = vmax.f32 %v6646_v22, 0.0  ;;  %v2469_v23 = vmax.f32 %v1479_v62, 0.0  ;;  %v1488_v2 = vpop.f32.mrf.mxu0 }
 0x15f   :  { %v2788_v26 = vmax.f32 %v2660_v59, %v2724_v6  ;;  %v2723_v58 = vmax.f32 %v6643_v20, %v2595_v13  ;;  %v1494_v38 = vadd.f32 %v3547_v55, %v5032_v54  ;;  %v5717_v12 = vadd.f32 %v5261_v9, %v5032_v54  ;;  %v2128_v6 = vpop.f32.mrf.mxu1 }
 0x160   :  { %v2662_v18 = vmax.f32 %v6645_v29, %v2470_v16  ;;  %v2726_v61 = vmax.f32 %v6647_v3, %v2598_v28  ;;  %v2597_v59 = vmax.f32 %v2119_v15, 0.0  ;;  %v2134_v30 = vadd.f32 %v3739_v21, %v5032_v54  ;;  %v6653_v3 = vld [vmem:[#allocation44_spill] sm:$0xff] }
 0x161   :  { %2853 = vst.msk [vmem:[%s6405_s3 + $0x38] sm:$0xff] %vm2845_vm2, %v2788_v26  ;;  %v2787_v32 = vmax.f32 %v2659_v14, %v2723_v58  ;;  %v6648_v52 = vmax.f32 %v5147_v37, 0.0  ;;  %v2472_v39 = vmax.f32 %v1494_v38, 0.0  ;;  %v1489_v16 = vadd.f32 %v5032_v54, %v1488_v2  ;;  %v6649_v14 = vld [vmem:[#allocation42_spill] sm:$0xff]  ;;  %v3550_v37 = vpop.f32.mrf.mxu0  ;;  %v3742_v58 = vpop.f32.mrf.mxu1 }
 0x162   :  { %v2790_v13 = vmax.f32 %v2662_v18, %v2726_v61  ;;  %v5729_v9 = vadd.f32 %v5263_v19, %v5032_v54  ;;  %v6650_v28 = vmax.f32 %v6649_v14, 0.0  ;;  %v2600_v26 = vmax.f32 %v2134_v30, 0.0  ;;  %v6651_v19 = vld [vmem:[#allocation43_spill] sm:$0xff] }
 0x163   :  { %v2661_v45 = vmax.f32 %v6648_v52, %v2469_v23  ;;  %2852 = vst.msk [vmem:[%s6405_s3 + $0x30] sm:$0xff] %vm2845_vm2, %v2787_v32  ;;  %v2129_v20 = vadd.f32 %v5032_v54, %v2128_v6  ;;  %v6652_v15 = vmax.f32 %v6651_v19, 0.0  ;;  %v2471_v21 = vmax.f32 %v1489_v16, 0.0  ;;  %v1498_v32 = vpop.f32.mrf.mxu0 }
 0x164   :  { %v2725_v62 = vmax.f32 %v6650_v28, %v2597_v59  ;;  %2855 = vst.msk [vmem:[%s6405_s3 + $0x48] sm:$0xff] %vm2845_vm2, %v2790_v13  ;;  %v1504_v35 = vadd.f32 %v3550_v37, %v5032_v54  ;;  %v2144_v29 = vadd.f32 %v3742_v58, %v5032_v54  ;;  %v2448_v18 = vmax.f32 %v5717_v12, 0.0  ;;  %v2138_v59 = vpop.f32.mrf.mxu1  ;;  %v6659_v58 = vld [vmem:[#allocation46_spill] sm:$0xff] }
 0x165   :  { %v2664_v55 = vmax.f32 %v6652_v15, %v2472_v39  ;;  %v6654_v61 = vmax.f32 %v6653_v3, 0.0  ;;  %v2599_v38 = vmax.f32 %v2129_v20, 0.0  ;;  %v6655_v30 = vmax.f32 %v5173_v49, 0.0 }
 0x166   :  { %v2789_v22 = vmax.f32 %v2661_v45, %v2725_v62  ;;  %v2474_v6 = vmax.f32 %v1504_v35, 0.0  ;;  %v2602_v13 = vmax.f32 %v2144_v29, 0.0  ;;  %v1499_v52 = vadd.f32 %v5032_v54, %v1498_v32  ;;  %v3553_v62 = vpop.f32.mrf.mxu0  ;;  %v3745_v49 = vpop.f32.mrf.mxu1 }
 0x167   :  { %v2728_v23 = vmax.f32 %v6654_v61, %v2600_v26  ;;  %v2663_v2 = vmax.f32 %v6655_v30, %v2471_v21  ;;  %v2576_v39 = vmax.f32 %v5729_v9, 0.0  ;;  %v6656_v16 = vmax.f32 %v5177_v8, 0.0  ;;  %v6657_v26 = vld [vmem:[#allocation45_spill] sm:$0xff] }
 0x168   :  { %2854 = vst.msk [vmem:[%s6405_s3 + $0x40] sm:$0xff] %vm2845_vm2, %v2789_v22  ;;  %v2139_v28 = vadd.f32 %v5032_v54, %v2138_v59  ;;  %v6658_v20 = vmax.f32 %v6657_v26, 0.0  ;;  %v6660_v19 = vmax.f32 %v6659_v58, 0.0  ;;  %v2473_v21 = vmax.f32 %v1499_v52, 0.0  ;;  %v1508_v3 = vpop.f32.mrf.mxu0  ;;  %v2148_v61 = vpop.f32.mrf.mxu1 }
 0x169   :  { %v2792_v45 = vmax.f32 %v2664_v55, %v2728_v23  ;;  %v2727_v14 = vmax.f32 %v6656_v16, %v2599_v38  ;;  %v1514_v35 = vadd.f32 %v3553_v62, %v5032_v54  ;;  %v5767_v29 = vadd.f32 %v5032_v54, %v5288_v34  ;;  %v6661_v38 = vld [vmem:[#allocation47_spill] sm:$0xff] }
 0x16a   :  { %v2666_v37 = vmax.f32 %v6658_v20, %v2474_v6  ;;  %v2730_v15 = vmax.f32 %v6660_v19, %v2602_v13  ;;  %v2601_v55 = vmax.f32 %v2139_v28, 0.0  ;;  %v2154_v22 = vadd.f32 %v3745_v49, %v5032_v54  ;;  %v3556_v16 = vpop.f32.mrf.mxu0 }
 0x16b   :  { %2857 = vst.msk [vmem:[%s6405_s3 + $0x58] sm:$0xff] %vm2845_vm2, %v2792_v45  ;;  %v2791_v8 = vmax.f32 %v2663_v2, %v2727_v14  ;;  %v6662_v32 = vmax.f32 %v6661_v38, 0.0  ;;  %v2476_v30 = vmax.f32 %v1514_v35, 0.0  ;;  %v1509_v6 = vadd.f32 %v5032_v54, %v1508_v3  ;;  %v3748_v14 = vpop.f32.mrf.mxu1 }
 0x16c   :  { %v2794_v23 = vmax.f32 %v2666_v37, %v2730_v15  ;;  %v5779_v34 = vadd.f32 %v5032_v54, %v5290_v44  ;;  %v6663_v2 = vmax.f32 %v5202_v57, 0.0  ;;  %v2604_v52 = vmax.f32 %v2154_v22, 0.0  ;;  %v1518_v15 = vpop.f32.mrf.mxu0 }
 0x16d   :  { %v2665_v59 = vmax.f32 %v6662_v32, %v2473_v21  ;;  %2856 = vst.msk [vmem:[%s6405_s3 + $0x50] sm:$0xff] %vm2845_vm2, %v2791_v8  ;;  %v2149_v45 = vadd.f32 %v5032_v54, %v2148_v61  ;;  %v6664_v44 = vmax.f32 %v5206_v60, 0.0  ;;  %v2475_v62 = vmax.f32 %v1509_v6, 0.0  ;;  %v2158_v21 = vpop.f32.mrf.mxu1 }
 0x16e   :  { %v2729_v13 = vmax.f32 %v6663_v2, %v2601_v55  ;;  %2859 = vst.msk [vmem:[%s6405_s3 + $0x68] sm:$0xff] %vm2845_vm2, %v2794_v23  ;;  %v1524_v49 = vadd.f32 %v3556_v16, %v5032_v54  ;;  %v2164_v26 = vadd.f32 %v3748_v14, %v5032_v54  ;;  %v2447_v57 = vmax.f32 %v5767_v29, 0.0  ;;  %v3559_v32 = vpop.f32.mrf.mxu0  ;;  %v6670_v2 = vld [vmem:[#allocation49_spill] sm:$0xff] }
 0x16f   :  { %v2668_v28 = vmax.f32 %v6664_v44, %v2476_v30  ;;  %v6665_v37 = vmax.f32 %v5210_v33, 0.0  ;;  %v2603_v19 = vmax.f32 %v2149_v45, 0.0  ;;  %v6666_v35 = vmax.f32 %v5214_v53, 0.0  ;;  %v3751_v53 = vpop.f32.mrf.mxu1 }
 0x170   :  { %v2793_v20 = vmax.f32 %v2665_v59, %v2729_v13  ;;  %v2478_v55 = vmax.f32 %v1524_v49, 0.0  ;;  %v2606_v60 = vmax.f32 %v2164_v26, 0.0  ;;  %v1519_v22 = vadd.f32 %v5032_v54, %v1518_v15  ;;  %v6668_v59 = vld [vmem:[#allocation48_spill] sm:$0xff]  ;;  %v6673_v15 = vld [vmem:[#allocation50_spill] sm:$0xff] }
 0x171   :  { %v2732_v58 = vmax.f32 %v6665_v37, %v2604_v52  ;;  %v2667_v8 = vmax.f32 %v6666_v35, %v2475_v62  ;;  %v2575_v3 = vmax.f32 %v5779_v34, 0.0  ;;  %v6667_v33 = vmax.f32 %v5224_v0, 0.0  ;;  %v1528_v62 = vpop.f32.mrf.mxu0  ;;  %v2168_v49 = vpop.f32.mrf.mxu1 }
 0x172   :  { %2858 = vst.msk [vmem:[%s6405_s3 + $0x60] sm:$0xff] %vm2845_vm2, %v2793_v20  ;;  %v2159_v38 = vadd.f32 %v5032_v54, %v2158_v21  ;;  %v6669_v30 = vmax.f32 %v6668_v59, 0.0  ;;  %v6671_v13 = vmax.f32 %v6670_v2, 0.0  ;;  %v2477_v45 = vmax.f32 %v1519_v22, 0.0  ;;  %v6677_v59 = vld [vmem:[#allocation52_spill] sm:$0xff] }
 0x173   :  { %v2796_v61 = vmax.f32 %v2668_v28, %v2732_v58  ;;  %v2731_v23 = vmax.f32 %v6667_v33, %v2603_v19  ;;  %v1534_v16 = vadd.f32 %v3559_v32, %v5032_v54  ;;  %v5817_v14 = vadd.f32 %v5312_v48, %v5032_v54 }
 0x174   :  { %v2670_v6 = vmax.f32 %v6669_v30, %v2478_v55  ;;  %v2734_v52 = vmax.f32 %v6671_v13, %v2606_v60  ;;  %v2605_v44 = vmax.f32 %v2159_v38, 0.0  ;;  %v2174_v28 = vadd.f32 %v3751_v53, %v5032_v54  ;;  %v3754_v60 = vpop.f32.mrf.mxu1 }
 0x175   :  { %2861 = vst.msk [vmem:[%s6405_s3 + $0x78] sm:$0xff] %vm2845_vm2, %v2796_v61  ;;  %v2795_v0 = vmax.f32 %v2667_v8, %v2731_v23  ;;  %v6672_v20 = vmax.f32 %v5243_v5, 0.0  ;;  %v2480_v58 = vmax.f32 %v1534_v16, 0.0  ;;  %v1529_v19 = vadd.f32 %v5032_v54, %v1528_v62  ;;  %v3562_v5 = vpop.f32.mrf.mxu0 }
 0x176   :  { %v2798_v26 = vmax.f32 %v2670_v6, %v2734_v52  ;;  %v5829_v48 = vadd.f32 %v5314_v40, %v5032_v54  ;;  %v6674_v21 = vmax.f32 %v6673_v15, 0.0  ;;  %v2608_v8 = vmax.f32 %v2174_v28, 0.0  ;;  %v6675_v40 = vld [vmem:[#allocation51_spill] sm:$0xff]  ;;  %v2178_v52 = vpop.f32.mrf.mxu1  ;;  %v6682_v15 = vld [vmem:[#allocation54_spill] sm:$0xff] }
 0x177   :  { %v2669_v37 = vmax.f32 %v6672_v20, %v2477_v45  ;;  %2860 = vst.msk [vmem:[%s6405_s3 + $0x70] sm:$0xff] %vm2845_vm2, %v2795_v0  ;;  %v2169_v55 = vadd.f32 %v5032_v54, %v2168_v49  ;;  %v6676_v22 = vmax.f32 %v6675_v40, 0.0  ;;  %v2479_v33 = vmax.f32 %v1529_v19, 0.0  ;;  %v1538_v13 = vpop.f32.mrf.mxu0 }
 0x178   :  { %v2733_v35 = vmax.f32 %v6674_v21, %v2605_v44  ;;  %2863 = vst.msk [vmem:[%s6405_s3 + $0x88] sm:$0xff] %vm2845_vm2, %v2798_v26  ;;  %v1544_v23 = vadd.f32 %v3562_v5, %v5032_v54  ;;  %v2184_v38 = vadd.f32 %v3754_v60, %v5032_v54  ;;  %v2450_v32 = vmax.f32 %v5817_v14, 0.0  ;;  %v6680_v26 = vld [vmem:[#allocation53_spill] sm:$0xff] }
 0x179   :  { %v2672_v61 = vmax.f32 %v6676_v22, %v2480_v58  ;;  %v6678_v30 = vmax.f32 %v6677_v59, 0.0  ;;  %v2607_v2 = vmax.f32 %v2169_v55, 0.0  ;;  %v6679_v45 = vmax.f32 %v5269_v27, 0.0  ;;  %v3565_v19 = vpop.f32.mrf.mxu0  ;;  %v3757_v27 = vpop.f32.mrf.mxu1  ;;  %v6686_v22 = vld [vmem:[#allocation62_spill] sm:$0xff] }
 0x17a   :  { %v2797_v53 = vmax.f32 %v2669_v37, %v2733_v35  ;;  %v2482_v0 = vmax.f32 %v1544_v23, 0.0  ;;  %v2610_v44 = vmax.f32 %v2184_v38, 0.0  ;;  %v1539_v28 = vadd.f32 %v5032_v54, %v1538_v13 }
 0x17b   :  { %v2736_v6 = vmax.f32 %v6678_v30, %v2608_v8  ;;  %v2671_v16 = vmax.f32 %v6679_v45, %v2479_v33  ;;  %v2578_v62 = vmax.f32 %v5829_v48, 0.0  ;;  %v6681_v20 = vmax.f32 %v6680_v26, 0.0  ;;  %v6684_v8 = vld [vmem:[#allocation55_spill] sm:$0xff]  ;;  %v2188_v59 = vpop.f32.mrf.mxu1 }
 0x17c   :  { %2862 = vst.msk [vmem:[%s6405_s3 + $0x80] sm:$0xff] %vm2845_vm2, %v2797_v53  ;;  %v2179_v58 = vadd.f32 %v5032_v54, %v2178_v52  ;;  %v6683_v21 = vmax.f32 %v6682_v15, 0.0  ;;  %v6685_v55 = vmax.f32 %v6684_v8, 0.0  ;;  %v2481_v60 = vmax.f32 %v1539_v28, 0.0  ;;  %v1548_v53 = vpop.f32.mrf.mxu0  ;;  %v6692_v8 = vld [vmem:[#allocation57_spill] sm:$0xff] }
 0x17d   :  { %v2800_v49 = vmax.f32 %v2672_v61, %v2736_v6  ;;  %v2735_v37 = vmax.f32 %v6681_v20, %v2607_v2  ;;  %v1554_v40 = vadd.f32 %v3565_v19, %v5032_v54  ;;  %v5867_v33 = vadd.f32 %v5032_v54, %v6686_v22  ;;  %v6687_v6 = vld [vmem:[#allocation56_spill] sm:$0xff] }
 0x17e   :  { %v2674_v35 = vmax.f32 %v6683_v21, %v2482_v0  ;;  %v2738_v5 = vmax.f32 %v6685_v55, %v2610_v44  ;;  %v2609_v23 = vmax.f32 %v2179_v58, 0.0  ;;  %v2194_v38 = vadd.f32 %v3757_v27, %v5032_v54  ;;  %v6689_v0 = vld [vmem:[#allocation63_spill] sm:$0xff]  ;;  %v3568_v20 = vpop.f32.mrf.mxu0 }
 0x17f   :  { %2865 = vst.msk [vmem:[%s6405_s3 + $0x98] sm:$0xff] %vm2845_vm2, %v2800_v49  ;;  %v2799_v61 = vmax.f32 %v2671_v16, %v2735_v37  ;;  %v6688_v2 = vmax.f32 %v6687_v6, 0.0  ;;  %v2484_v52 = vmax.f32 %v1554_v40, 0.0  ;;  %v1549_v45 = vadd.f32 %v5032_v54, %v1548_v53  ;;  %v3760_v37 = vpop.f32.mrf.mxu1 }
 0x180   :  { %v2802_v30 = vmax.f32 %v2674_v35, %v2738_v5  ;;  %v5879_v44 = vadd.f32 %v5032_v54, %v6689_v0  ;;  %v6690_v16 = vmax.f32 %v5298_v43, 0.0  ;;  %v2612_v49 = vmax.f32 %v2194_v38, 0.0  ;;  %v1558_v40 = vpop.f32.mrf.mxu0 }
 0x181   :  { %v2673_v13 = vmax.f32 %v6688_v2, %v2481_v60  ;;  %2864 = vst.msk [vmem:[%s6405_s3 + $0x90] sm:$0xff] %vm2845_vm2, %v2799_v61  ;;  %v2189_v26 = vadd.f32 %v5032_v54, %v2188_v59  ;;  %v6691_v58 = vmax.f32 %v5302_v50, 0.0  ;;  %v2483_v27 = vmax.f32 %v1549_v45, 0.0  ;;  %v2198_v22 = vpop.f32.mrf.mxu1  ;;  %v6694_v61 = vld [vmem:[#allocation58_spill] sm:$0xff]  ;;  %v6696_v2 = vld [vmem:[#allocation59_spill] sm:$0xff] }
 0x182   :  { %v2737_v28 = vmax.f32 %v6690_v16, %v2609_v23  ;;  %2867 = vst.msk [vmem:[%s6405_s3 + $0xa8] sm:$0xff] %vm2845_vm2, %v2802_v30  ;;  %v1564_v15 = vadd.f32 %v3568_v20, %v5032_v54  ;;  %v2204_v21 = vadd.f32 %v3760_v37, %v5032_v54  ;;  %v2449_v43 = vmax.f32 %v5867_v33, 0.0  ;;  %v5912_v45 = vld [vmem:[%s6404_s2] ss:$0 sm:$0xff]  ;;  %v3571_v16 = vpop.f32.mrf.mxu0  ;;  %v6700_v20 = vld [vmem:[#allocation61_spill] sm:$0xff] }
 0x183   :  { %v2676_v19 = vmax.f32 %v6691_v58, %v2484_v52  ;;  %v6693_v55 = vmax.f32 %v6692_v8, 0.0  ;;  %v2611_v60 = vmax.f32 %v2189_v26, 0.0  ;;  %v6695_v23 = vmax.f32 %v6694_v61, 0.0 }
 0x184   :  { %v2801_v35 = vmax.f32 %v2673_v13, %v2737_v28  ;;  %v2486_v53 = vmax.f32 %v1564_v15, 0.0  ;;  %v2614_v50 = vmax.f32 %v2204_v21, 0.0  ;;  %v1559_v59 = vadd.f32 %v5032_v54, %v1558_v40  ;;  %v3763_v54 = vpop.f32.mrf.mxu1  ;;  %v6698_v28 = vld [vmem:[#allocation60_spill] sm:$0xff]  ;;  %v6702_v15 = vld [vmem:[#allocation67_spill] sm:$0xff] }
 0x185   :  { %v2740_v5 = vmax.f32 %v6693_v55, %v2612_v49  ;;  %v2675_v38 = vmax.f32 %v6695_v23, %v2483_v27  ;;  %v2577_v30 = vmax.f32 %v5879_v44, 0.0  ;;  %v6697_v13 = vmax.f32 %v6696_v2, 0.0 }
 0x186   :  { %2866 = vst.msk [vmem:[%s6405_s3 + $0xa0] sm:$0xff] %vm2845_vm2, %v2801_v35  ;;  %v2199_v0 = vadd.f32 %v5912_v45, %v2198_v22  ;;  %v6699_v49 = vmax.f32 %v6698_v28, 0.0  ;;  %v6701_v37 = vmax.f32 %v6700_v20, 0.0  ;;  %v2485_v27 = vmax.f32 %v1559_v59, 0.0  ;;  %v6703_v22 = vld [vmem:[#allocation64_spill] sm:$0xff]  ;;  %v6708_v28 = vld [vmem:[#allocation66_spill] sm:$0xff] }
 0x187   :  { %v2804_v6 = vmax.f32 %v2676_v19, %v2740_v5  ;;  %v2739_v52 = vmax.f32 %v6697_v13, %v2611_v60  ;;  %v1574_v19 = vadd.f32 %v5912_v45, %v3571_v16  ;;  %v5922_v21 = vadd.f32 %v5912_v45, %v6702_v15  ;;  %v1568_v5 = vpop.f32.mrf.mxu0  ;;  %v2208_v60 = vpop.f32.mrf.mxu1  ;;  %v6705_v59 = vld [vmem:[#allocation68_spill] sm:$0xff]  ;;  %v6710_v15 = vld [vmem:[#allocation2_spill] sm:$0xff] }
 0x188   :  { %v2678_v26 = vmax.f32 %v6699_v49, %v2486_v53  ;;  %v2742_v58 = vmax.f32 %v6701_v37, %v2614_v50  ;;  %v2613_v8 = vmax.f32 %v2199_v0, 0.0  ;;  %v2214_v55 = vadd.f32 %v5912_v45, %v3763_v54 }
 0x189   :  { %2869 = vst.msk [vmem:[%s6405_s3 + $0xb8] sm:$0xff] %vm2845_vm2, %v2804_v6  ;;  %v2803_v35 = vmax.f32 %v2675_v38, %v2739_v52  ;;  %v6704_v61 = vmax.f32 %v6703_v22, 0.0  ;;  %v2488_v53 = vmax.f32 %v1574_v19, 0.0  ;;  %v1569_v50 = vadd.f32 %v5912_v45, %v1568_v5  ;;  %v6706_v38 = vld [vmem:[#allocation65_spill] sm:$0xff]  ;;  %v3574_v16 = vpop.f32.mrf.mxu0  ;;  %v3766_v54 = vpop.f32.mrf.mxu1  ;;  %v6712_v22 = vld [vmem:[#allocation3_spill] sm:$0xff] }
 0x18a   :  { %v2806_v40 = vmax.f32 %v2678_v26, %v2742_v58  ;;  %v5934_v2 = vadd.f32 %v5912_v45, %v6705_v59  ;;  %v6707_v6 = vmax.f32 %v6706_v38, 0.0  ;;  %v2616_v52 = vmax.f32 %v2214_v55, 0.0 }
 0x18b   :  { %v2677_v23 = vmax.f32 %v6704_v61, %v2485_v27  ;;  %2868 = vst.msk [vmem:[%s6405_s3 + $0xb0] sm:$0xff] %vm2845_vm2, %v2803_v35  ;;  %v2209_v0 = vadd.f32 %v5912_v45, %v2208_v60  ;;  %v6709_v49 = vmax.f32 %v6708_v28, 0.0  ;;  %v2487_v20 = vmax.f32 %v1569_v50, 0.0  ;;  %v1578_v5 = vpop.f32.mrf.mxu0  ;;  %v2218_v60 = vpop.f32.mrf.mxu1  ;;  %v6716_v28 = vld [vmem:[#allocation5_spill] sm:$0xff] }
 0x18c   :  { %v2741_v13 = vmax.f32 %v6707_v6, %v2613_v8  ;;  %2871 = vst.msk [vmem:[%s6405_s3 + $0xc8] sm:$0xff] %vm2845_vm2, %v2806_v40  ;;  %v1584_v37 = vadd.f32 %v5912_v45, %v3574_v16  ;;  %v2224_v58 = vadd.f32 %v5912_v45, %v3766_v54  ;;  %v2452_v27 = vmax.f32 %v5922_v21, 0.0  ;;  %v6714_v6 = vld [vmem:[#allocation4_spill] sm:$0xff] }
 0x18d   :  { %v2680_v26 = vmax.f32 %v6709_v49, %v2488_v53  ;;  %v6711_v35 = vmax.f32 %v6710_v15, 0.0  ;;  %v2615_v55 = vmax.f32 %v2209_v0, 0.0  ;;  %v6713_v61 = vmax.f32 %v6712_v22, 0.0  ;;  %v3577_v16 = vpop.f32.mrf.mxu0  ;;  %v3769_v54 = vpop.f32.mrf.mxu1  ;;  %v6720_v22 = vld [vmem:[#allocation69_spill] sm:$0xff] }
 0x18e   :  { %v2805_v19 = vmax.f32 %v2677_v23, %v2741_v13  ;;  %v2490_v59 = vmax.f32 %v1584_v37, 0.0  ;;  %v2618_v38 = vmax.f32 %v2224_v58, 0.0  ;;  %v1579_v53 = vadd.f32 %v5912_v45, %v1578_v5  ;;  %v6718_v37 = vld [vmem:[#allocation6_spill] sm:$0xff] }
 0x18f   :  { %v2744_v8 = vmax.f32 %v6711_v35, %v2616_v52  ;;  %v2679_v40 = vmax.f32 %v6713_v61, %v2487_v20  ;;  %v6715_v13 = vmax.f32 %v6714_v6, 0.0  ;;  %v2219_v0 = vadd.f32 %v5912_v45, %v2218_v60  ;;  %v1588_v60 = vpop.f32.mrf.mxu0  ;;  %v2228_v61 = vpop.f32.mrf.mxu1 }
 0x190   :  { %2870 = vst.msk [vmem:[%s6405_s3 + $0xc0] sm:$0xff] %vm2845_vm2, %v2805_v19  ;;  %v6717_v49 = vmax.f32 %v6716_v28, 0.0  ;;  %v6719_v58 = vmax.f32 %v6718_v37, 0.0  ;;  %v2489_v35 = vmax.f32 %v1579_v53, 0.0  ;;  %v1594_v5 = vadd.f32 %v5912_v45, %v3577_v16  ;;  %v6723_v28 = vld [vmem:[#allocation70_spill] sm:$0xff] }
 0x191   :  { %v2808_v23 = vmax.f32 %v2680_v26, %v2744_v8  ;;  %v2743_v52 = vmax.f32 %v6715_v13, %v2615_v55  ;;  %v5972_v19 = vadd.f32 %v5912_v45, %v6720_v22  ;;  %v2617_v8 = vmax.f32 %v2219_v0, 0.0 }
 0x192   :  { %v2682_v20 = vmax.f32 %v6717_v49, %v2490_v59  ;;  %v2746_v15 = vmax.f32 %v6719_v58, %v2618_v38  ;;  %v2234_v55 = vadd.f32 %v5912_v45, %v3769_v54  ;;  %v6721_v38 = vld [vmem:[#allocation7_spill] sm:$0xff]  ;;  %v2492_v13 = vmax.f32 %v1594_v5, 0.0  ;;  %v3580_v54 = vpop.f32.mrf.mxu0 }
 0x193   :  { %2873 = vst.msk [vmem:[%s6405_s3 + $0xd8] sm:$0xff] %vm2845_vm2, %v2808_v23  ;;  %v2807_v26 = vmax.f32 %v2679_v40, %v2743_v52  ;;  %v6722_v53 = vmax.f32 %v6721_v38, 0.0  ;;  %v1589_v16 = vadd.f32 %v5912_v45, %v1588_v60  ;;  %v5984_v49 = vadd.f32 %v5912_v45, %v6723_v28 }
 0x194   :  { %v2810_v59 = vmax.f32 %v2682_v20, %v2746_v15  ;;  %v6724_v40 = vmax.f32 %v5394_v31, 0.0  ;;  %v2620_v52 = vmax.f32 %v2234_v55, 0.0  ;;  %v2229_v0 = vadd.f32 %v5912_v45, %v2228_v61  ;;  %v3772_v20 = vpop.f32.mrf.mxu1  ;;  %v1598_v61 = vpop.f32.mrf.mxu0 }
 0x195   :  { %v2681_v6 = vmax.f32 %v6722_v53, %v2489_v35  ;;  %2872 = vst.msk [vmem:[%s6405_s3 + $0xd0] sm:$0xff] %vm2845_vm2, %v2807_v26  ;;  %v6725_v37 = vmax.f32 %v5398_v41, 0.0  ;;  %v2491_v15 = vmax.f32 %v1589_v16, 0.0  ;;  %v1604_v35 = vadd.f32 %v5912_v45, %v3580_v54  ;;  %v6726_v26 = vld [vmem:[#allocation8_spill] sm:$0xff]  ;;  %v6728_v53 = vld [vmem:[#allocation9_spill] sm:$0xff]  ;;  %v6736_v16 = vld [vmem:[#allocation10_spill] sm:$0xff] }
 0x196   :  { %v2745_v23 = vmax.f32 %v6724_v40, %v2617_v8  ;;  %2875 = vst.msk [vmem:[%s6405_s3 + $0xe8] sm:$0xff] %vm2845_vm2, %v2810_v59  ;;  %v2244_v5 = vadd.f32 %v5912_v45, %v3772_v20  ;;  %v6727_v8 = vmax.f32 %v6726_v26, 0.0  ;;  %v2619_v60 = vmax.f32 %v2229_v0, 0.0  ;;  %v2238_v38 = vpop.f32.mrf.mxu1  ;;  %v3583_v20 = vpop.f32.mrf.mxu0  ;;  %v6734_v26 = vld [vmem:[#allocation14_spill] sm:$0xff] }
 0x197   :  { %v2684_v58 = vmax.f32 %v6725_v37, %v2492_v13  ;;  %v6729_v28 = vmax.f32 %v6728_v53, 0.0  ;;  %v2494_v40 = vmax.f32 %v1604_v35, 0.0  ;;  %v1599_v13 = vadd.f32 %v5912_v45, %v1598_v61 }
 0x198   :  { %v2809_v22 = vmax.f32 %v2681_v6, %v2745_v23  ;;  %v2748_v55 = vmax.f32 %v6727_v8, %v2620_v52  ;;  %v2622_v41 = vmax.f32 %v2244_v5, 0.0  ;;  %v6730_v23 = vld [vmem:[#allocation12_spill] sm:$0xff]  ;;  %v2239_v54 = vadd.f32 %v5912_v45, %v2238_v38  ;;  %v3775_v37 = vpop.f32.mrf.mxu1  ;;  %v1608_v38 = vpop.f32.mrf.mxu0 }
 0x199   :  { %v2683_v59 = vmax.f32 %v6729_v28, %v2491_v15  ;;  %v6731_v52 = vmax.f32 %v6730_v23, 0.0  ;;  %v6732_v15 = vld [vmem:[#allocation13_spill] sm:$0xff]  ;;  %v6735_v8 = vmax.f32 %v6734_v26, 0.0  ;;  %v2493_v53 = vmax.f32 %v1599_v13, 0.0 }
 0x19a   :  { %2874 = vst.msk [vmem:[%s6405_s3 + $0xe0] sm:$0xff] %vm2845_vm2, %v2809_v22  ;;  %v2812_v6 = vmax.f32 %v2684_v58, %v2748_v55  ;;  %v6733_v35 = vmax.f32 %v6732_v15, 0.0  ;;  %v1614_v28 = vadd.f32 %v5912_v45, %v3583_v20  ;;  %v6022_v22 = vadd.f32 %v5912_v45, %v6736_v16  ;;  %v6738_v16 = vld [vmem:[#allocation11_spill] sm:$0xff] }
 0x19b   :  { %v2747_v0 = vmax.f32 %v6731_v52, %v2619_v60  ;;  %v2750_v61 = vmax.f32 %v6735_v8, %v2622_v41  ;;  %v2621_v55 = vmax.f32 %v2239_v54, 0.0  ;;  %v2254_v60 = vadd.f32 %v5912_v45, %v3775_v37 }
 0x19c   :  { %v2686_v5 = vmax.f32 %v6733_v35, %v2494_v40  ;;  %2877 = vst.msk [vmem:[%s6405_s3 + $0xf8] sm:$0xff] %vm2845_vm2, %v2812_v6  ;;  %v2248_v40 = vpop.f32.mrf.mxu1  ;;  %v6737_v41 = vmax.f32 %v5435_v11, 0.0  ;;  %v2496_v52 = vmax.f32 %v1614_v28, 0.0  ;;  %v1609_v20 = vadd.f32 %v5912_v45, %v1608_v38  ;;  %v3586_v11 = vpop.f32.mrf.mxu0 }
 0x19d   :  { %v2811_v58 = vmax.f32 %v2683_v59, %v2747_v0  ;;  %v6034_v15 = vadd.f32 %v5912_v45, %v6738_v16  ;;  %v6739_v59 = vld [vmem:[#allocation15_spill] sm:$0xff]  ;;  %v2624_v54 = vmax.f32 %v2254_v60, 0.0  ;;  %v2249_v37 = vadd.f32 %v5912_v45, %v2248_v40  ;;  %v6743_v60 = vld [vmem:[#allocation16_spill] sm:$0xff] }
 0x19e   :  { %v2814_v23 = vmax.f32 %v2686_v5, %v2750_v61  ;;  %v2685_v13 = vmax.f32 %v6737_v41, %v2493_v53  ;;  %v6740_v6 = vmax.f32 %v6739_v59, 0.0  ;;  %v3778_v35 = vpop.f32.mrf.mxu1  ;;  %v6741_v5 = vld [vmem:[#allocation73_spill] sm:$0xff]  ;;  %v2495_v61 = vmax.f32 %v1609_v20, 0.0  ;;  %v1618_v16 = vpop.f32.mrf.mxu0  ;;  %v6753_v20 = vld [vmem:[#allocation71_spill] sm:$0xff] }
 0x19f   :  { %2876 = vst.msk [vmem:[%s6405_s3 + $0xf0] sm:$0xff] %vm2845_vm2, %v2811_v58  ;;  %v6742_v26 = vmax.f32 %v6741_v5, 0.0  ;;  %v1624_v53 = vadd.f32 %v5912_v45, %v3586_v11  ;;  %v2264_v28 = vadd.f32 %v5912_v45, %v3778_v35  ;;  %v2454_v58 = vmax.f32 %v6022_v22, 0.0 }
 0x1a0   :  { %v2749_v0 = vmax.f32 %v6740_v6, %v2621_v55  ;;  %2879 = vst.msk [vmem:[%s6405_s3 + $0x108] sm:$0xff] %vm2845_vm2, %v2814_v23  ;;  %v6744_v38 = vmax.f32 %v6743_v60, 0.0  ;;  %v2623_v41 = vmax.f32 %v2249_v37, 0.0  ;;  %v2258_v59 = vpop.f32.mrf.mxu1  ;;  %v6745_v6 = vld [vmem:[#allocation17_spill] sm:$0xff]  ;;  %v3589_v35 = vpop.f32.mrf.mxu0 }
 0x1a1   :  { %v2688_v8 = vmax.f32 %v6742_v26, %v2496_v52  ;;  %v6746_v31 = vmax.f32 %v6745_v6, 0.0  ;;  %v2498_v50 = vmax.f32 %v1624_v53, 0.0  ;;  %v2626_v5 = vmax.f32 %v2264_v28, 0.0  ;;  %v6751_v28 = vld [vmem:[#allocation20_spill] sm:$0xff] }
 0x1a2   :  { %v2813_v55 = vmax.f32 %v2685_v13, %v2749_v0  ;;  %v2752_v40 = vmax.f32 %v6744_v38, %v2624_v54  ;;  %v1619_v52 = vadd.f32 %v5912_v45, %v1618_v16  ;;  %v6747_v0 = vld [vmem:[#allocation18_spill] sm:$0xff]  ;;  %v2259_v11 = vadd.f32 %v5912_v45, %v2258_v59  ;;  %v3781_v26 = vpop.f32.mrf.mxu1 }
 0x1a3   :  { %v2687_v23 = vmax.f32 %v6746_v31, %v2495_v61  ;;  %v6748_v54 = vmax.f32 %v6747_v0, 0.0  ;;  %v6749_v31 = vld [vmem:[#allocation19_spill] sm:$0xff]  ;;  %v6752_v60 = vmax.f32 %v6751_v28, 0.0  ;;  %v1634_v6 = vadd.f32 %v5912_v45, %v3589_v35 }
 0x1a4   :  { %2878 = vst.msk [vmem:[%s6405_s3 + $0x100] sm:$0xff] %vm2845_vm2, %v2813_v55  ;;  %v2816_v13 = vmax.f32 %v2688_v8, %v2752_v40  ;;  %v6750_v61 = vmax.f32 %v6749_v31, 0.0  ;;  %v2497_v16 = vmax.f32 %v1619_v52, 0.0  ;;  %v6072_v55 = vadd.f32 %v5912_v45, %v6753_v20  ;;  %v2268_v59 = vpop.f32.mrf.mxu1  ;;  %v6756_v20 = vld [vmem:[#allocation72_spill] sm:$0xff] }
 0x1a5   :  { %v2751_v37 = vmax.f32 %v6748_v54, %v2623_v41  ;;  %v2754_v38 = vmax.f32 %v6752_v60, %v2626_v5  ;;  %v2625_v40 = vmax.f32 %v2259_v11, 0.0  ;;  %v2274_v41 = vadd.f32 %v5912_v45, %v3781_v26  ;;  %v6754_v5 = vld [vmem:[#allocation21_spill] sm:$0xff] }
 0x1a6   :  { %v2690_v53 = vmax.f32 %v6750_v61, %v2498_v50  ;;  %2881 = vst.msk [vmem:[%s6405_s3 + $0x118] sm:$0xff] %vm2845_vm2, %v2816_v13  ;;  %v1628_v50 = vpop.f32.mrf.mxu0  ;;  %v6755_v52 = vmax.f32 %v6754_v5, 0.0  ;;  %v2500_v35 = vmax.f32 %v1634_v6, 0.0  ;;  %v6084_v61 = vadd.f32 %v5912_v45, %v6756_v20 }
 0x1a7   :  { %v2815_v8 = vmax.f32 %v2687_v23, %v2751_v37  ;;  %v1629_v31 = vadd.f32 %v5912_v45, %v1628_v50  ;;  %v6757_v23 = vmax.f32 %v5490_v63, 0.0  ;;  %v2628_v37 = vmax.f32 %v2274_v41, 0.0 }
 0x1a8   :  { %v2818_v0 = vmax.f32 %v2690_v53, %v2754_v38  ;;  %v2689_v54 = vmax.f32 %v6755_v52, %v2497_v16  ;;  %v2269_v11 = vadd.f32 %v5912_v45, %v2268_v59  ;;  %v3592_v26 = vpop.f32.mrf.mxu0  ;;  %v3784_v53 = vpop.f32.mrf.mxu1  ;;  %v6758_v28 = vmax.f32 %v5494_v42, 0.0 }
 0x1a9   :  { %2880 = vst.msk [vmem:[%s6405_s3 + $0x110] sm:$0xff] %vm2845_vm2, %v2815_v8  ;;  %v2753_v13 = vmax.f32 %v6757_v23, %v2625_v40  ;;  %v2499_v38 = vmax.f32 %v1629_v31, 0.0  ;;  %v1644_v16 = vadd.f32 %v5912_v45, %v3592_v26  ;;  %v2284_v6 = vadd.f32 %v5912_v45, %v3784_v53  ;;  %v6763_v53 = vld [vmem:[#allocation24_spill] sm:$0xff] }
 0x1aa   :  { %2883 = vst.msk [vmem:[%s6405_s3 + $0x128] sm:$0xff] %vm2845_vm2, %v2818_v0  ;;  %v2692_v60 = vmax.f32 %v6758_v28, %v2500_v35  ;;  %v2453_v63 = vmax.f32 %v6072_v55, 0.0  ;;  %v6759_v40 = vmax.f32 %v5498_v1, 0.0  ;;  %v2627_v50 = vmax.f32 %v2269_v11, 0.0  ;;  %v1638_v59 = vpop.f32.mrf.mxu0  ;;  %v2278_v5 = vpop.f32.mrf.mxu1 }
 0x1ab   :  { %v2817_v8 = vmax.f32 %v2689_v54, %v2753_v13  ;;  %v6760_v52 = vmax.f32 %v5502_v4, 0.0  ;;  %v2502_v20 = vmax.f32 %v1644_v16, 0.0  ;;  %v2630_v42 = vmax.f32 %v2284_v6, 0.0 }
 0x1ac   :  { %v2756_v41 = vmax.f32 %v6759_v40, %v2628_v37  ;;  %v1639_v35 = vadd.f32 %v5912_v45, %v1638_v59  ;;  %v6761_v1 = vmax.f32 %v5512_v36, 0.0  ;;  %v2279_v13 = vadd.f32 %v5912_v45, %v2278_v5  ;;  %v3595_v37 = vpop.f32.mrf.mxu0  ;;  %v3787_v4 = vpop.f32.mrf.mxu1  ;;  %v6765_v40 = vld [vmem:[#allocation74_spill] sm:$0xff]  ;;  %v6766_v5 = vld [vmem:[#allocation27_spill] sm:$0xff] }
 0x1ad   :  { %v2691_v0 = vmax.f32 %v6760_v52, %v2499_v38  ;;  %2882 = vst.msk [vmem:[%s6405_s3 + $0x120] sm:$0xff] %vm2845_vm2, %v2817_v8  ;;  %v6762_v11 = vmax.f32 %v5516_v51, 0.0  ;;  %v6764_v28 = vmax.f32 %v6763_v53, 0.0  ;;  %v1654_v6 = vadd.f32 %v5912_v45, %v3595_v37  ;;  %v6771_v53 = vld [vmem:[#allocation31_spill] sm:$0xff] }
 0x1ae   :  { %v2820_v54 = vmax.f32 %v2692_v60, %v2756_v41  ;;  %v2755_v23 = vmax.f32 %v6761_v1, %v2627_v50  ;;  %v2501_v16 = vmax.f32 %v1639_v35, 0.0  ;;  %v6122_v8 = vadd.f32 %v5912_v45, %v6765_v40  ;;  %v1648_v41 = vpop.f32.mrf.mxu0  ;;  %v2288_v50 = vpop.f32.mrf.mxu1  ;;  %v6768_v1 = vld [vmem:[#allocation75_spill] sm:$0xff] }
 0x1af   :  { %v2694_v26 = vmax.f32 %v6762_v11, %v2502_v20  ;;  %v2758_v38 = vmax.f32 %v6764_v28, %v2630_v42  ;;  %v2629_v60 = vmax.f32 %v2279_v13, 0.0  ;;  %v2294_v51 = vadd.f32 %v5912_v45, %v3787_v4 }
 0x1b0   :  { %2885 = vst.msk [vmem:[%s6405_s3 + $0x138] sm:$0xff] %vm2845_vm2, %v2820_v54  ;;  %v2819_v36 = vmax.f32 %v2691_v0, %v2755_v23  ;;  %v6767_v52 = vmax.f32 %v6766_v5, 0.0  ;;  %v2504_v42 = vmax.f32 %v1654_v6, 0.0  ;;  %v1649_v35 = vadd.f32 %v5912_v45, %v1648_v41  ;;  %v6769_v0 = vld [vmem:[#allocation30_spill] sm:$0xff]  ;;  %v3598_v11 = vpop.f32.mrf.mxu0 }
 0x1b1   :  { %v2822_v59 = vmax.f32 %v2694_v26, %v2758_v38  ;;  %v6134_v37 = vadd.f32 %v5912_v45, %v6768_v1  ;;  %v6770_v54 = vmax.f32 %v6769_v0, 0.0  ;;  %v2632_v13 = vmax.f32 %v2294_v51, 0.0  ;;  %v3790_v26 = vpop.f32.mrf.mxu1  ;;  %v6773_v51 = vld [vmem:[#allocation35_spill] sm:$0xff] }
 0x1b2   :  { %v2693_v20 = vmax.f32 %v6767_v52, %v2501_v16  ;;  %2884 = vst.msk [vmem:[%s6405_s3 + $0x130] sm:$0xff] %vm2845_vm2, %v2819_v36  ;;  %v2289_v4 = vadd.f32 %v5912_v45, %v2288_v50  ;;  %v6772_v28 = vmax.f32 %v6771_v53, 0.0  ;;  %v2503_v16 = vmax.f32 %v1649_v35, 0.0  ;;  %v1658_v52 = vpop.f32.mrf.mxu0  ;;  %v6775_v0 = vld [vmem:[#allocation39_spill] sm:$0xff]  ;;  %v6783_v35 = vld [vmem:[#allocation76_spill] sm:$0xff] }
 0x1b3   :  { %v2757_v23 = vmax.f32 %v6770_v54, %v2629_v60  ;;  %2887 = vst.msk [vmem:[%s6405_s3 + $0x148] sm:$0xff] %vm2845_vm2, %v2822_v59  ;;  %v1664_v6 = vadd.f32 %v5912_v45, %v3598_v11  ;;  %v2304_v40 = vadd.f32 %v5912_v45, %v3790_v26  ;;  %v6774_v41 = vmax.f32 %v6773_v51, 0.0  ;;  %v2298_v1 = vpop.f32.mrf.mxu1  ;;  %v6781_v51 = vld [vmem:[#allocation82_spill] sm:$0xff] }
 0x1b4   :  { %v2696_v38 = vmax.f32 %v6772_v28, %v2504_v42  ;;  %v2631_v5 = vmax.f32 %v2289_v4, 0.0  ;;  %v6776_v54 = vmax.f32 %v6775_v0, 0.0  ;;  %v1659_v42 = vadd.f32 %v5912_v45, %v1658_v52  ;;  %v3601_v26 = vpop.f32.mrf.mxu0 }
 0x1b5   :  { %v2821_v60 = vmax.f32 %v2693_v20, %v2757_v23  ;;  %v2760_v50 = vmax.f32 %v6774_v41, %v2632_v13  ;;  %v2506_v31 = vmax.f32 %v1664_v6, 0.0  ;;  %v2634_v53 = vmax.f32 %v2304_v40, 0.0  ;;  %v6777_v23 = vld [vmem:[#allocation80_spill] sm:$0xff]  ;;  %v3793_v28 = vpop.f32.mrf.mxu1 }
 0x1b6   :  { %v2695_v59 = vmax.f32 %v6776_v54, %v2503_v16  ;;  %v6778_v13 = vmax.f32 %v6777_v23, 0.0  ;;  %v2299_v11 = vadd.f32 %v5912_v45, %v2298_v1  ;;  %v6779_v16 = vld [vmem:[#allocation81_spill] sm:$0xff]  ;;  %v6782_v41 = vmax.f32 %v6781_v51, 0.0 }
 0x1b7   :  { %2886 = vst.msk [vmem:[%s6405_s3 + $0x140] sm:$0xff] %vm2845_vm2, %v2821_v60  ;;  %v2824_v20 = vmax.f32 %v2696_v38, %v2760_v50  ;;  %v6780_v6 = vmax.f32 %v6779_v16, 0.0  ;;  %v2505_v0 = vmax.f32 %v1659_v42, 0.0  ;;  %v1674_v54 = vadd.f32 %v5912_v45, %v3601_v26  ;;  %v2308_v1 = vpop.f32.mrf.mxu1 }
 0x1b8   :  { %v2759_v4 = vmax.f32 %v6778_v13, %v2631_v5  ;;  %v2762_v52 = vmax.f32 %v6782_v41, %v2634_v53  ;;  %v6172_v60 = vadd.f32 %v5912_v45, %v6783_v35  ;;  %v2633_v50 = vmax.f32 %v2299_v11, 0.0  ;;  %v6784_v53 = vld [vmem:[#allocation83_spill] sm:$0xff]  ;;  %v6786_v35 = vld [vmem:[#allocation77_spill] sm:$0xff] }
 0x1b9   :  { %v2698_v40 = vmax.f32 %v6780_v6, %v2506_v31  ;;  %2889 = vst.msk [vmem:[%s6405_s3 + $0x158] sm:$0xff] %vm2845_vm2, %v2824_v20  ;;  %v2314_v5 = vadd.f32 %v5912_v45, %v3793_v28  ;;  %v1668_v31 = vpop.f32.mrf.mxu0  ;;  %v6785_v42 = vmax.f32 %v6784_v53, 0.0  ;;  %v2508_v26 = vmax.f32 %v1674_v54, 0.0 }
 0x1ba   :  { %v2823_v38 = vmax.f32 %v2695_v59, %v2759_v4  ;;  %v1669_v16 = vadd.f32 %v5912_v45, %v1668_v31  ;;  %v6184_v6 = vadd.f32 %v5912_v45, %v6786_v35  ;;  %v6787_v59 = vmax.f32 %v5586_v47, 0.0  ;;  %v6791_v35 = vld [vmem:[#allocation87_spill] sm:$0xff] }
 0x1bb   :  { %v2826_v23 = vmax.f32 %v2698_v40, %v2762_v52  ;;  %v2697_v13 = vmax.f32 %v6785_v42, %v2505_v0  ;;  %v2636_v4 = vmax.f32 %v2314_v5, 0.0  ;;  %v2309_v11 = vadd.f32 %v5912_v45, %v2308_v1  ;;  %v3604_v28 = vpop.f32.mrf.mxu0  ;;  %v3796_v40 = vpop.f32.mrf.mxu1 }
 0x1bc   :  { %2888 = vst.msk [vmem:[%s6405_s3 + $0x150] sm:$0xff] %vm2845_vm2, %v2823_v38  ;;  %v2761_v20 = vmax.f32 %v6787_v59, %v2633_v50  ;;  %v6788_v51 = vmax.f32 %v5590_v24, 0.0  ;;  %v2507_v52 = vmax.f32 %v1669_v16, 0.0  ;;  %v1684_v0 = vadd.f32 %v5912_v45, %v3604_v28  ;;  %v6789_v50 = vld [vmem:[#allocation86_spill] sm:$0xff] }
 0x1bd   :  { %2891 = vst.msk [vmem:[%s6405_s3 + $0x168] sm:$0xff] %vm2845_vm2, %v2826_v23  ;;  %v2324_v54 = vadd.f32 %v5912_v45, %v3796_v40  ;;  %v2455_v47 = vmax.f32 %v6172_v60, 0.0  ;;  %v6790_v5 = vmax.f32 %v6789_v50, 0.0  ;;  %v2635_v1 = vmax.f32 %v2309_v11, 0.0  ;;  %v1678_v53 = vpop.f32.mrf.mxu0  ;;  %v2318_v42 = vpop.f32.mrf.mxu1 }
 0x1be   :  { %v2700_v41 = vmax.f32 %v6788_v51, %v2508_v26  ;;  %v2825_v38 = vmax.f32 %v2697_v13, %v2761_v20  ;;  %v6792_v59 = vmax.f32 %v6791_v35, 0.0  ;;  %v2510_v36 = vmax.f32 %v1684_v0, 0.0  ;;  %v6793_v20 = vld [vmem:[#allocation88_spill] sm:$0xff]  ;;  %v6797_v35 = vld [vmem:[#allocation22_spill] sm:$0xff] }
 0x1bf   :  { %v2764_v31 = vmax.f32 %v6790_v5, %v2636_v4  ;;  %v2638_v24 = vmax.f32 %v2324_v54, 0.0  ;;  %v1679_v26 = vadd.f32 %v5912_v45, %v1678_v53  ;;  %v2583_v16 = vmax.f32 %v6184_v6, 0.0  ;;  %v3607_v40 = vpop.f32.mrf.mxu0  ;;  %v3799_v51 = vpop.f32.mrf.mxu1 }
 0x1c0   :  { %v2699_v23 = vmax.f32 %v6792_v59, %v2507_v52  ;;  %2890 = vst.msk [vmem:[%s6405_s3 + $0x160] sm:$0xff] %vm2845_vm2, %v2825_v38  ;;  %v6794_v4 = vmax.f32 %v6793_v20, 0.0  ;;  %v2319_v28 = vadd.f32 %v5912_v45, %v2318_v42  ;;  %v6795_v52 = vld [vmem:[#allocation28_spill] sm:$0xff]  ;;  %v1694_v53 = vadd.f32 %v5912_v45, %v3607_v40 }
 0x1c1   :  { %v2828_v13 = vmax.f32 %v2700_v41, %v2764_v31  ;;  %v6796_v0 = vmax.f32 %v6795_v52, 0.0  ;;  %v2766_v50 = vmax.f32 %v2574_v7, %v2638_v24  ;;  %v2509_v5 = vmax.f32 %v1679_v26, 0.0  ;;  %v2328_v42 = vpop.f32.mrf.mxu1  ;;  %v6798_v26 = vld [vmem:[#allocation23_spill] sm:$0xff] }
 0x1c2   :  { %v2763_v11 = vmax.f32 %v6794_v4, %v2635_v1  ;;  %v6222_v38 = vadd.f32 %v5912_v45, %v6797_v35  ;;  %v2637_v31 = vmax.f32 %v2319_v28, 0.0  ;;  %v2334_v1 = vadd.f32 %v5912_v45, %v3799_v51 }
 0x1c3   :  { %v2702_v54 = vmax.f32 %v6796_v0, %v2510_v36  ;;  %2893 = vst.msk [vmem:[%s6405_s3 + $0x178] sm:$0xff] %vm2845_vm2, %v2828_v13  ;;  %v1688_v36 = vpop.f32.mrf.mxu0  ;;  %v2701_v7 = vmax.f32 %v2445_v25, %v2509_v5  ;;  %v2512_v59 = vmax.f32 %v1694_v53, 0.0  ;;  %v6234_v20 = vadd.f32 %v5912_v45, %v6798_v26  ;;  %v3802_v25 = vpop.f32.mrf.mxu1 }
 0x1c4   :  { %v2827_v41 = vmax.f32 %v2699_v23, %v2763_v11  ;;  %v1689_v24 = vadd.f32 %v5912_v45, %v1688_v36  ;;  %v2765_v23 = vmax.f32 %v2573_v46, %v2637_v31  ;;  %v2640_v13 = vmax.f32 %v2334_v1, 0.0 }
 0x1c5   :  { %v2830_v17 = vmax.f32 %v2702_v54, %v2766_v50  ;;  %v2329_v4 = vadd.f32 %v5912_v45, %v2328_v42  ;;  %v3610_v10 = vpop.f32.mrf.mxu0  ;;  %v2704_v11 = vmax.f32 %v2448_v18, %v2512_v59  ;;  %v2344_v51 = vadd.f32 %v5912_v45, %v3802_v25  ;;  %v2338_v50 = vpop.f32.mrf.mxu1 }
 0x1c6   :  { %2892 = vst.msk [vmem:[%s6405_s3 + $0x170] sm:$0xff] %vm2845_vm2, %v2827_v41  ;;  %v2511_v28 = vmax.f32 %v1689_v24, 0.0  ;;  %v1704_v40 = vadd.f32 %v5912_v45, %v3610_v10  ;;  %v2458_v56 = vmax.f32 %v6222_v38, 0.0  ;;  %v2829_v46 = vmax.f32 %v2701_v7, %v2765_v23  ;;  %v6800_v23 = vld [vmem:[#allocation26_spill] sm:$0xff] }
 0x1c7   :  { %2895 = vst.msk [vmem:[%s6405_s3 + $0x188] sm:$0xff] %vm2845_vm2, %v2830_v17  ;;  %v2768_v52 = vmax.f32 %v2576_v39, %v2640_v13  ;;  %v2639_v0 = vmax.f32 %v2329_v4, 0.0  ;;  %v1698_v54 = vpop.f32.mrf.mxu0  ;;  %v2642_v12 = vmax.f32 %v2344_v51, 0.0  ;;  %v2586_v35 = vmax.f32 %v6234_v20, 0.0  ;;  %v3805_v29 = vpop.f32.mrf.mxu1  ;;  %v6799_v17 = vld [vmem:[#allocation25_spill] sm:$0xff] }
 0x1c8   :  { %v2703_v5 = vmax.f32 %v2447_v57, %v2511_v28  ;;  %v2514_v53 = vmax.f32 %v1704_v40, 0.0  ;;  %v1699_v18 = vadd.f32 %v5912_v45, %v1698_v54  ;;  %2894 = vst.msk [vmem:[%s6405_s3 + $0x180] sm:$0xff] %vm2845_vm2, %v2829_v46  ;;  %v2339_v39 = vadd.f32 %v5912_v45, %v2338_v50 }
 0x1c9   :  { %v2832_v41 = vmax.f32 %v2704_v11, %v2768_v52  ;;  %v2767_v9 = vmax.f32 %v2575_v3, %v2639_v0  ;;  %v3613_v31 = vpop.f32.mrf.mxu0  ;;  %v2770_v1 = vmax.f32 %v2578_v62, %v2642_v12  ;;  %v6272_v7 = vadd.f32 %v5912_v45, %v6799_v17  ;;  %v2348_v59 = vpop.f32.mrf.mxu1  ;;  %v6805_v17 = vld [vmem:[#allocation78_spill] sm:$0xff] }
 0x1ca   :  { %v2706_v57 = vmax.f32 %v2450_v32, %v2514_v53  ;;  %v2513_v36 = vmax.f32 %v1699_v18, 0.0  ;;  %v1714_v42 = vadd.f32 %v5912_v45, %v3613_v31  ;;  %v2641_v3 = vmax.f32 %v2339_v39, 0.0 }
 0x1cb   :  { %2897 = vst.msk [vmem:[%s6405_s3 + $0x198] sm:$0xff] %vm2845_vm2, %v2832_v41  ;;  %v2831_v34 = vmax.f32 %v2703_v5, %v2767_v9  ;;  %v2354_v14 = vadd.f32 %v5912_v45, %v3805_v29  ;;  %v1708_v32 = vpop.f32.mrf.mxu0  ;;  %v6284_v13 = vadd.f32 %v5912_v45, %v6800_v23  ;;  %v2349_v25 = vadd.f32 %v5912_v45, %v2348_v59 }
 0x1cc   :  { %v2834_v48 = vmax.f32 %v2706_v57, %v2770_v1  ;;  %v2705_v62 = vmax.f32 %v2449_v43, %v2513_v36  ;;  %v2516_v24 = vmax.f32 %v1714_v42, 0.0  ;;  %v1709_v26 = vadd.f32 %v5912_v45, %v1708_v32  ;;  %v3808_v43 = vpop.f32.mrf.mxu1 }
 0x1cd   :  { %2896 = vst.msk [vmem:[%s6405_s3 + $0x190] sm:$0xff] %vm2845_vm2, %v2831_v34  ;;  %v2769_v4 = vmax.f32 %v2577_v30, %v2641_v3  ;;  %v2644_v10 = vmax.f32 %v2354_v14, 0.0  ;;  %v3616_v33 = vpop.f32.mrf.mxu0  ;;  %v2364_v51 = vadd.f32 %v5912_v45, %v3808_v43  ;;  %v2457_v44 = vmax.f32 %v6272_v7, 0.0 }
 0x1ce   :  { %2899 = vst.msk [vmem:[%s6405_s3 + $0x1a8] sm:$0xff] %vm2845_vm2, %v2834_v48  ;;  %v2708_v11 = vmax.f32 %v2452_v27, %v2516_v24  ;;  %v2515_v28 = vmax.f32 %v1709_v26, 0.0  ;;  %v1724_v40 = vadd.f32 %v5912_v45, %v3616_v33  ;;  %v6801_v46 = vmax.f32 %v5934_v2, 0.0  ;;  %v2358_v50 = vpop.f32.mrf.mxu1 }
 0x1cf   :  { %v2833_v30 = vmax.f32 %v2705_v62, %v2769_v4  ;;  %v2643_v0 = vmax.f32 %v2349_v25, 0.0  ;;  %v1718_v54 = vpop.f32.mrf.mxu0  ;;  %v6802_v5 = vmax.f32 %v5972_v19, 0.0  ;;  %v2646_v21 = vmax.f32 %v2364_v51, 0.0  ;;  %v6806_v62 = vld [vmem:[#allocation79_spill] sm:$0xff] }
 0x1d0   :  { %v2772_v52 = vmax.f32 %v6801_v46, %v2644_v10  ;;  %v2518_v12 = vmax.f32 %v1724_v40, 0.0  ;;  %v1719_v27 = vadd.f32 %v5912_v45, %v1718_v54  ;;  %v2585_v18 = vmax.f32 %v6284_v13, 0.0  ;;  %v3811_v19 = vpop.f32.mrf.mxu1 }
 0x1d1   :  { %v2707_v53 = vmax.f32 %v6802_v5, %v2515_v28  ;;  %2898 = vst.msk [vmem:[%s6405_s3 + $0x1a0] sm:$0xff] %vm2845_vm2, %v2833_v30  ;;  %v6803_v2 = vmax.f32 %v5984_v49, 0.0  ;;  %v2359_v39 = vadd.f32 %v5912_v45, %v2358_v50  ;;  %v3619_v31 = vpop.f32.mrf.mxu0  ;;  %v6804_v57 = vmax.f32 %v6034_v15, 0.0 }
 0x1d2   :  { %v2836_v41 = vmax.f32 %v2708_v11, %v2772_v52  ;;  %v2710_v29 = vmax.f32 %v2454_v58, %v2518_v12  ;;  %v2517_v36 = vmax.f32 %v1719_v27, 0.0  ;;  %v1734_v42 = vadd.f32 %v5912_v45, %v3619_v31  ;;  %v2368_v14 = vpop.f32.mrf.mxu1  ;;  %v6811_v31 = vld [vmem:[#allocation85_spill] sm:$0xff] }
 0x1d3   :  { %v2771_v9 = vmax.f32 %v6803_v2, %v2643_v0  ;;  %v2774_v1 = vmax.f32 %v6804_v57, %v2646_v21  ;;  %v6322_v34 = vadd.f32 %v5912_v45, %v6805_v17  ;;  %v2645_v3 = vmax.f32 %v2359_v39, 0.0  ;;  %v1728_v58 = vpop.f32.mrf.mxu0 }
 0x1d4   :  { %2901 = vst.msk [vmem:[%s6405_s3 + $0x1b8] sm:$0xff] %vm2845_vm2, %v2836_v41  ;;  %v2374_v22 = vadd.f32 %v5912_v45, %v3811_v19  ;;  %v2709_v32 = vmax.f32 %v2453_v63, %v2517_v36  ;;  %v2520_v59 = vmax.f32 %v1734_v42, 0.0  ;;  %v1729_v48 = vadd.f32 %v5912_v45, %v1728_v58  ;;  %v3814_v55 = vpop.f32.mrf.mxu1 }
 0x1d5   :  { %v2835_v49 = vmax.f32 %v2707_v53, %v2771_v9  ;;  %v2838_v15 = vmax.f32 %v2710_v29, %v2774_v1  ;;  %v2074_v24 = vadd.f32 %v5912_v45, %v6806_v62  ;;  %v6807_v26 = vmax.f32 %v6084_v61, 0.0  ;;  %v3622_v25 = vpop.f32.mrf.mxu0  ;;  %v6810_v53 = vld [vmem:[#allocation84_spill] sm:$0xff] }
 0x1d6   :  { %v2648_v4 = vmax.f32 %v2374_v22, 0.0  ;;  %v2369_v10 = vadd.f32 %v5912_v45, %v2368_v14  ;;  %v6808_v63 = vmax.f32 %v6122_v8, 0.0  ;;  %v2519_v43 = vmax.f32 %v1729_v48, 0.0  ;;  %v2378_v0 = vpop.f32.mrf.mxu1 }
 0x1d7   :  { %2900 = vst.msk [vmem:[%s6405_s3 + $0x1b0] sm:$0xff] %vm2845_vm2, %v2835_v49  ;;  %v2773_v23 = vmax.f32 %v6807_v26, %v2645_v3  ;;  %2903 = vst.msk [vmem:[%s6405_s3 + $0x1c8] sm:$0xff] %vm2845_vm2, %v2838_v15  ;;  %v1744_v11 = vadd.f32 %v5912_v45, %v3622_v25  ;;  %v2384_v28 = vadd.f32 %v5912_v45, %v3814_v55  ;;  %v2460_v61 = vmax.f32 %v6322_v34, 0.0  ;;  %v1738_v52 = vpop.f32.mrf.mxu0 }
 0x1d8   :  { %v2712_v33 = vmax.f32 %v6808_v63, %v2520_v59  ;;  %v6809_v51 = vmax.f32 %v6134_v37, 0.0  ;;  %v2647_v46 = vmax.f32 %v2369_v10, 0.0  ;;  %v2711_v54 = vmax.f32 %v2455_v47, %v2519_v43  ;;  %v3817_v47 = vpop.f32.mrf.mxu1 }
 0x1d9   :  { %v2837_v40 = vmax.f32 %v2709_v32, %v2773_v23  ;;  %v2522_v50 = vmax.f32 %v1744_v11, 0.0  ;;  %v2650_v8 = vmax.f32 %v2384_v28, 0.0  ;;  %v1739_v5 = vadd.f32 %v5912_v45, %v1738_v52  ;;  %v3625_v60 = vpop.f32.mrf.mxu0 }
 0x1da   :  { %v2776_v30 = vmax.f32 %v6809_v51, %v2648_v4  ;;  %v1429_v12 = vadd.f32 %v5912_v45, %v6810_v53  ;;  %v2775_v21 = vmax.f32 %v2583_v16, %v2647_v46  ;;  %v2379_v27 = vadd.f32 %v5912_v45, %v2378_v0 }
 0x1db   :  { %2902 = vst.msk [vmem:[%s6405_s3 + $0x1c0] sm:$0xff] %vm2845_vm2, %v2837_v40  ;;  %v2714_v41 = vmax.f32 %v2458_v56, %v2522_v50  ;;  %v2778_v2 = vmax.f32 %v2586_v35, %v2650_v8  ;;  %v2521_v9 = vmax.f32 %v1739_v5, 0.0  ;;  %v1754_v39 = vadd.f32 %v5912_v45, %v3625_v60  ;;  %v1748_v38 = vpop.f32.mrf.mxu0  ;;  %v2388_v56 = vpop.f32.mrf.mxu1 }
 0x1dc   :  { %v2840_v37 = vmax.f32 %v2712_v33, %v2776_v30  ;;  %v2069_v19 = vadd.f32 %v5912_v45, %v6811_v31  ;;  %v2839_v6 = vmax.f32 %v2711_v54, %v2775_v21  ;;  %v2649_v16 = vmax.f32 %v2379_v27, 0.0 }
 0x1dd   :  { %v2394_v29 = vadd.f32 %v5912_v45, %v3817_v47  ;;  %v2842_v57 = vmax.f32 %v2714_v41, %v2778_v2  ;;  %v2713_v20 = vmax.f32 %v2457_v44, %v2521_v9  ;;  %v2524_v35 = vmax.f32 %v1754_v39, 0.0 }
 0x1de   :  { %2905 = vst.msk [vmem:[%s6405_s3 + $0x1d8] sm:$0xff] %vm2845_vm2, %v2840_v37  ;;  %v1749_v1 = vadd.f32 %v5912_v45, %v1748_v38  ;;  %v2588_v36 = vmax.f32 %v2074_v24, 0.0  ;;  %2904 = vst.msk [vmem:[%s6405_s3 + $0x1d0] sm:$0xff] %vm2845_vm2, %v2839_v6  ;;  %v2777_v42 = vmax.f32 %v2585_v18, %v2649_v16  ;;  %v2389_v34 = vadd.f32 %v5912_v45, %v2388_v56 }
 0x1df   :  { %v2652_v17 = vmax.f32 %v2394_v29, 0.0  ;;  %v2459_v49 = vmax.f32 %v1429_v12, 0.0  ;;  %2907 = vst.msk [vmem:[%s6405_s3 + $0x1e8] sm:$0xff] %vm2845_vm2, %v2842_v57  ;;  %v2716_v7 = vmax.f32 %v2460_v61, %v2524_v35  ;;  %v2587_v3 = vmax.f32 %v2069_v19, 0.0 }
 0x1e0   :  { %v2523_v44 = vmax.f32 %v1749_v1, 0.0  ;;  %v2841_v22 = vmax.f32 %v2713_v20, %v2777_v42  ;;  %v2651_v14 = vmax.f32 %v2389_v34, 0.0 }
 0x1e1   :  { %v2780_v58 = vmax.f32 %v2588_v36, %v2652_v17 }
 0x1e2   :  { %v2715_v15 = vmax.f32 %v2459_v49, %v2523_v44  ;;  %2906 = vst.msk [vmem:[%s6405_s3 + $0x1e0] sm:$0xff] %vm2845_vm2, %v2841_v22  ;;  %v2779_v45 = vmax.f32 %v2587_v3, %v2651_v14 }
 0x1e3   :  { %v2844_v13 = vmax.f32 %v2716_v7, %v2780_v58 }
 0x1e4   :  { %v2843_v18 = vmax.f32 %v2715_v15, %v2779_v45 }
 0x1e5   :  { %2909 = vst.msk [vmem:[%s6405_s3 + $0x1f8] sm:$0xff] %vm2845_vm2, %v2844_v13 }
 0x1e6   :  { %2908 = vst.msk [vmem:[%s6405_s3 + $0x1f0] sm:$0xff] %vm2845_vm2, %v2843_v18 }

// kernel: glyphnet_forward.7
= control target key start
LH: loop header
LB: loop body
LE: loop exit
PB: predicated region body
PF: predicated region fallthrough
CT: control target
= control target key end

     0   :  { %v979_v0 = vmov 0.0   ;;  %vm167_vm0 = vcmask 130048   ;;  %s1767_s1 = inlined_call_operand.vmem [shape: f32[144,16], index: 1, kind: input, shape index: {}]   ;;  %s1768_s0 = inlined_call_operand.vmem [shape: f32[4,128,144], index: 0, kind: input, shape index: {}]   ;;  %s1769_s2 = inlined_call_operand.vmem [shape: f32[1,16], index: 2, kind: input, shape index: {}]   ;;  %s1770_s3 = inlined_call_operand.vmem [shape: f32[128,16], index: 3, kind: output, shape index: {}]  }
   0x1   :  { %360 = vmatprep.subr.mxu0 %v979_v0  ;;  %942 = vmatprep.subr.mxu1 %v979_v0  ;;  %v157_v1 = vld [vmem:[%s1767_s1 + $0x78] sm:$0xff]  ;;  %v156_v2 = vld [vmem:[%s1767_s1 + $0x70] sm:$0xff]  ;;  %v155_v3 = vld [vmem:[%s1767_s1 + $0x68] sm:$0xff] }
   0x2   :  { %361 = vmatpush1.msra.mxu0 %v157_v1  ;;  %960 = vmatpush1.msra.mxu1 %v157_v1  ;;  %v154_v4 = vld [vmem:[%s1767_s1 + $0x60] sm:$0xff]  ;;  %v153_v5 = vld [vmem:[%s1767_s1 + $0x58] sm:$0xff]  ;;  %v152_v6 = vld [vmem:[%s1767_s1 + $0x50] sm:$0xff] }
   0x3   :  { %362 = vmatprep.subr.mxu0 %v979_v0  ;;  %943 = vmatprep.subr.mxu1 %v979_v0  ;;  %v151_v7 = vld [vmem:[%s1767_s1 + $0x48] sm:$0xff]  ;;  %v150_v8 = vld [vmem:[%s1767_s1 + $0x40] sm:$0xff]  ;;  %v149_v9 = vld [vmem:[%s1767_s1 + $0x38] sm:$0xff] }
   0x4   :  { %363 = vmatpush1.msra.mxu0 %v156_v2  ;;  %961 = vmatpush1.msra.mxu1 %v156_v2  ;;  %v148_v10 = vld [vmem:[%s1767_s1 + $0x30] sm:$0xff]  ;;  %v147_v11 = vld [vmem:[%s1767_s1 + $0x28] sm:$0xff]  ;;  %v146_v12 = vld [vmem:[%s1767_s1 + $0x20] sm:$0xff] }
   0x5   :  { %364 = vmatprep.subr.mxu0 %v979_v0  ;;  %944 = vmatprep.subr.mxu1 %v979_v0  ;;  %v145_v13 = vld [vmem:[%s1767_s1 + $0x18] sm:$0xff]  ;;  %v144_v14 = vld [vmem:[%s1767_s1 + $0x10] sm:$0xff]  ;;  %v143_v15 = vld [vmem:[%s1767_s1 + $0x8] sm:$0xff] }
   0x6   :  { %365 = vmatpush1.msra.mxu0 %v155_v3  ;;  %962 = vmatpush1.msra.mxu1 %v155_v3  ;;  %v142_v16 = vld [vmem:[%s1767_s1] sm:$0xff]  ;;  %v159_v17 = vld [vmem:[%s1767_s1 + $0x88] sm:$0xff]  ;;  %v17_v23 = vld [vmem:[%s1768_s0 + $0x18] sm:$0xff] }
   0x7   :  { %366 = vmatprep.subr.mxu0 %v979_v0  ;;  %945 = vmatprep.subr.mxu1 %v979_v0  ;;  %v158_v18 = vld [vmem:[%s1767_s1 + $0x80] sm:$0xff]  ;;  %v15_v19 = vld [vmem:[%s1768_s0 + $0x8] sm:$0xff]  ;;  %v81_v24 = vld [vmem:[%s1768_s0 + $0x218] sm:$0xff] }
   0x8   :  { %367 = vmatpush1.msra.mxu0 %v154_v4  ;;  %963 = vmatpush1.msra.mxu1 %v154_v4  ;;  %v79_v20 = vld [vmem:[%s1768_s0 + $0x208] sm:$0xff]  ;;  %v14_v21 = vld [vmem:[%s1768_s0] sm:$0xff]  ;;  %v16_v25 = vld [vmem:[%s1768_s0 + $0x10] sm:$0xff] }
   0x9   :  { %368 = vmatprep.subr.mxu0 %v979_v0  ;;  %946 = vmatprep.subr.mxu1 %v979_v0  ;;  %v78_v22 = vld [vmem:[%s1768_s0 + $0x200] sm:$0xff]  ;;  %v80_v26 = vld [vmem:[%s1768_s0 + $0x210] sm:$0xff]  ;;  %v19_v27 = vld [vmem:[%s1768_s0 + $0x28] sm:$0xff] }
   0xa   :  { %369 = vmatpush1.msra.mxu0 %v153_v5  ;;  %964 = vmatpush1.msra.mxu1 %v153_v5  ;;  %v83_v28 = vld [vmem:[%s1768_s0 + $0x228] sm:$0xff]  ;;  %v18_v29 = vld [vmem:[%s1768_s0 + $0x20] sm:$0xff]  ;;  %v21_v31 = vld [vmem:[%s1768_s0 + $0x38] sm:$0xff] }
   0xb   :  { %370 = vmatprep.subr.mxu0 %v979_v0  ;;  %947 = vmatprep.subr.mxu1 %v979_v0  ;;  %v82_v30 = vld [vmem:[%s1768_s0 + $0x220] sm:$0xff]  ;;  %v85_v32 = vld [vmem:[%s1768_s0 + $0x238] sm:$0xff]  ;;  %v20_v33 = vld [vmem:[%s1768_s0 + $0x30] sm:$0xff] }
   0xc   :  { %371 = vmatpush1.msra.mxu0 %v152_v6  ;;  %965 = vmatpush1.msra.mxu1 %v152_v6  ;;  %v84_v34 = vld [vmem:[%s1768_s0 + $0x230] sm:$0xff]  ;;  %v23_v35 = vld [vmem:[%s1768_s0 + $0x48] sm:$0xff]  ;;  %v22_v37 = vld [vmem:[%s1768_s0 + $0x40] sm:$0xff] }
   0xd   :  { %372 = vmatprep.subr.mxu0 %v979_v0  ;;  %948 = vmatprep.subr.mxu1 %v979_v0  ;;  %v87_v36 = vld [vmem:[%s1768_s0 + $0x248] sm:$0xff]  ;;  %v86_v38 = vld [vmem:[%s1768_s0 + $0x240] sm:$0xff]  ;;  %v25_v39 = vld [vmem:[%s1768_s0 + $0x58] sm:$0xff] }
   0xe   :  { %373 = vmatpush1.msra.mxu0 %v151_v7  ;;  %966 = vmatpush1.msra.mxu1 %v151_v7  ;;  %v89_v40 = vld [vmem:[%s1768_s0 + $0x258] sm:$0xff]  ;;  %v24_v41 = vld [vmem:[%s1768_s0 + $0x50] sm:$0xff]  ;;  %v27_v43 = vld [vmem:[%s1768_s0 + $0x68] sm:$0xff] }
   0xf   :  { %374 = vmatprep.subr.mxu0 %v979_v0  ;;  %949 = vmatprep.subr.mxu1 %v979_v0  ;;  %v88_v42 = vld [vmem:[%s1768_s0 + $0x250] sm:$0xff]  ;;  %v91_v44 = vld [vmem:[%s1768_s0 + $0x268] sm:$0xff]  ;;  %v26_v45 = vld [vmem:[%s1768_s0 + $0x60] sm:$0xff] }
  0x10   :  { %375 = vmatpush1.msra.mxu0 %v150_v8  ;;  %967 = vmatpush1.msra.mxu1 %v150_v8  ;;  %v90_v46 = vld [vmem:[%s1768_s0 + $0x260] sm:$0xff]  ;;  %v29_v47 = vld [vmem:[%s1768_s0 + $0x78] sm:$0xff]  ;;  %v28_v49 = vld [vmem:[%s1768_s0 + $0x70] sm:$0xff] }
  0x11   :  { %376 = vmatprep.subr.mxu0 %v979_v0  ;;  %950 = vmatprep.subr.mxu1 %v979_v0  ;;  %v93_v48 = vld [vmem:[%s1768_s0 + $0x278] sm:$0xff]  ;;  %v92_v50 = vld [vmem:[%s1768_s0 + $0x270] sm:$0xff]  ;;  %v31_v51 = vld [vmem:[%s1768_s0 + $0x88] sm:$0xff] }
  0x12   :  { %377 = vmatpush1.msra.mxu0 %v149_v9  ;;  %968 = vmatpush1.msra.mxu1 %v149_v9  ;;  %v95_v52 = vld [vmem:[%s1768_s0 + $0x288] sm:$0xff]  ;;  %v30_v53 = vld [vmem:[%s1768_s0 + $0x80] sm:$0xff]  ;;  %v33_v55 = vld [vmem:[%s1768_s0 + $0x98] sm:$0xff] }
  0x13   :  { %378 = vmatprep.subr.mxu0 %v979_v0  ;;  %951 = vmatprep.subr.mxu1 %v979_v0  ;;  %v94_v54 = vld [vmem:[%s1768_s0 + $0x280] sm:$0xff]  ;;  %v97_v56 = vld [vmem:[%s1768_s0 + $0x298] sm:$0xff]  ;;  %v32_v57 = vld [vmem:[%s1768_s0 + $0x90] sm:$0xff] }
  0x14   :  { %379 = vmatpush1.msra.mxu0 %v148_v10  ;;  %969 = vmatpush1.msra.mxu1 %v148_v10  ;;  %v96_v58 = vld [vmem:[%s1768_s0 + $0x290] sm:$0xff]  ;;  %v35_v59 = vld [vmem:[%s1768_s0 + $0xa8] sm:$0xff]  ;;  %v34_v61 = vld [vmem:[%s1768_s0 + $0xa0] sm:$0xff] }
  0x15   :  { %380 = vmatprep.subr.mxu0 %v979_v0  ;;  %952 = vmatprep.subr.mxu1 %v979_v0  ;;  %v99_v60 = vld [vmem:[%s1768_s0 + $0x2a8] sm:$0xff]  ;;  %v98_v62 = vld [vmem:[%s1768_s0 + $0x2a0] sm:$0xff]  ;;  %v37_v63 = vld [vmem:[%s1768_s0 + $0xb8] sm:$0xff] }
  0x16   :  { %381 = vmatpush1.msra.mxu0 %v147_v11  ;;  %970 = vmatpush1.msra.mxu1 %v147_v11  ;;  %v36_v1 = vld [vmem:[%s1768_s0 + $0xb0] sm:$0xff]  ;;  %v39_v3 = vld [vmem:[%s1768_s0 + $0xc8] sm:$0xff]  ;;  %v38_v5 = vld [vmem:[%s1768_s0 + $0xc0] sm:$0xff] }
  0x17   :  { %382 = vmatprep.subr.mxu0 %v979_v0  ;;  %953 = vmatprep.subr.mxu1 %v979_v0  ;;  %v100_v2 = vld [vmem:[%s1768_s0 + $0x2b0] sm:$0xff]  ;;  %v103_v4 = vld [vmem:[%s1768_s0 + $0x2c8] sm:$0xff]  ;;  %v102_v6 = vld [vmem:[%s1768_s0 + $0x2c0] sm:$0xff] }
  0x18   :  { %383 = vmatpush1.msra.mxu0 %v146_v12  ;;  %971 = vmatpush1.msra.mxu1 %v146_v12  ;;  %v41_v7 = vld [vmem:[%s1768_s0 + $0xd8] sm:$0xff]  ;;  %v40_v9 = vld [vmem:[%s1768_s0 + $0xd0] sm:$0xff]  ;;  %v43_v11 = vld [vmem:[%s1768_s0 + $0xe8] sm:$0xff] }
  0x19   :  { %384 = vmatprep.subr.mxu0 %v979_v0  ;;  %954 = vmatprep.subr.mxu1 %v979_v0  ;;  %v105_v8 = vld [vmem:[%s1768_s0 + $0x2d8] sm:$0xff]  ;;  %v104_v10 = vld [vmem:[%s1768_s0 + $0x2d0] sm:$0xff]  ;;  %v107_v12 = vld [vmem:[%s1768_s0 + $0x2e8] sm:$0xff] }
  0x1a   :  { %385 = vmatpush1.msra.mxu0 %v145_v13  ;;  %972 = vmatpush1.msra.mxu1 %v145_v13  ;;  %v42_v13 = vld [vmem:[%s1768_s0 + $0xe0] sm:$0xff] }
  0x1b   :  { %386 = vmatprep.subr.mxu0 %v979_v0  ;;  %955 = vmatprep.subr.mxu1 %v979_v0 }
  0x1c   :  { %387 = vmatpush1.msra.mxu0 %v144_v14  ;;  %973 = vmatpush1.msra.mxu1 %v144_v14  ;;  %v106_v14 = vld [vmem:[%s1768_s0 + $0x2e0] sm:$0xff] }
  0x1d   :  { %388 = vmatprep.subr.mxu0 %v979_v0  ;;  %956 = vmatprep.subr.mxu1 %v979_v0 }
  0x1e   :  { %389 = vmatpush1.msra.mxu0 %v143_v15  ;;  %974 = vmatpush1.msra.mxu1 %v143_v15  ;;  %v45_v15 = vld [vmem:[%s1768_s0 + $0xf8] sm:$0xff] }
  0x1f   :  { %390 = vmatprep.subr.mxu0 %v979_v0  ;;  %957 = vmatprep.subr.mxu1 %v979_v0 }
  0x20   :  { %391 = vmatpush1.msra.mxu0 %v142_v16  ;;  %975 = vmatpush1.msra.mxu1 %v142_v16  ;;  %v109_v16 = vld [vmem:[%s1768_s0 + $0x2f8] sm:$0xff] }
  0x21   :  { %420 = vmatprep.subr.mxu0 %v979_v0  ;;  %958 = vmatprep.subr.mxu1 %v979_v0 }
  0x22   :  { %421 = vmatpush2.msra.mxu0 %v159_v17  ;;  %976 = vmatpush2.msra.mxu1 %v159_v17  ;;  %v44_v17 = vld [vmem:[%s1768_s0 + $0xf0] sm:$0xff] }
  0x23   :  { %422 = vmatprep.subr.mxu0 %v979_v0  ;;  %959 = vmatprep.subr.mxu1 %v979_v0  ;;  %v101_v0 = vld [vmem:[%s1768_s0 + $0x2b8] sm:$0xff] }
  0x24   :  { %423 = vmatpush2.msra.mxu0 %v158_v18  ;;  %977 = vmatpush2.msra.mxu1 %v158_v18  ;;  %v108_v18 = vld [vmem:[%s1768_s0 + $0x2f0] sm:$0xff] }
  0x25   :  { %878 = vmatprep.mubr.msk.f32.mxu0 %vm167_vm0, %v15_v19  ;;  %910 = vmatprep.mubr.msk.f32.mxu1 %vm167_vm0, %v79_v20  ;;  %v47_v19 = vld [vmem:[%s1768_s0 + $0x108] sm:$0xff] }
  0x26   :  { %425 = vmatmul.mubr.f32.vlgmr.msra.gmra.mxu0 %v14_v21  ;;  %585 = vmatmul.mubr.f32.vlgmr.msra.gmra.mxu1 %v78_v22  ;;  %v111_v20 = vld [vmem:[%s1768_s0 + $0x308] sm:$0xff]  ;;  %v46_v21 = vld [vmem:[%s1768_s0 + $0x100] sm:$0xff] }
  0x27   :  { %879 = vmatprep.mubr.msk.f32.mxu0 %vm167_vm0, %v17_v23  ;;  %911 = vmatprep.mubr.msk.f32.mxu1 %vm167_vm0, %v81_v24  ;;  %v110_v22 = vld [vmem:[%s1768_s0 + $0x300] sm:$0xff]  ;;  %v49_v23 = vld [vmem:[%s1768_s0 + $0x118] sm:$0xff] }
  0x28   :  { %v113_v24 = vld [vmem:[%s1768_s0 + $0x318] sm:$0xff] }
  0x2a   :  { %430 = vmatmul.mubr.f32.gmra.mxu0 %v16_v25  ;;  %590 = vmatmul.mubr.f32.gmra.mxu1 %v80_v26  ;;  %v48_v25 = vld [vmem:[%s1768_s0 + $0x110] sm:$0xff] }
  0x2b   :  { %880 = vmatprep.mubr.msk.f32.mxu0 %vm167_vm0, %v19_v27  ;;  %912 = vmatprep.mubr.msk.f32.mxu1 %vm167_vm0, %v83_v28  ;;  %v112_v26 = vld [vmem:[%s1768_s0 + $0x310] sm:$0xff]  ;;  %v51_v27 = vld [vmem:[%s1768_s0 + $0x128] sm:$0xff] }
  0x2c   :  { %v115_v28 = vld [vmem:[%s1768_s0 + $0x328] sm:$0xff] }
  0x2e   :  { %435 = vmatmul.mubr.f32.gmra.mxu0 %v18_v29  ;;  %595 = vmatmul.mubr.f32.gmra.mxu1 %v82_v30  ;;  %v50_v29 = vld [vmem:[%s1768_s0 + $0x120] sm:$0xff] }
  0x2f   :  { %881 = vmatprep.mubr.msk.f32.mxu0 %vm167_vm0, %v21_v31  ;;  %913 = vmatprep.mubr.msk.f32.mxu1 %vm167_vm0, %v85_v32  ;;  %v114_v30 = vld [vmem:[%s1768_s0 + $0x320] sm:$0xff]  ;;  %v53_v31 = vld [vmem:[%s1768_s0 + $0x138] sm:$0xff] }
  0x30   :  { %v117_v32 = vld [vmem:[%s1768_s0 + $0x338] sm:$0xff] }
  0x32   :  { %440 = vmatmul.mubr.f32.gmra.mxu0 %v20_v33  ;;  %600 = vmatmul.mubr.f32.gmra.mxu1 %v84_v34  ;;  %v52_v33 = vld [vmem:[%s1768_s0 + $0x130] sm:$0xff] }
  0x33   :  { %882 = vmatprep.mubr.msk.f32.mxu0 %vm167_vm0, %v23_v35  ;;  %914 = vmatprep.mubr.msk.f32.mxu1 %vm167_vm0, %v87_v36  ;;  %v116_v34 = vld [vmem:[%s1768_s0 + $0x330] sm:$0xff]  ;;  %v55_v35 = vld [vmem:[%s1768_s0 + $0x148] sm:$0xff] }
  0x34   :  { %v119_v36 = vld [vmem:[%s1768_s0 + $0x348] sm:$0xff] }
  0x36   :  { %445 = vmatmul.mubr.f32.gmra.mxu0 %v22_v37  ;;  %605 = vmatmul.mubr.f32.gmra.mxu1 %v86_v38  ;;  %v54_v37 = vld [vmem:[%s1768_s0 + $0x140] sm:$0xff] }
  0x37   :  { %883 = vmatprep.mubr.msk.f32.mxu0 %vm167_vm0, %v25_v39  ;;  %915 = vmatprep.mubr.msk.f32.mxu1 %vm167_vm0, %v89_v40  ;;  %v118_v38 = vld [vmem:[%s1768_s0 + $0x340] sm:$0xff]  ;;  %v57_v39 = vld [vmem:[%s1768_s0 + $0x158] sm:$0xff] }
  0x38   :  { %v121_v40 = vld [vmem:[%s1768_s0 + $0x358] sm:$0xff] }
  0x3a   :  { %450 = vmatmul.mubr.f32.gmra.mxu0 %v24_v41  ;;  %610 = vmatmul.mubr.f32.gmra.mxu1 %v88_v42  ;;  %v56_v41 = vld [vmem:[%s1768_s0 + $0x150] sm:$0xff] }
  0x3b   :  { %884 = vmatprep.mubr.msk.f32.mxu0 %vm167_vm0, %v27_v43  ;;  %916 = vmatprep.mubr.msk.f32.mxu1 %vm167_vm0, %v91_v44  ;;  %v120_v42 = vld [vmem:[%s1768_s0 + $0x350] sm:$0xff]  ;;  %v59_v43 = vld [vmem:[%s1768_s0 + $0x168] sm:$0xff] }
  0x3c   :  { %v123_v44 = vld [vmem:[%s1768_s0 + $0x368] sm:$0xff] }
  0x3e   :  { %455 = vmatmul.mubr.f32.gmra.mxu0 %v26_v45  ;;  %615 = vmatmul.mubr.f32.gmra.mxu1 %v90_v46  ;;  %v58_v45 = vld [vmem:[%s1768_s0 + $0x160] sm:$0xff] }
  0x3f   :  { %885 = vmatprep.mubr.msk.f32.mxu0 %vm167_vm0, %v29_v47  ;;  %917 = vmatprep.mubr.msk.f32.mxu1 %vm167_vm0, %v93_v48  ;;  %v122_v46 = vld [vmem:[%s1768_s0 + $0x360] sm:$0xff]  ;;  %v61_v47 = vld [vmem:[%s1768_s0 + $0x178] sm:$0xff] }
  0x40   :  { %v125_v48 = vld [vmem:[%s1768_s0 + $0x378] sm:$0xff] }
  0x42   :  { %460 = vmatmul.mubr.f32.gmra.mxu0 %v28_v49  ;;  %620 = vmatmul.mubr.f32.gmra.mxu1 %v92_v50  ;;  %v60_v49 = vld [vmem:[%s1768_s0 + $0x170] sm:$0xff] }
  0x43   :  { %886 = vmatprep.mubr.msk.f32.mxu0 %vm167_vm0, %v31_v51  ;;  %918 = vmatprep.mubr.msk.f32.mxu1 %vm167_vm0, %v95_v52  ;;  %v124_v50 = vld [vmem:[%s1768_s0 + $0x370] sm:$0xff]  ;;  %v63_v51 = vld [vmem:[%s1768_s0 + $0x188] sm:$0xff] }
  0x44   :  { %v127_v52 = vld [vmem:[%s1768_s0 + $0x388] sm:$0xff] }
  0x46   :  { %465 = vmatmul.mubr.f32.gmra.mxu0 %v30_v53  ;;  %625 = vmatmul.mubr.f32.gmra.mxu1 %v94_v54  ;;  %v62_v53 = vld [vmem:[%s1768_s0 + $0x180] sm:$0xff] }
  0x47   :  { %887 = vmatprep.mubr.msk.f32.mxu0 %vm167_vm0, %v33_v55  ;;  %919 = vmatprep.mubr.msk.f32.mxu1 %vm167_vm0, %v97_v56  ;;  %v126_v54 = vld [vmem:[%s1768_s0 + $0x380] sm:$0xff]  ;;  %v65_v55 = vld [vmem:[%s1768_s0 + $0x198] sm:$0xff] }
  0x48   :  { %v129_v56 = vld [vmem:[%s1768_s0 + $0x398] sm:$0xff] }
  0x4a   :  { %470 = vmatmul.mubr.f32.gmra.mxu0 %v32_v57  ;;  %630 = vmatmul.mubr.f32.gmra.mxu1 %v96_v58  ;;  %v64_v57 = vld [vmem:[%s1768_s0 + $0x190] sm:$0xff] }
  0x4b   :  { %888 = vmatprep.mubr.msk.f32.mxu0 %vm167_vm0, %v35_v59  ;;  %920 = vmatprep.mubr.msk.f32.mxu1 %vm167_vm0, %v99_v60  ;;  %v128_v58 = vld [vmem:[%s1768_s0 + $0x390] sm:$0xff]  ;;  %v67_v59 = vld [vmem:[%s1768_s0 + $0x1a8] sm:$0xff] }
  0x4c   :  { %v131_v60 = vld [vmem:[%s1768_s0 + $0x3a8] sm:$0xff] }
  0x4e   :  { %475 = vmatmul.mubr.f32.gmra.mxu0 %v34_v61  ;;  %635 = vmatmul.mubr.f32.gmra.mxu1 %v98_v62  ;;  %v66_v61 = vld [vmem:[%s1768_s0 + $0x1a0] sm:$0xff] }
  0x4f   :  { %889 = vmatprep.mubr.msk.f32.mxu0 %vm167_vm0, %v37_v63  ;;  %921 = vmatprep.mubr.msk.f32.mxu1 %vm167_vm0, %v101_v0  ;;  %v130_v62 = vld [vmem:[%s1768_s0 + $0x3a0] sm:$0xff]  ;;  %v69_v63 = vld [vmem:[%s1768_s0 + $0x1b8] sm:$0xff] }
  0x50   :  { %v133_v0 = vld [vmem:[%s1768_s0 + $0x3b8] sm:$0xff] }
  0x52   :  { %480 = vmatmul.mubr.f32.gmra.mxu0 %v36_v1  ;;  %640 = vmatmul.mubr.f32.gmra.mxu1 %v100_v2  ;;  %v68_v1 = vld [vmem:[%s1768_s0 + $0x1b0] sm:$0xff] }
  0x53   :  { %890 = vmatprep.mubr.msk.f32.mxu0 %vm167_vm0, %v39_v3  ;;  %922 = vmatprep.mubr.msk.f32.mxu1 %vm167_vm0, %v103_v4  ;;  %v132_v2 = vld [vmem:[%s1768_s0 + $0x3b0] sm:$0xff]  ;;  %v71_v3 = vld [vmem:[%s1768_s0 + $0x1c8] sm:$0xff] }
  0x54   :  { %v135_v4 = vld [vmem:[%s1768_s0 + $0x3c8] sm:$0xff] }
  0x56   :  { %485 = vmatmul.mubr.f32.gmra.mxu0 %v38_v5  ;;  %645 = vmatmul.mubr.f32.gmra.mxu1 %v102_v6  ;;  %v70_v5 = vld [vmem:[%s1768_s0 + $0x1c0] sm:$0xff] }
  0x57   :  { %891 = vmatprep.mubr.msk.f32.mxu0 %vm167_vm0, %v41_v7  ;;  %923 = vmatprep.mubr.msk.f32.mxu1 %vm167_vm0, %v105_v8  ;;  %v134_v6 = vld [vmem:[%s1768_s0 + $0x3c0] sm:$0xff]  ;;  %v73_v7 = vld [vmem:[%s1768_s0 + $0x1d8] sm:$0xff] }
  0x58   :  { %v137_v8 = vld [vmem:[%s1768_s0 + $0x3d8] sm:$0xff] }
  0x5a   :  { %490 = vmatmul.mubr.f32.gmra.mxu0 %v40_v9  ;;  %650 = vmatmul.mubr.f32.gmra.mxu1 %v104_v10  ;;  %v72_v9 = vld [vmem:[%s1768_s0 + $0x1d0] sm:$0xff] }
  0x5b   :  { %892 = vmatprep.mubr.msk.f32.mxu0 %vm167_vm0, %v43_v11  ;;  %924 = vmatprep.mubr.msk.f32.mxu1 %vm167_vm0, %v107_v12  ;;  %v136_v10 = vld [vmem:[%s1768_s0 + $0x3d0] sm:$0xff]  ;;  %v75_v11 = vld [vmem:[%s1768_s0 + $0x1e8] sm:$0xff] }
  0x5c   :  { %v139_v12 = vld [vmem:[%s1768_s0 + $0x3e8] sm:$0xff] }
  0x5e   :  { %495 = vmatmul.mubr.f32.gmra.mxu0 %v42_v13  ;;  %655 = vmatmul.mubr.f32.gmra.mxu1 %v106_v14  ;;  %v74_v13 = vld [vmem:[%s1768_s0 + $0x1e0] sm:$0xff] }
  0x5f   :  { %893 = vmatprep.mubr.msk.f32.mxu0 %vm167_vm0, %v45_v15  ;;  %925 = vmatprep.mubr.msk.f32.mxu1 %vm167_vm0, %v109_v16  ;;  %v138_v14 = vld [vmem:[%s1768_s0 + $0x3e0] sm:$0xff]  ;;  %v77_v15 = vld [vmem:[%s1768_s0 + $0x1f8] sm:$0xff] }
  0x60   :  { %v141_v16 = vld [vmem:[%s1768_s0 + $0x3f8] sm:$0xff] }
  0x62   :  { %500 = vmatmul.mubr.f32.gmra.mxu0 %v44_v17  ;;  %660 = vmatmul.mubr.f32.gmra.mxu1 %v108_v18  ;;  %v76_v17 = vld [vmem:[%s1768_s0 + $0x1f0] sm:$0xff] }
  0x63   :  { %894 = vmatprep.mubr.msk.f32.mxu0 %vm167_vm0, %v47_v19  ;;  %926 = vmatprep.mubr.msk.f32.mxu1 %vm167_vm0, %v111_v20  ;;  %v140_v18 = vld [vmem:[%s1768_s0 + $0x3f0] sm:$0xff] }
  0x66   :  { %505 = vmatmul.mubr.f32.gmra.mxu0 %v46_v21  ;;  %665 = vmatmul.mubr.f32.gmra.mxu1 %v110_v22 }
  0x67   :  { %895 = vmatprep.mubr.msk.f32.mxu0 %vm167_vm0, %v49_v23  ;;  %927 = vmatprep.mubr.msk.f32.mxu1 %vm167_vm0, %v113_v24 }
  0x6a   :  { %510 = vmatmul.mubr.f32.gmra.mxu0 %v48_v25  ;;  %670 = vmatmul.mubr.f32.gmra.mxu1 %v112_v26 }
  0x6b   :  { %896 = vmatprep.mubr.msk.f32.mxu0 %vm167_vm0, %v51_v27  ;;  %928 = vmatprep.mubr.msk.f32.mxu1 %vm167_vm0, %v115_v28 }
  0x6e   :  { %515 = vmatmul.mubr.f32.gmra.mxu0 %v50_v29  ;;  %675 = vmatmul.mubr.f32.gmra.mxu1 %v114_v30 }
  0x6f   :  { %897 = vmatprep.mubr.msk.f32.mxu0 %vm167_vm0, %v53_v31  ;;  %929 = vmatprep.mubr.msk.f32.mxu1 %vm167_vm0, %v117_v32 }
  0x72   :  { %520 = vmatmul.mubr.f32.gmra.mxu0 %v52_v33  ;;  %680 = vmatmul.mubr.f32.gmra.mxu1 %v116_v34 }
  0x73   :  { %898 = vmatprep.mubr.msk.f32.mxu0 %vm167_vm0, %v55_v35  ;;  %930 = vmatprep.mubr.msk.f32.mxu1 %vm167_vm0, %v119_v36 }
  0x76   :  { %525 = vmatmul.mubr.f32.gmra.mxu0 %v54_v37  ;;  %685 = vmatmul.mubr.f32.gmra.mxu1 %v118_v38 }
  0x77   :  { %899 = vmatprep.mubr.msk.f32.mxu0 %vm167_vm0, %v57_v39  ;;  %931 = vmatprep.mubr.msk.f32.mxu1 %vm167_vm0, %v121_v40 }
  0x7a   :  { %530 = vmatmul.mubr.f32.gmra.mxu0 %v56_v41  ;;  %690 = vmatmul.mubr.f32.gmra.mxu1 %v120_v42 }
  0x7b   :  { %900 = vmatprep.mubr.msk.f32.mxu0 %vm167_vm0, %v59_v43  ;;  %932 = vmatprep.mubr.msk.f32.mxu1 %vm167_vm0, %v123_v44 }
  0x7e   :  { %535 = vmatmul.mubr.f32.gmra.mxu0 %v58_v45  ;;  %695 = vmatmul.mubr.f32.gmra.mxu1 %v122_v46 }
  0x7f   :  { %901 = vmatprep.mubr.msk.f32.mxu0 %vm167_vm0, %v61_v47  ;;  %933 = vmatprep.mubr.msk.f32.mxu1 %vm167_vm0, %v125_v48 }
  0x82   :  { %540 = vmatmul.mubr.f32.gmra.mxu0 %v60_v49  ;;  %700 = vmatmul.mubr.f32.gmra.mxu1 %v124_v50 }
  0x83   :  { %902 = vmatprep.mubr.msk.f32.mxu0 %vm167_vm0, %v63_v51  ;;  %934 = vmatprep.mubr.msk.f32.mxu1 %vm167_vm0, %v127_v52 }
  0x86   :  { %545 = vmatmul.mubr.f32.gmra.mxu0 %v62_v53  ;;  %705 = vmatmul.mubr.f32.gmra.mxu1 %v126_v54 }
  0x87   :  { %903 = vmatprep.mubr.msk.f32.mxu0 %vm167_vm0, %v65_v55  ;;  %935 = vmatprep.mubr.msk.f32.mxu1 %vm167_vm0, %v129_v56 }
  0x8a   :  { %550 = vmatmul.mubr.f32.gmra.mxu0 %v64_v57  ;;  %710 = vmatmul.mubr.f32.gmra.mxu1 %v128_v58 }
  0x8b   :  { %904 = vmatprep.mubr.msk.f32.mxu0 %vm167_vm0, %v67_v59  ;;  %936 = vmatprep.mubr.msk.f32.mxu1 %vm167_vm0, %v131_v60 }
  0x8e   :  { %555 = vmatmul.mubr.f32.gmra.mxu0 %v66_v61  ;;  %715 = vmatmul.mubr.f32.gmra.mxu1 %v130_v62 }
  0x8f   :  { %905 = vmatprep.mubr.msk.f32.mxu0 %vm167_vm0, %v69_v63  ;;  %937 = vmatprep.mubr.msk.f32.mxu1 %vm167_vm0, %v133_v0 }
  0x92   :  { %560 = vmatmul.mubr.f32.gmra.mxu0 %v68_v1  ;;  %720 = vmatmul.mubr.f32.gmra.mxu1 %v132_v2 }
  0x93   :  { %906 = vmatprep.mubr.msk.f32.mxu0 %vm167_vm0, %v71_v3  ;;  %938 = vmatprep.mubr.msk.f32.mxu1 %vm167_vm0, %v135_v4 }
  0x96   :  { %565 = vmatmul.mubr.f32.gmra.mxu0 %v70_v5  ;;  %725 = vmatmul.mubr.f32.gmra.mxu1 %v134_v6 }
  0x97   :  { %907 = vmatprep.mubr.msk.f32.mxu0 %vm167_vm0, %v73_v7  ;;  %939 = vmatprep.mubr.msk.f32.mxu1 %vm167_vm0, %v137_v8 }
  0x9a   :  { %570 = vmatmul.mubr.f32.gmra.mxu0 %v72_v9  ;;  %730 = vmatmul.mubr.f32.gmra.mxu1 %v136_v10 }
  0x9b   :  { %908 = vmatprep.mubr.msk.f32.mxu0 %vm167_vm0, %v75_v11  ;;  %940 = vmatprep.mubr.msk.f32.mxu1 %vm167_vm0, %v139_v12 }
  0x9e   :  { %575 = vmatmul.mubr.f32.gmra.mxu0 %v74_v13  ;;  %735 = vmatmul.mubr.f32.gmra.mxu1 %v138_v14 }
  0x9f   :  { %909 = vmatprep.mubr.msk.f32.mxu0 %vm167_vm0, %v77_v15  ;;  %941 = vmatprep.mubr.msk.f32.mxu1 %vm167_vm0, %v141_v16  ;;  %v1601_v15 = vld [vmem:[%s1769_s2] ss:$0 sm:$0xff] }
  0xa2   :  { %580 = vmatmul.mubr.f32.gmra.mxu0 %v76_v17  ;;  %740 = vmatmul.mubr.f32.gmra.mxu1 %v140_v18 }
  0xe6   :  { %v1538_v19 = vpop.f32.mrf.mxu0  ;;  %v1540_v20 = vpop.f32.mrf.mxu1 }
  0xe7   :  { %v427_v18 = vadd.f32 %v1601_v15, %v1538_v19 }
  0xe8   :  { %v428_v21 = vpop.f32.mrf.mxu0  ;;  %v588_v22 = vpop.f32.mrf.mxu1 }
  0xea   :  { %v1542_v23 = vpop.f32.mrf.mxu0  ;;  %v1544_v24 = vpop.f32.mrf.mxu1 }
  0xeb   :  { %v592_v19 = vadd.f32 %v1601_v15, %v1544_v24 }
  0xec   :  { %v433_v25 = vpop.f32.mrf.mxu0  ;;  %v593_v26 = vpop.f32.mrf.mxu1 }
  0xed   :  { %v587_v25 = vadd.f32 %v1601_v15, %v1540_v20  ;;  %v778_v24 = vmax.f32 %v592_v19, 0.0 }
  0xee   :  { %v1546_v27 = vpop.f32.mrf.mxu0  ;;  %v1548_v28 = vpop.f32.mrf.mxu1 }
  0xf0   :  { %v438_v29 = vpop.f32.mrf.mxu0  ;;  %v598_v30 = vpop.f32.mrf.mxu1 }
  0xf2   :  { %v1550_v31 = vpop.f32.mrf.mxu0  ;;  %v1552_v32 = vpop.f32.mrf.mxu1 }
  0xf4   :  { %v443_v33 = vpop.f32.mrf.mxu0  ;;  %v603_v34 = vpop.f32.mrf.mxu1 }
  0xf5   :  { %v745_v34 = vmax.f32 %v427_v18, 0.0 }
  0xf6   :  { %v1554_v35 = vpop.f32.mrf.mxu0  ;;  %v1556_v36 = vpop.f32.mrf.mxu1 }
  0xf8   :  { %v448_v37 = vpop.f32.mrf.mxu0  ;;  %v608_v38 = vpop.f32.mrf.mxu1 }
  0xf9   :  { %v432_v37 = vadd.f32 %v1601_v15, %v1542_v23  ;;  %v437_v23 = vadd.f32 %v1601_v15, %v1546_v27 }
  0xfa   :  { %v1558_v39 = vpop.f32.mrf.mxu0  ;;  %v1560_v40 = vpop.f32.mrf.mxu1 }
  0xfc   :  { %v453_v41 = vpop.f32.mrf.mxu0  ;;  %v613_v42 = vpop.f32.mrf.mxu1 }
  0xfd   :  { %v777_v42 = vmax.f32 %v587_v25, 0.0 }
  0xfe   :  { %v1562_v43 = vpop.f32.mrf.mxu0  ;;  %v1564_v44 = vpop.f32.mrf.mxu1 }
 0x100   :  { %v458_v45 = vpop.f32.mrf.mxu0  ;;  %v618_v46 = vpop.f32.mrf.mxu1 }
 0x102   :  { %v1566_v47 = vpop.f32.mrf.mxu0  ;;  %v1568_v48 = vpop.f32.mrf.mxu1 }
 0x104   :  { %v463_v49 = vpop.f32.mrf.mxu0  ;;  %v623_v50 = vpop.f32.mrf.mxu1 }
 0x106   :  { %v1570_v51 = vpop.f32.mrf.mxu0  ;;  %v1572_v52 = vpop.f32.mrf.mxu1 }
 0x108   :  { %v468_v53 = vpop.f32.mrf.mxu0  ;;  %v628_v54 = vpop.f32.mrf.mxu1 }
 0x10a   :  { %v1574_v55 = vpop.f32.mrf.mxu0  ;;  %v1576_v56 = vpop.f32.mrf.mxu1 }
 0x10c   :  { %v473_v57 = vpop.f32.mrf.mxu0  ;;  %v633_v58 = vpop.f32.mrf.mxu1 }
 0x10d   :  { %v746_v58 = vmax.f32 %v432_v37, 0.0 }
 0x10e   :  { %v1578_v59 = vpop.f32.mrf.mxu0  ;;  %v1580_v60 = vpop.f32.mrf.mxu1 }
 0x110   :  { %v478_v61 = vpop.f32.mrf.mxu0  ;;  %v638_v62 = vpop.f32.mrf.mxu1 }
 0x111   :  { %v597_v61 = vadd.f32 %v1601_v15, %v1548_v28  ;;  %v747_v28 = vmax.f32 %v437_v23, 0.0 }
 0x112   :  { %v1582_v63 = vpop.f32.mrf.mxu0  ;;  %v1584_v0 = vpop.f32.mrf.mxu1 }
 0x114   :  { %v483_v1 = vpop.f32.mrf.mxu0  ;;  %v643_v2 = vpop.f32.mrf.mxu1 }
 0x116   :  { %v1586_v3 = vpop.f32.mrf.mxu0  ;;  %v1588_v4 = vpop.f32.mrf.mxu1 }
 0x118   :  { %v488_v5 = vpop.f32.mrf.mxu0  ;;  %v648_v6 = vpop.f32.mrf.mxu1 }
 0x11a   :  { %v1590_v7 = vpop.f32.mrf.mxu0  ;;  %v1592_v8 = vpop.f32.mrf.mxu1 }
 0x11c   :  { %v493_v9 = vpop.f32.mrf.mxu0  ;;  %v653_v10 = vpop.f32.mrf.mxu1 }
 0x11e   :  { %v1594_v11 = vpop.f32.mrf.mxu0  ;;  %v1596_v12 = vpop.f32.mrf.mxu1 }
 0x120   :  { %v498_v13 = vpop.f32.mrf.mxu0  ;;  %v658_v14 = vpop.f32.mrf.mxu1 }
 0x122   :  { %v1603_v16 = vpop.f32.mrf.mxu0  ;;  %v1605_v17 = vpop.f32.mrf.mxu1 }
 0x124   :  { %v503_v21 = vpop.f32.mrf.mxu0  ;;  %v663_v22 = vpop.f32.mrf.mxu1 }
 0x125   :  { %v779_v21 = vmax.f32 %v597_v61, 0.0  ;;  %v442_v22 = vadd.f32 %v1601_v15, %v1550_v31 }
 0x126   :  { %v506_v26 = vpop.f32.mrf.mxu0  ;;  %v666_v29 = vpop.f32.mrf.mxu1 }
 0x127   :  { %v507_v30 = vadd.f32 %v1601_v15, %v506_v26  ;;  %v667_v33 = vadd.f32 %v1601_v15, %v666_v29  ;;  %v602_v29 = vadd.f32 %v1601_v15, %v1552_v32  ;;  %v447_v32 = vadd.f32 %v1601_v15, %v1554_v35 }
 0x128   :  { %v508_v38 = vpop.f32.mrf.mxu0  ;;  %v668_v41 = vpop.f32.mrf.mxu1 }
 0x129   :  { %v761_v45 = vmax.f32 %v507_v30, 0.0  ;;  %v793_v46 = vmax.f32 %v667_v33, 0.0 }
 0x12a   :  { %v511_v49 = vpop.f32.mrf.mxu0  ;;  %v671_v20 = vpop.f32.mrf.mxu1 }
 0x12b   :  { %v809_v50 = vmax.f32 %v745_v34, %v761_v45  ;;  %v825_v53 = vmax.f32 %v777_v42, %v793_v46  ;;  %v512_v54 = vadd.f32 %v1601_v15, %v511_v49  ;;  %v672_v57 = vadd.f32 %v1601_v15, %v671_v20 }
 0x12c   :  { %v513_v62 = vpop.f32.mrf.mxu0  ;;  %v673_v1 = vpop.f32.mrf.mxu1  ;;  %v748_v45 = vmax.f32 %v442_v22, 0.0  ;;  %v607_v46 = vadd.f32 %v1601_v15, %v1556_v36  ;;  %v749_v36 = vmax.f32 %v447_v32, 0.0 }
 0x12d   :  { %v841_v2 = vmax.f32 %v809_v50, %v825_v53  ;;  %v762_v5 = vmax.f32 %v512_v54, 0.0  ;;  %v794_v6 = vmax.f32 %v672_v57, 0.0  ;;  %v780_v50 = vmax.f32 %v602_v29, 0.0 }
 0x12e   :  { %v516_v9 = vpop.f32.mrf.mxu0  ;;  %v676_v10 = vpop.f32.mrf.mxu1 }
 0x12f   :  { %857 = vst.msk [vmem:[%s1770_s3] sm:$0xff] %vm167_vm0, %v841_v2  ;;  %v810_v13 = vmax.f32 %v746_v58, %v762_v5  ;;  %v826_v14 = vmax.f32 %v778_v24, %v794_v6  ;;  %v517_v27 = vadd.f32 %v1601_v15, %v516_v9  ;;  %v677_v18 = vadd.f32 %v1601_v15, %v676_v10 }
 0x130   :  { %v518_v25 = vpop.f32.mrf.mxu0  ;;  %v678_v26 = vpop.f32.mrf.mxu1  ;;  %v781_v24 = vmax.f32 %v607_v46, 0.0  ;;  %v452_v2 = vadd.f32 %v1601_v15, %v1558_v39  ;;  %v612_v9 = vadd.f32 %v1601_v15, %v1560_v40  ;;  %v457_v40 = vadd.f32 %v1601_v15, %v1562_v43 }
 0x131   :  { %v842_v30 = vmax.f32 %v810_v13, %v826_v14  ;;  %v763_v33 = vmax.f32 %v517_v27, 0.0  ;;  %v795_v34 = vmax.f32 %v677_v18, 0.0  ;;  %v617_v26 = vadd.f32 %v1601_v15, %v1564_v44 }
 0x132   :  { %v521_v37 = vpop.f32.mrf.mxu0  ;;  %v681_v38 = vpop.f32.mrf.mxu1  ;;  %v750_v25 = vmax.f32 %v452_v2, 0.0  ;;  %v751_v44 = vmax.f32 %v457_v40, 0.0  ;;  %v462_v46 = vadd.f32 %v1601_v15, %v1566_v47  ;;  %v632_v40 = vadd.f32 %v1601_v15, %v1576_v56 }
 0x133   :  { %858 = vst.msk [vmem:[%s1770_s3 + $0x8] sm:$0xff] %vm167_vm0, %v842_v30  ;;  %v811_v41 = vmax.f32 %v747_v28, %v763_v33  ;;  %v827_v42 = vmax.f32 %v779_v21, %v795_v34  ;;  %v522_v19 = vadd.f32 %v1601_v15, %v521_v37  ;;  %v682_v31 = vadd.f32 %v1601_v15, %v681_v38 }
 0x134   :  { %v523_v49 = vpop.f32.mrf.mxu0  ;;  %v683_v20 = vpop.f32.mrf.mxu1  ;;  %v782_v33 = vmax.f32 %v612_v9, 0.0  ;;  %v783_v32 = vmax.f32 %v617_v26, 0.0  ;;  %v477_v56 = vadd.f32 %v1601_v15, %v1578_v59 }
 0x135   :  { %v843_v53 = vmax.f32 %v811_v41, %v827_v42  ;;  %v764_v54 = vmax.f32 %v522_v19, 0.0  ;;  %v796_v57 = vmax.f32 %v682_v31, 0.0 }
 0x136   :  { %v526_v58 = vpop.f32.mrf.mxu0  ;;  %v686_v23 = vpop.f32.mrf.mxu1 }
 0x137   :  { %859 = vst.msk [vmem:[%s1770_s3 + $0x10] sm:$0xff] %vm167_vm0, %v843_v53  ;;  %v812_v61 = vmax.f32 %v748_v45, %v764_v54  ;;  %v828_v62 = vmax.f32 %v780_v50, %v796_v57  ;;  %v527_v35 = vadd.f32 %v1601_v15, %v526_v58  ;;  %v687_v1 = vadd.f32 %v1601_v15, %v686_v23 }
 0x138   :  { %v528_v5 = vpop.f32.mrf.mxu0  ;;  %v688_v6 = vpop.f32.mrf.mxu1  ;;  %v622_v50 = vadd.f32 %v1601_v15, %v1568_v48  ;;  %v467_v48 = vadd.f32 %v1601_v15, %v1570_v51 }
 0x139   :  { %v844_v10 = vmax.f32 %v812_v61, %v828_v62  ;;  %v765_v13 = vmax.f32 %v527_v35, 0.0  ;;  %v797_v14 = vmax.f32 %v687_v1, 0.0  ;;  %v752_v1 = vmax.f32 %v462_v46, 0.0 }
 0x13a   :  { %v531_v27 = vpop.f32.mrf.mxu0  ;;  %v691_v18 = vpop.f32.mrf.mxu1  ;;  %v784_v5 = vmax.f32 %v622_v50, 0.0 }
 0x13b   :  { %860 = vst.msk [vmem:[%s1770_s3 + $0x18] sm:$0xff] %vm167_vm0, %v844_v10  ;;  %v813_v28 = vmax.f32 %v749_v36, %v765_v13  ;;  %v829_v21 = vmax.f32 %v781_v24, %v797_v14  ;;  %v532_v22 = vadd.f32 %v1601_v15, %v531_v27  ;;  %v692_v39 = vadd.f32 %v1601_v15, %v691_v18 }
 0x13c   :  { %v533_v29 = vpop.f32.mrf.mxu0  ;;  %v693_v30 = vpop.f32.mrf.mxu1  ;;  %v627_v36 = vadd.f32 %v1601_v15, %v1572_v52  ;;  %v753_v52 = vmax.f32 %v467_v48, 0.0 }
 0x13d   :  { %v845_v34 = vmax.f32 %v813_v28, %v829_v21  ;;  %v766_v37 = vmax.f32 %v532_v22, 0.0  ;;  %v798_v38 = vmax.f32 %v692_v39, 0.0  ;;  %v472_v22 = vadd.f32 %v1601_v15, %v1574_v55 }
 0x13e   :  { %v536_v41 = vpop.f32.mrf.mxu0  ;;  %v696_v42 = vpop.f32.mrf.mxu1  ;;  %v785_v21 = vmax.f32 %v627_v36, 0.0 }
 0x13f   :  { %861 = vst.msk [vmem:[%s1770_s3 + $0x20] sm:$0xff] %vm167_vm0, %v845_v34  ;;  %v814_v19 = vmax.f32 %v750_v25, %v766_v37  ;;  %v830_v31 = vmax.f32 %v782_v33, %v798_v38  ;;  %v537_v43 = vadd.f32 %v1601_v15, %v536_v41  ;;  %v697_v45 = vadd.f32 %v1601_v15, %v696_v42 }
 0x140   :  { %v538_v49 = vpop.f32.mrf.mxu0  ;;  %v698_v20 = vpop.f32.mrf.mxu1  ;;  %v754_v42 = vmax.f32 %v472_v22, 0.0 }
 0x141   :  { %v846_v53 = vmax.f32 %v814_v19, %v830_v31  ;;  %v767_v54 = vmax.f32 %v537_v43, 0.0  ;;  %v799_v57 = vmax.f32 %v697_v45, 0.0  ;;  %v637_v19 = vadd.f32 %v1601_v15, %v1580_v60 }
 0x142   :  { %v541_v58 = vpop.f32.mrf.mxu0  ;;  %v701_v23 = vpop.f32.mrf.mxu1  ;;  %v786_v45 = vmax.f32 %v632_v40, 0.0  ;;  %v755_v60 = vmax.f32 %v477_v56, 0.0  ;;  %v492_v40 = vadd.f32 %v1601_v15, %v1590_v7 }
 0x143   :  { %862 = vst.msk [vmem:[%s1770_s3 + $0x28] sm:$0xff] %vm167_vm0, %v846_v53  ;;  %v815_v61 = vmax.f32 %v751_v44, %v767_v54  ;;  %v831_v62 = vmax.f32 %v783_v32, %v799_v57  ;;  %v542_v35 = vadd.f32 %v1601_v15, %v541_v58  ;;  %v702_v47 = vadd.f32 %v1601_v15, %v701_v23 }
 0x144   :  { %v543_v24 = vpop.f32.mrf.mxu0  ;;  %v703_v2 = vpop.f32.mrf.mxu1  ;;  %v787_v57 = vmax.f32 %v637_v19, 0.0  ;;  %v482_v58 = vadd.f32 %v1601_v15, %v1582_v63  ;;  %v758_v19 = vmax.f32 %v492_v40, 0.0 }
 0x145   :  { %v847_v6 = vmax.f32 %v815_v61, %v831_v62  ;;  %v768_v9 = vmax.f32 %v542_v35, 0.0  ;;  %v800_v10 = vmax.f32 %v702_v47, 0.0  ;;  %v642_v62 = vadd.f32 %v1601_v15, %v1584_v0 }
 0x146   :  { %v546_v13 = vpop.f32.mrf.mxu0  ;;  %v706_v14 = vpop.f32.mrf.mxu1  ;;  %v487_v0 = vadd.f32 %v1601_v15, %v1586_v3 }
 0x147   :  { %863 = vst.msk [vmem:[%s1770_s3 + $0x30] sm:$0xff] %vm167_vm0, %v847_v6  ;;  %v816_v27 = vmax.f32 %v752_v1, %v768_v9  ;;  %v832_v18 = vmax.f32 %v784_v5, %v800_v10  ;;  %v547_v51 = vadd.f32 %v1601_v15, %v546_v13  ;;  %v707_v28 = vadd.f32 %v1601_v15, %v706_v14 }
 0x148   :  { %v548_v39 = vpop.f32.mrf.mxu0  ;;  %v708_v25 = vpop.f32.mrf.mxu1  ;;  %v756_v6 = vmax.f32 %v482_v58, 0.0  ;;  %v647_v9 = vadd.f32 %v1601_v15, %v1588_v4  ;;  %v788_v14 = vmax.f32 %v642_v62, 0.0  ;;  %v757_v4 = vmax.f32 %v487_v0, 0.0 }
 0x149   :  { %v848_v26 = vmax.f32 %v816_v27, %v832_v18  ;;  %v769_v29 = vmax.f32 %v547_v51, 0.0  ;;  %v801_v30 = vmax.f32 %v707_v28, 0.0 }
 0x14a   :  { %v551_v33 = vpop.f32.mrf.mxu0  ;;  %v711_v34 = vpop.f32.mrf.mxu1  ;;  %v789_v25 = vmax.f32 %v647_v9, 0.0 }
 0x14b   :  { %864 = vst.msk [vmem:[%s1770_s3 + $0x38] sm:$0xff] %vm167_vm0, %v848_v26  ;;  %v817_v37 = vmax.f32 %v753_v52, %v769_v29  ;;  %v833_v38 = vmax.f32 %v785_v21, %v801_v30  ;;  %v552_v41 = vadd.f32 %v1601_v15, %v551_v33  ;;  %v712_v55 = vadd.f32 %v1601_v15, %v711_v34 }
 0x14c   :  { %v553_v31 = vpop.f32.mrf.mxu0  ;;  %v713_v43 = vpop.f32.mrf.mxu1  ;;  %v652_v30 = vadd.f32 %v1601_v15, %v1592_v8  ;;  %v497_v8 = vadd.f32 %v1601_v15, %v1594_v11 }
 0x14d   :  { %v849_v44 = vmax.f32 %v817_v37, %v833_v38  ;;  %v770_v32 = vmax.f32 %v552_v41, 0.0  ;;  %v802_v46 = vmax.f32 %v712_v55, 0.0  ;;  %v657_v31 = vadd.f32 %v1601_v15, %v1596_v12 }
 0x14e   :  { %v556_v49 = vpop.f32.mrf.mxu0  ;;  %v716_v20 = vpop.f32.mrf.mxu1  ;;  %v759_v12 = vmax.f32 %v497_v8, 0.0 }
 0x14f   :  { %865 = vst.msk [vmem:[%s1770_s3 + $0x40] sm:$0xff] %vm167_vm0, %v849_v44  ;;  %v818_v50 = vmax.f32 %v754_v42, %v770_v32  ;;  %v834_v53 = vmax.f32 %v786_v45, %v802_v46  ;;  %v557_v59 = vadd.f32 %v1601_v15, %v556_v49  ;;  %v717_v54 = vadd.f32 %v1601_v15, %v716_v20 }
 0x150   :  { %v558_v23 = vpop.f32.mrf.mxu0  ;;  %v718_v61 = vpop.f32.mrf.mxu1  ;;  %v790_v44 = vmax.f32 %v652_v30, 0.0 }
 0x151   :  { %v850_v35 = vmax.f32 %v818_v50, %v834_v53  ;;  %v771_v47 = vmax.f32 %v557_v59, 0.0  ;;  %v803_v1 = vmax.f32 %v717_v54, 0.0  ;;  %v662_v61 = vadd.f32 %v1601_v15, %v1605_v17 }
 0x152   :  { %v561_v48 = vpop.f32.mrf.mxu0  ;;  %v721_v36 = vpop.f32.mrf.mxu1 }
 0x153   :  { %866 = vst.msk [vmem:[%s1770_s3 + $0x48] sm:$0xff] %vm167_vm0, %v850_v35  ;;  %v819_v24 = vmax.f32 %v755_v60, %v771_v47  ;;  %v835_v2 = vmax.f32 %v787_v57, %v803_v1  ;;  %v562_v5 = vadd.f32 %v1601_v15, %v561_v48  ;;  %v722_v63 = vadd.f32 %v1601_v15, %v721_v36 }
 0x154   :  { %v563_v10 = vpop.f32.mrf.mxu0  ;;  %v723_v13 = vpop.f32.mrf.mxu1  ;;  %v791_v60 = vmax.f32 %v657_v31, 0.0  ;;  %v502_v57 = vadd.f32 %v1601_v15, %v1603_v16  ;;  %v792_v17 = vmax.f32 %v662_v61, 0.0 }
 0x155   :  { %v851_v27 = vmax.f32 %v819_v24, %v835_v2  ;;  %v772_v18 = vmax.f32 %v562_v5, 0.0  ;;  %v804_v51 = vmax.f32 %v722_v63, 0.0 }
 0x156   :  { %v566_v28 = vpop.f32.mrf.mxu0  ;;  %v726_v52 = vpop.f32.mrf.mxu1  ;;  %v760_v5 = vmax.f32 %v502_v57, 0.0 }
 0x157   :  { %867 = vst.msk [vmem:[%s1770_s3 + $0x50] sm:$0xff] %vm167_vm0, %v851_v27  ;;  %v820_v21 = vmax.f32 %v756_v6, %v772_v18  ;;  %v836_v22 = vmax.f32 %v788_v14, %v804_v51  ;;  %v567_v3 = vadd.f32 %v1601_v15, %v566_v28  ;;  %v727_v39 = vadd.f32 %v1601_v15, %v726_v52 }
 0x158   :  { %v568_v26 = vpop.f32.mrf.mxu0  ;;  %v728_v29 = vpop.f32.mrf.mxu1 }
 0x159   :  { %v852_v33 = vmax.f32 %v820_v21, %v836_v22  ;;  %v773_v34 = vmax.f32 %v567_v3, 0.0  ;;  %v805_v37 = vmax.f32 %v727_v39, 0.0 }
 0x15a   :  { %v571_v38 = vpop.f32.mrf.mxu0  ;;  %v731_v41 = vpop.f32.mrf.mxu1 }
 0x15b   :  { %868 = vst.msk [vmem:[%s1770_s3 + $0x58] sm:$0xff] %vm167_vm0, %v852_v33  ;;  %v821_v55 = vmax.f32 %v757_v4, %v773_v34  ;;  %v837_v42 = vmax.f32 %v789_v25, %v805_v37  ;;  %v572_v56 = vadd.f32 %v1601_v15, %v571_v38  ;;  %v732_v7 = vadd.f32 %v1601_v15, %v731_v41 }
 0x15c   :  { %v573_v43 = vpop.f32.mrf.mxu0  ;;  %v733_v45 = vpop.f32.mrf.mxu1 }
 0x15d   :  { %v853_v32 = vmax.f32 %v821_v55, %v837_v42  ;;  %v774_v46 = vmax.f32 %v572_v56, 0.0  ;;  %v806_v49 = vmax.f32 %v732_v7, 0.0 }
 0x15e   :  { %v576_v20 = vpop.f32.mrf.mxu0  ;;  %v736_v50 = vpop.f32.mrf.mxu1 }
 0x15f   :  { %869 = vst.msk [vmem:[%s1770_s3 + $0x60] sm:$0xff] %vm167_vm0, %v853_v32  ;;  %v822_v53 = vmax.f32 %v758_v19, %v774_v46  ;;  %v838_v59 = vmax.f32 %v790_v44, %v806_v49  ;;  %v577_v11 = vadd.f32 %v1601_v15, %v576_v20  ;;  %v737_v54 = vadd.f32 %v1601_v15, %v736_v50 }
 0x160   :  { %v578_v58 = vpop.f32.mrf.mxu0  ;;  %v738_v23 = vpop.f32.mrf.mxu1 }
 0x161   :  { %v854_v62 = vmax.f32 %v822_v53, %v838_v59  ;;  %v775_v35 = vmax.f32 %v577_v11, 0.0  ;;  %v807_v47 = vmax.f32 %v737_v54, 0.0 }
 0x162   :  { %v581_v1 = vpop.f32.mrf.mxu0  ;;  %v741_v48 = vpop.f32.mrf.mxu1 }
 0x163   :  { %870 = vst.msk [vmem:[%s1770_s3 + $0x68] sm:$0xff] %vm167_vm0, %v854_v62  ;;  %v823_v36 = vmax.f32 %v759_v12, %v775_v35  ;;  %v839_v24 = vmax.f32 %v791_v60, %v807_v47  ;;  %v582_v2 = vadd.f32 %v1601_v15, %v581_v1  ;;  %v742_v16 = vadd.f32 %v1601_v15, %v741_v48 }
 0x164   :  { %v583_v63 = vpop.f32.mrf.mxu0  ;;  %v743_v6 = vpop.f32.mrf.mxu1 }
 0x165   :  { %v855_v0 = vmax.f32 %v823_v36, %v839_v24  ;;  %v776_v9 = vmax.f32 %v582_v2, 0.0  ;;  %v808_v10 = vmax.f32 %v742_v16, 0.0 }
 0x167   :  { %871 = vst.msk [vmem:[%s1770_s3 + $0x70] sm:$0xff] %vm167_vm0, %v855_v0  ;;  %v824_v13 = vmax.f32 %v760_v5, %v776_v9  ;;  %v840_v14 = vmax.f32 %v792_v17, %v808_v10 }
 0x169   :  { %v856_v27 = vmax.f32 %v824_v13, %v840_v14 }
 0x16b   :  { %872 = vst.msk [vmem:[%s1770_s3 + $0x78] sm:$0xff] %vm167_vm0, %v856_v27 }

// kernel: glyphnet_forward.8
= control target key start
LH: loop header
LB: loop body
LE: loop exit
PB: predicated region body
PF: predicated region fallthrough
CT: control target
= control target key end

     0   :  { %v355_v0 = vmov 0.0   ;;  %vm71_vm0 = vcmask 130048   ;;  %s597_s1 = inlined_call_operand.vmem [shape: f32[144,16], index: 1, kind: input, shape index: {}]   ;;  %s598_s0 = inlined_call_operand.vmem [shape: f32[4,32,144], index: 0, kind: input, shape index: {}]   ;;  %s599_s2 = inlined_call_operand.vmem [shape: f32[1,16], index: 2, kind: input, shape index: {}]   ;;  %s600_s3 = inlined_call_operand.vmem [shape: f32[32,16], index: 3, kind: output, shape index: {}]  }
   0x1   :  { %120 = vmatprep.subr.mxu0 %v355_v0  ;;  %318 = vmatprep.subr.mxu1 %v355_v0  ;;  %v61_v1 = vld [vmem:[%s597_s1 + $0x78] sm:$0xff]  ;;  %v60_v2 = vld [vmem:[%s597_s1 + $0x70] sm:$0xff]  ;;  %v59_v3 = vld [vmem:[%s597_s1 + $0x68] sm:$0xff] }
   0x2   :  { %121 = vmatpush1.msra.mxu0 %v61_v1  ;;  %336 = vmatpush1.msra.mxu1 %v61_v1  ;;  %v58_v4 = vld [vmem:[%s597_s1 + $0x60] sm:$0xff]  ;;  %v57_v5 = vld [vmem:[%s597_s1 + $0x58] sm:$0xff]  ;;  %v56_v6 = vld [vmem:[%s597_s1 + $0x50] sm:$0xff] }
   0x3   :  { %122 = vmatprep.subr.mxu0 %v355_v0  ;;  %319 = vmatprep.subr.mxu1 %v355_v0  ;;  %v55_v7 = vld [vmem:[%s597_s1 + $0x48] sm:$0xff]  ;;  %v54_v8 = vld [vmem:[%s597_s1 + $0x40] sm:$0xff]  ;;  %v53_v9 = vld [vmem:[%s597_s1 + $0x38] sm:$0xff] }
   0x4   :  { %123 = vmatpush1.msra.mxu0 %v60_v2  ;;  %337 = vmatpush1.msra.mxu1 %v60_v2  ;;  %v52_v10 = vld [vmem:[%s597_s1 + $0x30] sm:$0xff]  ;;  %v51_v11 = vld [vmem:[%s597_s1 + $0x28] sm:$0xff]  ;;  %v50_v12 = vld [vmem:[%s597_s1 + $0x20] sm:$0xff] }
   0x5   :  { %124 = vmatprep.subr.mxu0 %v355_v0  ;;  %320 = vmatprep.subr.mxu1 %v355_v0  ;;  %v49_v13 = vld [vmem:[%s597_s1 + $0x18] sm:$0xff]  ;;  %v48_v14 = vld [vmem:[%s597_s1 + $0x10] sm:$0xff]  ;;  %v47_v15 = vld [vmem:[%s597_s1 + $0x8] sm:$0xff] }
   0x6   :  { %125 = vmatpush1.msra.mxu0 %v59_v3  ;;  %338 = vmatpush1.msra.mxu1 %v59_v3  ;;  %v46_v16 = vld [vmem:[%s597_s1] sm:$0xff]  ;;  %v63_v17 = vld [vmem:[%s597_s1 + $0x88] sm:$0xff]  ;;  %v17_v23 = vld [vmem:[%s598_s0 + $0x18] sm:$0xff] }
   0x7   :  { %126 = vmatprep.subr.mxu0 %v355_v0  ;;  %321 = vmatprep.subr.mxu1 %v355_v0  ;;  %v62_v18 = vld [vmem:[%s597_s1 + $0x80] sm:$0xff]  ;;  %v15_v19 = vld [vmem:[%s598_s0 + $0x8] sm:$0xff]  ;;  %v33_v24 = vld [vmem:[%s598_s0 + $0x98] sm:$0xff] }
   0x8   :  { %127 = vmatpush1.msra.mxu0 %v58_v4  ;;  %339 = vmatpush1.msra.mxu1 %v58_v4  ;;  %v31_v20 = vld [vmem:[%s598_s0 + $0x88] sm:$0xff]  ;;  %v14_v21 = vld [vmem:[%s598_s0] sm:$0xff]  ;;  %v16_v25 = vld [vmem:[%s598_s0 + $0x10] sm:$0xff] }
   0x9   :  { %128 = vmatprep.subr.mxu0 %v355_v0  ;;  %322 = vmatprep.subr.mxu1 %v355_v0  ;;  %v30_v22 = vld [vmem:[%s598_s0 + $0x80] sm:$0xff]  ;;  %v32_v26 = vld [vmem:[%s598_s0 + $0x90] sm:$0xff]  ;;  %v19_v27 = vld [vmem:[%s598_s0 + $0x28] sm:$0xff] }
   0xa   :  { %129 = vmatpush1.msra.mxu0 %v57_v5  ;;  %340 = vmatpush1.msra.mxu1 %v57_v5  ;;  %v35_v28 = vld [vmem:[%s598_s0 + $0xa8] sm:$0xff]  ;;  %v18_v29 = vld [vmem:[%s598_s0 + $0x20] sm:$0xff]  ;;  %v21_v31 = vld [vmem:[%s598_s0 + $0x38] sm:$0xff] }
   0xb   :  { %130 = vmatprep.subr.mxu0 %v355_v0  ;;  %323 = vmatprep.subr.mxu1 %v355_v0  ;;  %v34_v30 = vld [vmem:[%s598_s0 + $0xa0] sm:$0xff]  ;;  %v37_v32 = vld [vmem:[%s598_s0 + $0xb8] sm:$0xff]  ;;  %v20_v33 = vld [vmem:[%s598_s0 + $0x30] sm:$0xff] }
   0xc   :  { %131 = vmatpush1.msra.mxu0 %v56_v6  ;;  %341 = vmatpush1.msra.mxu1 %v56_v6  ;;  %v36_v34 = vld [vmem:[%s598_s0 + $0xb0] sm:$0xff]  ;;  %v23_v35 = vld [vmem:[%s598_s0 + $0x48] sm:$0xff]  ;;  %v22_v37 = vld [vmem:[%s598_s0 + $0x40] sm:$0xff] }
   0xd   :  { %132 = vmatprep.subr.mxu0 %v355_v0  ;;  %324 = vmatprep.subr.mxu1 %v355_v0  ;;  %v39_v36 = vld [vmem:[%s598_s0 + $0xc8] sm:$0xff]  ;;  %v38_v38 = vld [vmem:[%s598_s0 + $0xc0] sm:$0xff]  ;;  %v25_v39 = vld [vmem:[%s598_s0 + $0x58] sm:$0xff] }
   0xe   :  { %133 = vmatpush1.msra.mxu0 %v55_v7  ;;  %342 = vmatpush1.msra.mxu1 %v55_v7  ;;  %v41_v40 = vld [vmem:[%s598_s0 + $0xd8] sm:$0xff]  ;;  %v24_v41 = vld [vmem:[%s598_s0 + $0x50] sm:$0xff]  ;;  %v27_v43 = vld [vmem:[%s598_s0 + $0x68] sm:$0xff] }
   0xf   :  { %134 = vmatprep.subr.mxu0 %v355_v0  ;;  %325 = vmatprep.subr.mxu1 %v355_v0  ;;  %v40_v42 = vld [vmem:[%s598_s0 + $0xd0] sm:$0xff]  ;;  %v43_v44 = vld [vmem:[%s598_s0 + $0xe8] sm:$0xff]  ;;  %v26_v45 = vld [vmem:[%s598_s0 + $0x60] sm:$0xff] }
  0x10   :  { %135 = vmatpush1.msra.mxu0 %v54_v8  ;;  %343 = vmatpush1.msra.mxu1 %v54_v8  ;;  %v42_v46 = vld [vmem:[%s598_s0 + $0xe0] sm:$0xff]  ;;  %v29_v47 = vld [vmem:[%s598_s0 + $0x78] sm:$0xff]  ;;  %v28_v49 = vld [vmem:[%s598_s0 + $0x70] sm:$0xff] }
  0x11   :  { %136 = vmatprep.subr.mxu0 %v355_v0  ;;  %326 = vmatprep.subr.mxu1 %v355_v0  ;;  %v45_v48 = vld [vmem:[%s598_s0 + $0xf8] sm:$0xff]  ;;  %v44_v50 = vld [vmem:[%s598_s0 + $0xf0] sm:$0xff]  ;;  %v301_v63 = vld [vmem:[%s599_s2] ss:$0 sm:$0xff] }
  0x12   :  { %137 = vmatpush1.msra.mxu0 %v53_v9  ;;  %344 = vmatpush1.msra.mxu1 %v53_v9 }
  0x13   :  { %138 = vmatprep.subr.mxu0 %v355_v0  ;;  %327 = vmatprep.subr.mxu1 %v355_v0 }
  0x14   :  { %139 = vmatpush1.msra.mxu0 %v52_v10  ;;  %345 = vmatpush1.msra.mxu1 %v52_v10 }
  0x15   :  { %140 = vmatprep.subr.mxu0 %v355_v0  ;;  %328 = vmatprep.subr.mxu1 %v355_v0 }
  0x16   :  { %141 = vmatpush1.msra.mxu0 %v51_v11  ;;  %346 = vmatpush1.msra.mxu1 %v51_v11 }
  0x17   :  { %142 = vmatprep.subr.mxu0 %v355_v0  ;;  %329 = vmatprep.subr.mxu1 %v355_v0 }
  0x18   :  { %143 = vmatpush1.msra.mxu0 %v50_v12  ;;  %347 = vmatpush1.msra.mxu1 %v50_v12 }
  0x19   :  { %144 = vmatprep.subr.mxu0 %v355_v0  ;;  %330 = vmatprep.subr.mxu1 %v355_v0 }
  0x1a   :  { %145 = vmatpush1.msra.mxu0 %v49_v13  ;;  %348 = vmatpush1.msra.mxu1 %v49_v13 }
  0x1b   :  { %146 = vmatprep.subr.mxu0 %v355_v0  ;;  %331 = vmatprep.subr.mxu1 %v355_v0 }
  0x1c   :  { %147 = vmatpush1.msra.mxu0 %v48_v14  ;;  %349 = vmatpush1.msra.mxu1 %v48_v14 }
  0x1d   :  { %148 = vmatprep.subr.mxu0 %v355_v0  ;;  %332 = vmatprep.subr.mxu1 %v355_v0 }
  0x1e   :  { %149 = vmatpush1.msra.mxu0 %v47_v15  ;;  %350 = vmatpush1.msra.mxu1 %v47_v15 }
  0x1f   :  { %150 = vmatprep.subr.mxu0 %v355_v0  ;;  %333 = vmatprep.subr.mxu1 %v355_v0 }
  0x20   :  { %151 = vmatpush1.msra.mxu0 %v46_v16  ;;  %351 = vmatpush1.msra.mxu1 %v46_v16 }
  0x21   :  { %180 = vmatprep.subr.mxu0 %v355_v0  ;;  %334 = vmatprep.subr.mxu1 %v355_v0 }
  0x22   :  { %181 = vmatpush2.msra.mxu0 %v63_v17  ;;  %352 = vmatpush2.msra.mxu1 %v63_v17 }
  0x23   :  { %182 = vmatprep.subr.mxu0 %v355_v0  ;;  %335 = vmatprep.subr.mxu1 %v355_v0 }
  0x24   :  { %183 = vmatpush2.msra.mxu0 %v62_v18  ;;  %353 = vmatpush2.msra.mxu1 %v62_v18 }
  0x25   :  { %302 = vmatprep.mubr.msk.f32.mxu0 %vm71_vm0, %v15_v19  ;;  %310 = vmatprep.mubr.msk.f32.mxu1 %vm71_vm0, %v31_v20 }
  0x26   :  { %185 = vmatmul.mubr.f32.vlgmr.msra.gmra.mxu0 %v14_v21  ;;  %225 = vmatmul.mubr.f32.vlgmr.msra.gmra.mxu1 %v30_v22 }
  0x27   :  { %303 = vmatprep.mubr.msk.f32.mxu0 %vm71_vm0, %v17_v23  ;;  %311 = vmatprep.mubr.msk.f32.mxu1 %vm71_vm0, %v33_v24 }
  0x2a   :  { %190 = vmatmul.mubr.f32.gmra.mxu0 %v16_v25  ;;  %230 = vmatmul.mubr.f32.gmra.mxu1 %v32_v26 }
  0x2b   :  { %304 = vmatprep.mubr.msk.f32.mxu0 %vm71_vm0, %v19_v27  ;;  %312 = vmatprep.mubr.msk.f32.mxu1 %vm71_vm0, %v35_v28 }
  0x2e   :  { %195 = vmatmul.mubr.f32.gmra.mxu0 %v18_v29  ;;  %235 = vmatmul.mubr.f32.gmra.mxu1 %v34_v30 }
  0x2f   :  { %305 = vmatprep.mubr.msk.f32.mxu0 %vm71_vm0, %v21_v31  ;;  %313 = vmatprep.mubr.msk.f32.mxu1 %vm71_vm0, %v37_v32 }
  0x32   :  { %200 = vmatmul.mubr.f32.gmra.mxu0 %v20_v33  ;;  %240 = vmatmul.mubr.f32.gmra.mxu1 %v36_v34 }
  0x33   :  { %306 = vmatprep.mubr.msk.f32.mxu0 %vm71_vm0, %v23_v35  ;;  %314 = vmatprep.mubr.msk.f32.mxu1 %vm71_vm0, %v39_v36 }
  0x36   :  { %205 = vmatmul.mubr.f32.gmra.mxu0 %v22_v37  ;;  %245 = vmatmul.mubr.f32.gmra.mxu1 %v38_v38 }
  0x37   :  { %307 = vmatprep.mubr.msk.f32.mxu0 %vm71_vm0, %v25_v39  ;;  %315 = vmatprep.mubr.msk.f32.mxu1 %vm71_vm0, %v41_v40 }
  0x3a   :  { %210 = vmatmul.mubr.f32.gmra.mxu0 %v24_v41  ;;  %250 = vmatmul.mubr.f32.gmra.mxu1 %v40_v42 }
  0x3b   :  { %308 = vmatprep.mubr.msk.f32.mxu0 %vm71_vm0, %v27_v43  ;;  %316 = vmatprep.mubr.msk.f32.mxu1 %vm71_vm0, %v43_v44 }
  0x3e   :  { %215 = vmatmul.mubr.f32.gmra.mxu0 %v26_v45  ;;  %255 = vmatmul.mubr.f32.gmra.mxu1 %v42_v46 }
  0x3f   :  { %309 = vmatprep.mubr.msk.f32.mxu0 %vm71_vm0, %v29_v47  ;;  %317 = vmatprep.mubr.msk.f32.mxu1 %vm71_vm0, %v45_v48 }
  0x42   :  { %220 = vmatmul.mubr.f32.gmra.mxu0 %v28_v49  ;;  %260 = vmatmul.mubr.f32.gmra.mxu1 %v44_v50 }
  0xe6   :  { %v186_v51 = vpop.f32.mrf.mxu0  ;;  %v226_v52 = vpop.f32.mrf.mxu1 }
  0xe7   :  { %v187_v2 = vadd.f32 %v301_v63, %v186_v51  ;;  %v227_v5 = vadd.f32 %v301_v63, %v226_v52 }
  0xe8   :  { %v188_v53 = vpop.f32.mrf.mxu0  ;;  %v228_v54 = vpop.f32.mrf.mxu1 }
  0xe9   :  { %v265_v10 = vmax.f32 %v187_v2, 0.0  ;;  %v273_v14 = vmax.f32 %v227_v5, 0.0 }
  0xea   :  { %v191_v55 = vpop.f32.mrf.mxu0  ;;  %v231_v56 = vpop.f32.mrf.mxu1 }
  0xeb   :  { %v192_v11 = vadd.f32 %v301_v63, %v191_v55  ;;  %v232_v15 = vadd.f32 %v301_v63, %v231_v56 }
  0xec   :  { %v193_v57 = vpop.f32.mrf.mxu0  ;;  %v233_v58 = vpop.f32.mrf.mxu1 }
  0xed   :  { %v266_v24 = vmax.f32 %v192_v11, 0.0  ;;  %v274_v29 = vmax.f32 %v232_v15, 0.0 }
  0xee   :  { %v196_v59 = vpop.f32.mrf.mxu0  ;;  %v236_v60 = vpop.f32.mrf.mxu1 }
  0xef   :  { %v197_v25 = vadd.f32 %v301_v63, %v196_v59  ;;  %v237_v26 = vadd.f32 %v301_v63, %v236_v60 }
  0xf0   :  { %v198_v61 = vpop.f32.mrf.mxu0  ;;  %v238_v62 = vpop.f32.mrf.mxu1 }
  0xf1   :  { %v267_v39 = vmax.f32 %v197_v25, 0.0  ;;  %v275_v40 = vmax.f32 %v237_v26, 0.0 }
  0xf2   :  { %v201_v0 = vpop.f32.mrf.mxu0  ;;  %v241_v1 = vpop.f32.mrf.mxu1 }
  0xf3   :  { %v202_v41 = vadd.f32 %v301_v63, %v201_v0  ;;  %v242_v44 = vadd.f32 %v301_v63, %v241_v1 }
  0xf4   :  { %v203_v3 = vpop.f32.mrf.mxu0  ;;  %v243_v4 = vpop.f32.mrf.mxu1 }
  0xf5   :  { %v268_v54 = vmax.f32 %v202_v41, 0.0  ;;  %v276_v57 = vmax.f32 %v242_v44, 0.0 }
  0xf6   :  { %v206_v6 = vpop.f32.mrf.mxu0  ;;  %v246_v7 = vpop.f32.mrf.mxu1 }
  0xf7   :  { %v207_v8 = vadd.f32 %v301_v63, %v206_v6  ;;  %v247_v9 = vadd.f32 %v301_v63, %v246_v7 }
  0xf8   :  { %v208_v12 = vpop.f32.mrf.mxu0  ;;  %v248_v13 = vpop.f32.mrf.mxu1 }
  0xf9   :  { %v269_v16 = vmax.f32 %v207_v8, 0.0  ;;  %v277_v17 = vmax.f32 %v247_v9, 0.0 }
  0xfa   :  { %v211_v18 = vpop.f32.mrf.mxu0  ;;  %v251_v19 = vpop.f32.mrf.mxu1 }
  0xfb   :  { %v281_v20 = vmax.f32 %v265_v10, %v269_v16  ;;  %v285_v21 = vmax.f32 %v273_v14, %v277_v17  ;;  %v212_v22 = vadd.f32 %v301_v63, %v211_v18  ;;  %v252_v23 = vadd.f32 %v301_v63, %v251_v19 }
  0xfc   :  { %v213_v27 = vpop.f32.mrf.mxu0  ;;  %v253_v28 = vpop.f32.mrf.mxu1 }
  0xfd   :  { %v289_v30 = vmax.f32 %v281_v20, %v285_v21  ;;  %v270_v31 = vmax.f32 %v212_v22, 0.0  ;;  %v278_v32 = vmax.f32 %v252_v23, 0.0 }
  0xfe   :  { %v216_v33 = vpop.f32.mrf.mxu0  ;;  %v256_v34 = vpop.f32.mrf.mxu1 }
  0xff   :  { %293 = vst.msk [vmem:[%s600_s3] sm:$0xff] %vm71_vm0, %v289_v30  ;;  %v282_v35 = vmax.f32 %v266_v24, %v270_v31  ;;  %v286_v36 = vmax.f32 %v274_v29, %v278_v32  ;;  %v217_v37 = vadd.f32 %v301_v63, %v216_v33  ;;  %v257_v38 = vadd.f32 %v301_v63, %v256_v34 }
 0x100   :  { %v218_v42 = vpop.f32.mrf.mxu0  ;;  %v258_v43 = vpop.f32.mrf.mxu1 }
 0x101   :  { %v290_v45 = vmax.f32 %v282_v35, %v286_v36  ;;  %v271_v46 = vmax.f32 %v217_v37, 0.0  ;;  %v279_v47 = vmax.f32 %v257_v38, 0.0 }
 0x102   :  { %v221_v48 = vpop.f32.mrf.mxu0  ;;  %v261_v49 = vpop.f32.mrf.mxu1 }
 0x103   :  { %294 = vst.msk [vmem:[%s600_s3 + $0x8] sm:$0xff] %vm71_vm0, %v290_v45  ;;  %v283_v50 = vmax.f32 %v267_v39, %v271_v46  ;;  %v287_v51 = vmax.f32 %v275_v40, %v279_v47  ;;  %v222_v52 = vadd.f32 %v301_v63, %v221_v48  ;;  %v262_v53 = vadd.f32 %v301_v63, %v261_v49 }
 0x104   :  { %v223_v55 = vpop.f32.mrf.mxu0  ;;  %v263_v56 = vpop.f32.mrf.mxu1 }
 0x105   :  { %v291_v58 = vmax.f32 %v283_v50, %v287_v51  ;;  %v272_v59 = vmax.f32 %v222_v52, 0.0  ;;  %v280_v60 = vmax.f32 %v262_v53, 0.0 }
 0x107   :  { %295 = vst.msk [vmem:[%s600_s3 + $0x10] sm:$0xff] %vm71_vm0, %v291_v58  ;;  %v284_v61 = vmax.f32 %v268_v54, %v272_v59  ;;  %v288_v62 = vmax.f32 %v276_v57, %v280_v60 }
 0x109   :  { %v292_v0 = vmax.f32 %v284_v61, %v288_v62 }
 0x10b   :  { %296 = vst.msk [vmem:[%s600_s3 + $0x18] sm:$0xff] %vm71_vm0, %v292_v0 }

// kernel: glyphnet_forward.9
= control target key start
LH: loop header
LB: loop body
LE: loop exit
PB: predicated region body
PF: predicated region fallthrough
CT: control target
= control target key end

     0   :  { %v200_v0 = vmov 0.0   ;;  %vm47_vm0 = vcmask 130048   ;;  %vm152_vm1 = vcmask 261120   ;;  %s341_s1 = inlined_call_operand.vmem [shape: f32[144,32], index: 1, kind: input, shape index: {}]   ;;  %s342_s0 = inlined_call_operand.vmem [shape: f32[4,8,144], index: 0, kind: input, shape index: {}]   ;;  %s343_s2 = inlined_call_operand.vmem [shape: f32[1,32], index: 2, kind: input, shape index: {}]   ;;  %s344_s3 = inlined_call_operand.vmem [shape: f32[8,32], index: 3, kind: output, shape index: {}]  }
   0x1   :  { %60 = vmatprep.subr.mxu0 %v200_v0  ;;  %163 = vmatprep.subr.mxu1 %v200_v0  ;;  %v37_v1 = vld [vmem:[%s341_s1 + $0x78] sm:$0xff]  ;;  %v36_v2 = vld [vmem:[%s341_s1 + $0x70] sm:$0xff]  ;;  %v35_v3 = vld [vmem:[%s341_s1 + $0x68] sm:$0xff] }
   0x2   :  { %61 = vmatpush1.msra.mxu0 %v37_v1  ;;  %181 = vmatpush1.msra.mxu1 %v37_v1  ;;  %v34_v4 = vld [vmem:[%s341_s1 + $0x60] sm:$0xff]  ;;  %v33_v5 = vld [vmem:[%s341_s1 + $0x58] sm:$0xff]  ;;  %v32_v6 = vld [vmem:[%s341_s1 + $0x50] sm:$0xff] }
   0x3   :  { %62 = vmatprep.subr.mxu0 %v200_v0  ;;  %164 = vmatprep.subr.mxu1 %v200_v0  ;;  %v31_v7 = vld [vmem:[%s341_s1 + $0x48] sm:$0xff]  ;;  %v30_v8 = vld [vmem:[%s341_s1 + $0x40] sm:$0xff]  ;;  %v29_v9 = vld [vmem:[%s341_s1 + $0x38] sm:$0xff] }
   0x4   :  { %63 = vmatpush1.msra.mxu0 %v36_v2  ;;  %182 = vmatpush1.msra.mxu1 %v36_v2  ;;  %v28_v10 = vld [vmem:[%s341_s1 + $0x30] sm:$0xff]  ;;  %v27_v11 = vld [vmem:[%s341_s1 + $0x28] sm:$0xff]  ;;  %v26_v12 = vld [vmem:[%s341_s1 + $0x20] sm:$0xff] }
   0x5   :  { %64 = vmatprep.subr.mxu0 %v200_v0  ;;  %165 = vmatprep.subr.mxu1 %v200_v0  ;;  %v25_v13 = vld [vmem:[%s341_s1 + $0x18] sm:$0xff]  ;;  %v24_v14 = vld [vmem:[%s341_s1 + $0x10] sm:$0xff]  ;;  %v23_v15 = vld [vmem:[%s341_s1 + $0x8] sm:$0xff] }
   0x6   :  { %65 = vmatpush1.msra.mxu0 %v35_v3  ;;  %183 = vmatpush1.msra.mxu1 %v35_v3  ;;  %v22_v16 = vld [vmem:[%s341_s1] sm:$0xff]  ;;  %v39_v17 = vld [vmem:[%s341_s1 + $0x88] sm:$0xff]  ;;  %v17_v23 = vld [vmem:[%s342_s0 + $0x18] sm:$0xff] }
   0x7   :  { %66 = vmatprep.subr.mxu0 %v200_v0  ;;  %166 = vmatprep.subr.mxu1 %v200_v0  ;;  %v38_v18 = vld [vmem:[%s341_s1 + $0x80] sm:$0xff]  ;;  %v15_v19 = vld [vmem:[%s342_s0 + $0x8] sm:$0xff]  ;;  %v21_v24 = vld [vmem:[%s342_s0 + $0x38] sm:$0xff] }
   0x8   :  { %67 = vmatpush1.msra.mxu0 %v34_v4  ;;  %184 = vmatpush1.msra.mxu1 %v34_v4  ;;  %v19_v20 = vld [vmem:[%s342_s0 + $0x28] sm:$0xff]  ;;  %v14_v21 = vld [vmem:[%s342_s0] sm:$0xff]  ;;  %v16_v25 = vld [vmem:[%s342_s0 + $0x10] sm:$0xff] }
   0x9   :  { %68 = vmatprep.subr.mxu0 %v200_v0  ;;  %167 = vmatprep.subr.mxu1 %v200_v0  ;;  %v18_v22 = vld [vmem:[%s342_s0 + $0x20] sm:$0xff]  ;;  %v20_v26 = vld [vmem:[%s342_s0 + $0x30] sm:$0xff] }
   0xa   :  { %69 = vmatpush1.msra.mxu0 %v33_v5  ;;  %185 = vmatpush1.msra.mxu1 %v33_v5  ;;  %v158_v27 = vld [vmem:[%s343_s2] ss:$0 sm:$0xff] }
   0xb   :  { %70 = vmatprep.subr.mxu0 %v200_v0  ;;  %168 = vmatprep.subr.mxu1 %v200_v0 }
   0xc   :  { %71 = vmatpush1.msra.mxu0 %v32_v6  ;;  %186 = vmatpush1.msra.mxu1 %v32_v6 }
   0xd   :  { %72 = vmatprep.subr.mxu0 %v200_v0  ;;  %169 = vmatprep.subr.mxu1 %v200_v0 }
   0xe   :  { %73 = vmatpush1.msra.mxu0 %v31_v7  ;;  %187 = vmatpush1.msra.mxu1 %v31_v7 }
   0xf   :  { %74 = vmatprep.subr.mxu0 %v200_v0  ;;  %170 = vmatprep.subr.mxu1 %v200_v0 }
  0x10   :  { %75 = vmatpush1.msra.mxu0 %v30_v8  ;;  %188 = vmatpush1.msra.mxu1 %v30_v8 }
  0x11   :  { %76 = vmatprep.subr.mxu0 %v200_v0  ;;  %171 = vmatprep.subr.mxu1 %v200_v0 }
  0x12   :  { %77 = vmatpush1.msra.mxu0 %v29_v9  ;;  %189 = vmatpush1.msra.mxu1 %v29_v9 }
  0x13   :  { %78 = vmatprep.subr.mxu0 %v200_v0  ;;  %172 = vmatprep.subr.mxu1 %v200_v0 }
  0x14   :  { %79 = vmatpush1.msra.mxu0 %v28_v10  ;;  %190 = vmatpush1.msra.mxu1 %v28_v10 }
  0x15   :  { %80 = vmatprep.subr.mxu0 %v200_v0  ;;  %173 = vmatprep.subr.mxu1 %v200_v0 }
  0x16   :  { %81 = vmatpush1.msra.mxu0 %v27_v11  ;;  %191 = vmatpush1.msra.mxu1 %v27_v11 }
  0x17   :  { %82 = vmatprep.subr.mxu0 %v200_v0  ;;  %174 = vmatprep.subr.mxu1 %v200_v0 }
  0x18   :  { %83 = vmatpush1.msra.mxu0 %v26_v12  ;;  %192 = vmatpush1.msra.mxu1 %v26_v12 }
  0x19   :  { %84 = vmatprep.subr.mxu0 %v200_v0  ;;  %175 = vmatprep.subr.mxu1 %v200_v0 }
  0x1a   :  { %85 = vmatpush1.msra.mxu0 %v25_v13  ;;  %193 = vmatpush1.msra.mxu1 %v25_v13 }
  0x1b   :  { %86 = vmatprep.subr.mxu0 %v200_v0  ;;  %176 = vmatprep.subr.mxu1 %v200_v0 }
  0x1c   :  { %87 = vmatpush1.msra.mxu0 %v24_v14  ;;  %194 = vmatpush1.msra.mxu1 %v24_v14 }
  0x1d   :  { %88 = vmatprep.subr.mxu0 %v200_v0  ;;  %177 = vmatprep.subr.mxu1 %v200_v0 }
  0x1e   :  { %89 = vmatpush1.msra.mxu0 %v23_v15  ;;  %195 = vmatpush1.msra.mxu1 %v23_v15 }
  0x1f   :  { %90 = vmatprep.subr.mxu0 %v200_v0  ;;  %178 = vmatprep.subr.mxu1 %v200_v0 }
  0x20   :  { %91 = vmatpush1.msra.mxu0 %v22_v16  ;;  %196 = vmatpush1.msra.mxu1 %v22_v16 }
  0x21   :  { %120 = vmatprep.subr.mxu0 %v200_v0  ;;  %179 = vmatprep.subr.mxu1 %v200_v0 }
  0x22   :  { %121 = vmatpush2.msra.mxu0 %v39_v17  ;;  %197 = vmatpush2.msra.mxu1 %v39_v17 }
  0x23   :  { %122 = vmatprep.subr.mxu0 %v200_v0  ;;  %180 = vmatprep.subr.mxu1 %v200_v0 }
  0x24   :  { %123 = vmatpush2.msra.mxu0 %v38_v18  ;;  %198 = vmatpush2.msra.mxu1 %v38_v18 }
  0x25   :  { %159 = vmatprep.mubr.msk.f32.mxu0 %vm47_vm0, %v15_v19  ;;  %161 = vmatprep.mubr.msk.f32.mxu1 %vm47_vm0, %v19_v20 }
  0x26   :  { %125 = vmatmul.mubr.f32.vlgmr.msra.gmra.mxu0 %v14_v21  ;;  %135 = vmatmul.mubr.f32.vlgmr.msra.gmra.mxu1 %v18_v22 }
  0x27   :  { %160 = vmatprep.mubr.msk.f32.mxu0 %vm47_vm0, %v17_v23  ;;  %162 = vmatprep.mubr.msk.f32.mxu1 %vm47_vm0, %v21_v24 }
  0x2a   :  { %130 = vmatmul.mubr.f32.gmra.mxu0 %v16_v25  ;;  %140 = vmatmul.mubr.f32.gmra.mxu1 %v20_v26 }
  0xe6   :  { %v126_v28 = vpop.f32.mrf.mxu0  ;;  %v136_v29 = vpop.f32.mrf.mxu1 }
  0xe7   :  { %v127_v32 = vadd.f32 %v158_v27, %v126_v28  ;;  %v137_v33 = vadd.f32 %v158_v27, %v136_v29 }
  0xe8   :  { %v128_v30 = vpop.f32.mrf.mxu0  ;;  %v138_v31 = vpop.f32.mrf.mxu1 }
  0xe9   :  { %v145_v40 = vmax.f32 %v127_v32, 0.0  ;;  %v147_v41 = vmax.f32 %v137_v33, 0.0 }
  0xea   :  { %v131_v34 = vpop.f32.mrf.mxu0  ;;  %v141_v35 = vpop.f32.mrf.mxu1 }
  0xeb   :  { %v132_v36 = vadd.f32 %v158_v27, %v131_v34  ;;  %v142_v37 = vadd.f32 %v158_v27, %v141_v35 }
  0xec   :  { %v133_v38 = vpop.f32.mrf.mxu0  ;;  %v143_v39 = vpop.f32.mrf.mxu1 }
  0xed   :  { %v146_v42 = vmax.f32 %v132_v36, 0.0  ;;  %v148_v43 = vmax.f32 %v142_v37, 0.0 }
  0xef   :  { %v149_v44 = vmax.f32 %v145_v40, %v146_v42  ;;  %v150_v45 = vmax.f32 %v147_v41, %v148_v43 }
  0xf1   :  { %v151_v46 = vmax.f32 %v149_v44, %v150_v45 }
  0xf3   :  { %153 = vst.msk [vmem:[%s344_s3] sm:$0xff] %vm152_vm1, %v151_v46 }

// kernel: glyphnet_forward.10
= control target key start
LH: loop header
LB: loop body
LE: loop exit
PB: predicated region body
PF: predicated region fallthrough
CT: control target
= control target key end

     0   :  { %vm69_vm0 = vcmask 261120   ;;  %s510_s1 = inlined_call_operand.vmem [shape: f32[288,32], index: 1, kind: input, shape index: {}]   ;;  %s511_s0 = inlined_call_operand.vmem [shape: f32[4,8,288], index: 0, kind: input, shape index: {}]   ;;  %s512_s2 = inlined_call_operand.vmem [shape: f32[1,32], index: 2, kind: input, shape index: {}]   ;;  %s513_s3 = inlined_call_operand.vmem [shape: f32[8,32], index: 3, kind: output, shape index: {}]  }
   0x1   :  { %v57_v0 = vld [vmem:[%s510_s1 + $0xf8] sm:$0xff]  ;;  %v56_v2 = vld [vmem:[%s510_s1 + $0xf0] sm:$0xff]  ;;  %v55_v4 = vld [vmem:[%s510_s1 + $0xe8] sm:$0xff] }
   0x2   :  { %v41_v1 = vld [vmem:[%s510_s1 + $0x78] sm:$0xff]  ;;  %269 = vmatprep.subr.mxu0 %v57_v0  ;;  %v40_v3 = vld [vmem:[%s510_s1 + $0x70] sm:$0xff]  ;;  %v39_v5 = vld [vmem:[%s510_s1 + $0x68] sm:$0xff] }
   0x3   :  { %270 = vmatpush3.msra.mxu0 %v41_v1  ;;  %v54_v6 = vld [vmem:[%s510_s1 + $0xe0] sm:$0xff]  ;;  %v53_v8 = vld [vmem:[%s510_s1 + $0xd8] sm:$0xff]  ;;  %v52_v10 = vld [vmem:[%s510_s1 + $0xd0] sm:$0xff] }
   0x4   :  { %271 = vmatprep.subr.mxu0 %v56_v2  ;;  %v38_v7 = vld [vmem:[%s510_s1 + $0x60] sm:$0xff]  ;;  %v37_v9 = vld [vmem:[%s510_s1 + $0x58] sm:$0xff]  ;;  %v36_v11 = vld [vmem:[%s510_s1 + $0x50] sm:$0xff] }
   0x5   :  { %272 = vmatpush3.msra.mxu0 %v40_v3  ;;  %v61_v12 = vld [vmem:[%s510_s1 + $0x118] sm:$0xff]  ;;  %v51_v13 = vld [vmem:[%s510_s1 + $0xc8] sm:$0xff]  ;;  %v60_v14 = vld [vmem:[%s510_s1 + $0x110] sm:$0xff] }
   0x6   :  { %273 = vmatprep.subr.mxu0 %v55_v4  ;;  %321 = vmatprep.subr.mxu1 %v61_v12  ;;  %v35_v15 = vld [vmem:[%s510_s1 + $0x48] sm:$0xff]  ;;  %v50_v17 = vld [vmem:[%s510_s1 + $0xc0] sm:$0xff]  ;;  %v49_v20 = vld [vmem:[%s510_s1 + $0xb8] sm:$0xff] }
   0x7   :  { %274 = vmatpush3.msra.mxu0 %v39_v5  ;;  %322 = vmatpush3.msra.mxu1 %v61_v12  ;;  %v15_v16 = vld [vmem:[%s511_s0 + $0x8] sm:$0xff]  ;;  %v34_v19 = vld [vmem:[%s510_s1 + $0x40] sm:$0xff]  ;;  %v33_v22 = vld [vmem:[%s510_s1 + $0x38] sm:$0xff] }
   0x8   :  { %275 = vmatprep.subr.mxu0 %v54_v6  ;;  %323 = vmatprep.subr.mxu1 %v60_v14  ;;  %v59_v18 = vld [vmem:[%s510_s1 + $0x108] sm:$0xff]  ;;  %v58_v21 = vld [vmem:[%s510_s1 + $0x100] sm:$0xff]  ;;  %v48_v23 = vld [vmem:[%s510_s1 + $0xb0] sm:$0xff] }
   0x9   :  { %276 = vmatpush3.msra.mxu0 %v38_v7  ;;  %146 = vmatprep.mubr.f32.mxu0 %v15_v16  ;;  %v16_v24 = vld [vmem:[%s511_s0 + $0x10] sm:$0xff]  ;;  %v19_v26 = vld [vmem:[%s511_s0 + $0x28] sm:$0xff]  ;;  %v22_v28 = vld [vmem:[%s511_s0 + $0x40] sm:$0xff] }
   0xa   :  { %277 = vmatprep.subr.mxu0 %v53_v8  ;;  %324 = vmatpush3.msra.mxu1 %v60_v14  ;;  %v32_v25 = vld [vmem:[%s510_s1 + $0x30] sm:$0xff]  ;;  %v47_v27 = vld [vmem:[%s510_s1 + $0xa8] sm:$0xff]  ;;  %v46_v30 = vld [vmem:[%s510_s1 + $0xa0] sm:$0xff] }
   0xb   :  { %278 = vmatpush3.msra.mxu0 %v37_v9  ;;  %325 = vmatprep.subr.mxu1 %v59_v18  ;;  %v31_v29 = vld [vmem:[%s510_s1 + $0x28] sm:$0xff]  ;;  %v30_v31 = vld [vmem:[%s510_s1 + $0x20] sm:$0xff]  ;;  %v25_v32 = vld [vmem:[%s511_s0 + $0x58] sm:$0xff] }
   0xc   :  { %279 = vmatprep.subr.mxu0 %v52_v10  ;;  %326 = vmatpush3.msra.mxu1 %v59_v18  ;;  %v45_v33 = vld [vmem:[%s510_s1 + $0x98] sm:$0xff]  ;;  %v44_v35 = vld [vmem:[%s510_s1 + $0x90] sm:$0xff]  ;;  %v43_v37 = vld [vmem:[%s510_s1 + $0x88] sm:$0xff] }
   0xd   :  { %280 = vmatpush3.msra.mxu0 %v36_v11  ;;  %327 = vmatprep.subr.mxu1 %v58_v21  ;;  %v29_v34 = vld [vmem:[%s510_s1 + $0x18] sm:$0xff]  ;;  %v28_v36 = vld [vmem:[%s510_s1 + $0x10] sm:$0xff]  ;;  %v27_v38 = vld [vmem:[%s510_s1 + $0x8] sm:$0xff] }
   0xe   :  { %281 = vmatprep.subr.mxu0 %v51_v13  ;;  %328 = vmatpush3.msra.mxu1 %v58_v21  ;;  %v42_v39 = vld [vmem:[%s510_s1 + $0x80] sm:$0xff]  ;;  %v17_v43 = vld [vmem:[%s511_s0 + $0x18] sm:$0xff]  ;;  %v20_v45 = vld [vmem:[%s511_s0 + $0x30] sm:$0xff] }
   0xf   :  { %282 = vmatpush3.msra.mxu0 %v35_v15  ;;  %329 = vmatprep.mubr.msk.f32.mxu1 %vm69_vm0, %v16_v24  ;;  %v26_v40 = vld [vmem:[%s510_s1] sm:$0xff]  ;;  %v21_v44 = vld [vmem:[%s511_s0 + $0x38] sm:$0xff]  ;;  %v24_v46 = vld [vmem:[%s511_s0 + $0x50] sm:$0xff] }
  0x10   :  { %283 = vmatprep.subr.mxu0 %v50_v17  ;;  %330 = vmatmul.mubr.msk.f32.vlgmr.msra.gmra.mxu1 %vm69_vm0, %v19_v26  ;;  %v14_v41 = vld [vmem:[%s511_s0] sm:$0xff]  ;;  %v23_v47 = vld [vmem:[%s511_s0 + $0x48] sm:$0xff] }
  0x11   :  { %284 = vmatpush3.msra.mxu0 %v34_v19  ;;  %332 = vmatprep.mubr.msk.f32.mxu1 %vm69_vm0, %v22_v28  ;;  %v18_v42 = vld [vmem:[%s511_s0 + $0x20] sm:$0xff] }
  0x12   :  { %285 = vmatprep.subr.mxu0 %v49_v20  ;;  %v264_v57 = vld [vmem:[%s512_s2] ss:$0 sm:$0xff] }
  0x13   :  { %286 = vmatpush3.msra.mxu0 %v33_v22 }
  0x14   :  { %287 = vmatprep.subr.mxu0 %v48_v23  ;;  %333 = vmatmul.mubr.msk.f32.gmra.mxu1 %vm69_vm0, %v25_v32 }
  0x15   :  { %288 = vmatpush3.msra.mxu0 %v32_v25 }
  0x16   :  { %289 = vmatprep.subr.mxu0 %v47_v27 }
  0x17   :  { %290 = vmatpush3.msra.mxu0 %v31_v29 }
  0x18   :  { %291 = vmatprep.subr.mxu0 %v46_v30 }
  0x19   :  { %292 = vmatpush3.msra.mxu0 %v30_v31 }
  0x1a   :  { %293 = vmatprep.subr.mxu0 %v45_v33 }
  0x1b   :  { %294 = vmatpush3.msra.mxu0 %v29_v34 }
  0x1c   :  { %295 = vmatprep.subr.mxu0 %v44_v35 }
  0x1d   :  { %296 = vmatpush3.msra.mxu0 %v28_v36 }
  0x1e   :  { %297 = vmatprep.subr.mxu0 %v43_v37 }
  0x1f   :  { %298 = vmatpush3.msra.mxu0 %v27_v38 }
  0x20   :  { %299 = vmatprep.subr.mxu0 %v42_v39 }
  0x21   :  { %300 = vmatpush3.msra.mxu0 %v26_v40 }
  0x22   :  { %147 = vmatmul.mubr.f32.vlgmr.msra.gmra.mxu0 %v14_v41 }
  0x23   :  { %151 = vmatprep.mubr.f32.mxu0 %v18_v42 }
  0x26   :  { %152 = vmatmul.mubr.f32.gmra.mxu0 %v17_v43 }
  0x27   :  { %156 = vmatprep.mubr.f32.mxu0 %v21_v44 }
  0x2a   :  { %157 = vmatmul.mubr.f32.gmra.mxu0 %v20_v45 }
  0x2b   :  { %161 = vmatprep.mubr.f32.mxu0 %v24_v46 }
  0x2e   :  { %162 = vmatmul.mubr.f32.gmra.mxu0 %v23_v47 }
  0xd0   :  { %v331_v51 = vpop.f32.mrf.mxu1 }
  0xd2   :  { %v233_v54 = vpop.f32.mrf.mxu1 }
  0xd4   :  { %v334_v59 = vpop.f32.mrf.mxu1 }
  0xd6   :  { %v243_v2 = vpop.f32.mrf.mxu1 }
  0xe2   :  { %v301_v48 = vpop.f32.mrf.mxu0 }
  0xe4   :  { %v302_v49 = vpop.f32.mrf.mxu0 }
  0xe5   :  { %v303_v56 = vadd.f32 %v302_v49, %v301_v48 }
  0xe6   :  { %v304_v50 = vpop.f32.mrf.mxu0 }
  0xe7   :  { %v149_v63 = vadd.f32 %v303_v56, %v264_v57 }
  0xe8   :  { %v305_v52 = vpop.f32.mrf.mxu0 }
  0xe9   :  { %v306_v53 = vadd.f32 %v305_v52, %v304_v50  ;;  %v234_v5 = vadd.f32 %v233_v54, %v149_v63 }
  0xea   :  { %v307_v55 = vpop.f32.mrf.mxu0 }
  0xeb   :  { %v154_v60 = vadd.f32 %v306_v53, %v264_v57  ;;  %v252_v10 = vmax.f32 %v234_v5, 0.0 }
  0xec   :  { %v308_v58 = vpop.f32.mrf.mxu0 }
  0xed   :  { %v309_v61 = vadd.f32 %v308_v58, %v307_v55  ;;  %v239_v3 = vadd.f32 %v331_v51, %v154_v60 }
  0xee   :  { %v310_v62 = vpop.f32.mrf.mxu0 }
  0xef   :  { %v159_v0 = vadd.f32 %v309_v61, %v264_v57  ;;  %v253_v8 = vmax.f32 %v239_v3, 0.0 }
  0xf0   :  { %v311_v1 = vpop.f32.mrf.mxu0 }
  0xf1   :  { %v312_v4 = vadd.f32 %v311_v1, %v310_v62  ;;  %v244_v7 = vadd.f32 %v243_v2, %v159_v0  ;;  %v256_v13 = vmax.f32 %v252_v10, %v253_v8 }
  0xf3   :  { %v164_v6 = vadd.f32 %v312_v4, %v264_v57  ;;  %v254_v11 = vmax.f32 %v244_v7, 0.0 }
  0xf5   :  { %v249_v9 = vadd.f32 %v334_v59, %v164_v6 }
  0xf7   :  { %v255_v12 = vmax.f32 %v249_v9, 0.0 }
  0xf9   :  { %v257_v14 = vmax.f32 %v254_v11, %v255_v12 }
  0xfb   :  { %v258_v15 = vmax.f32 %v256_v13, %v257_v14 }
  0xfd   :  { %259 = vst.msk [vmem:[%s513_s3] sm:$0xff] %vm69_vm0, %v258_v15 }

// kernel: glyphnet_forward.11
= control target key start
LH: loop header
LB: loop body
LE: loop exit
PB: predicated region body
PF: predicated region fallthrough
CT: control target
= control target key end

     0   :  { %vm121_vm0 = vcmask 261120   ;;  %s1352_s0 = inlined_call_operand.vmem [shape: f32[128,288], index: 0, kind: input, shape index: {}]   ;;  %s1353_s1 = inlined_call_operand.vmem [shape: f32[288,64], index: 1, kind: input, shape index: {}]   ;;  %s1354_s2 = inlined_call_operand.vmem [shape: f32[1,64], index: 2, kind: input, shape index: {}]   ;;  %s1355_s3 = inlined_call_operand.vmem [shape: f32[2,128], index: 3, kind: input, shape index: {}]   ;;  %s1356_s4 = inlined_call_operand.vmem [shape: f32[64,20], index: 4, kind: input, shape index: {}]   ;;  %s1357_s5 = inlined_call_operand.vmem [shape: f32[1,20], index: 5, kind: input, shape index: {}]   ;;  %s1358_s6 = inlined_call_operand.hbm [shape: f32[2,20], index: 6, kind: output, shape index: {}]  }
   0x1   :  { %v109_v0 = vld [vmem:[%s1353_s1 + $0xf8] sm:$0xff]  ;;  %v108_v2 = vld [vmem:[%s1353_s1 + $0xf0] sm:$0xff]  ;;  %v107_v4 = vld [vmem:[%s1353_s1 + $0xe8] sm:$0xff] }
   0x2   :  { %v93_v1 = vld [vmem:[%s1353_s1 + $0x78] sm:$0xff]  ;;  %679 = vmatprep.subr.mxu0 %v109_v0  ;;  %v92_v3 = vld [vmem:[%s1353_s1 + $0x70] sm:$0xff]  ;;  %v91_v5 = vld [vmem:[%s1353_s1 + $0x68] sm:$0xff] }
   0x3   :  { %680 = vmatpush3.msra.mxu0 %v93_v1  ;;  %v106_v6 = vld [vmem:[%s1353_s1 + $0xe0] sm:$0xff]  ;;  %v105_v8 = vld [vmem:[%s1353_s1 + $0xd8] sm:$0xff]  ;;  %v104_v10 = vld [vmem:[%s1353_s1 + $0xd0] sm:$0xff] }
   0x4   :  { %681 = vmatprep.subr.mxu0 %v108_v2  ;;  %v90_v7 = vld [vmem:[%s1353_s1 + $0x60] sm:$0xff]  ;;  %v89_v9 = vld [vmem:[%s1353_s1 + $0x58] sm:$0xff]  ;;  %v88_v11 = vld [vmem:[%s1353_s1 + $0x50] sm:$0xff] }
   0x5   :  { %682 = vmatpush3.msra.mxu0 %v92_v3  ;;  %v113_v12 = vld [vmem:[%s1353_s1 + $0x118] sm:$0xff]  ;;  %v103_v13 = vld [vmem:[%s1353_s1 + $0xc8] sm:$0xff]  ;;  %v112_v14 = vld [vmem:[%s1353_s1 + $0x110] sm:$0xff] }
   0x6   :  { %683 = vmatprep.subr.mxu0 %v107_v4  ;;  %805 = vmatprep.subr.mxu1 %v113_v12  ;;  %v87_v15 = vld [vmem:[%s1353_s1 + $0x48] sm:$0xff]  ;;  %v102_v17 = vld [vmem:[%s1353_s1 + $0xc0] sm:$0xff]  ;;  %v101_v20 = vld [vmem:[%s1353_s1 + $0xb8] sm:$0xff] }
   0x7   :  { %684 = vmatpush3.msra.mxu0 %v91_v5  ;;  %806 = vmatpush3.msra.mxu1 %v113_v12  ;;  %v31_v16 = vld [vmem:[%s1352_s0 + $0x8] sm:$0xff]  ;;  %v86_v19 = vld [vmem:[%s1353_s1 + $0x40] sm:$0xff]  ;;  %v85_v22 = vld [vmem:[%s1353_s1 + $0x38] sm:$0xff] }
   0x8   :  { %685 = vmatprep.subr.mxu0 %v106_v6  ;;  %807 = vmatprep.subr.mxu1 %v112_v14  ;;  %v111_v18 = vld [vmem:[%s1353_s1 + $0x108] sm:$0xff]  ;;  %v110_v21 = vld [vmem:[%s1353_s1 + $0x100] sm:$0xff]  ;;  %v100_v23 = vld [vmem:[%s1353_s1 + $0xb0] sm:$0xff] }
   0x9   :  { %686 = vmatpush3.msra.mxu0 %v90_v7  ;;  %234 = vmatprep.mubr.f32.mxu0 %v31_v16  ;;  %v32_v24 = vld [vmem:[%s1352_s0 + $0x10] sm:$0xff]  ;;  %v35_v26 = vld [vmem:[%s1352_s0 + $0x28] sm:$0xff]  ;;  %v38_v28 = vld [vmem:[%s1352_s0 + $0x40] sm:$0xff] }
   0xa   :  { %687 = vmatprep.subr.mxu0 %v105_v8  ;;  %808 = vmatpush3.msra.mxu1 %v112_v14  ;;  %v84_v25 = vld [vmem:[%s1353_s1 + $0x30] sm:$0xff]  ;;  %v99_v27 = vld [vmem:[%s1353_s1 + $0xa8] sm:$0xff]  ;;  %v98_v30 = vld [vmem:[%s1353_s1 + $0xa0] sm:$0xff] }
   0xb   :  { %688 = vmatpush3.msra.mxu0 %v89_v9  ;;  %809 = vmatprep.subr.mxu1 %v111_v18  ;;  %v83_v29 = vld [vmem:[%s1353_s1 + $0x28] sm:$0xff]  ;;  %v82_v31 = vld [vmem:[%s1353_s1 + $0x20] sm:$0xff]  ;;  %v41_v32 = vld [vmem:[%s1352_s0 + $0x58] sm:$0xff] }
   0xc   :  { %689 = vmatprep.subr.mxu0 %v104_v10  ;;  %810 = vmatpush3.msra.mxu1 %v111_v18  ;;  %v97_v33 = vld [vmem:[%s1353_s1 + $0x98] sm:$0xff]  ;;  %v44_v34 = vld [vmem:[%s1352_s0 + $0x70] sm:$0xff]  ;;  %v47_v38 = vld [vmem:[%s1352_s0 + $0x88] sm:$0xff] }
   0xd   :  { %690 = vmatpush3.msra.mxu0 %v88_v11  ;;  %811 = vmatprep.subr.mxu1 %v110_v21  ;;  %v81_v35 = vld [vmem:[%s1353_s1 + $0x18] sm:$0xff]  ;;  %v96_v36 = vld [vmem:[%s1353_s1 + $0x90] sm:$0xff]  ;;  %v95_v39 = vld [vmem:[%s1353_s1 + $0x88] sm:$0xff] }
   0xe   :  { %691 = vmatprep.subr.mxu0 %v103_v13  ;;  %812 = vmatpush3.msra.mxu1 %v110_v21  ;;  %v80_v37 = vld [vmem:[%s1353_s1 + $0x10] sm:$0xff]  ;;  %v50_v40 = vld [vmem:[%s1352_s0 + $0xa0] sm:$0xff]  ;;  %v79_v41 = vld [vmem:[%s1353_s1 + $0x8] sm:$0xff] }
   0xf   :  { %692 = vmatpush3.msra.mxu0 %v87_v15  ;;  %813 = vmatprep.mubr.msk.f32.mxu1 %vm121_vm0, %v32_v24  ;;  %v94_v42 = vld [vmem:[%s1353_s1 + $0x80] sm:$0xff] }
  0x10   :  { %693 = vmatprep.subr.mxu0 %v102_v17  ;;  %814 = vmatmul.mubr.msk.f32.vlgmr.msra.gmra.mxu1 %vm121_vm0, %v35_v26 }
  0x11   :  { %694 = vmatpush3.msra.mxu0 %v86_v19  ;;  %816 = vmatprep.mubr.msk.f32.mxu1 %vm121_vm0, %v38_v28 }
  0x12   :  { %695 = vmatprep.subr.mxu0 %v101_v20 }
  0x13   :  { %696 = vmatpush3.msra.mxu0 %v85_v22 }
  0x14   :  { %697 = vmatprep.subr.mxu0 %v100_v23  ;;  %817 = vmatmul.mubr.msk.f32.gmra.mxu1 %vm121_vm0, %v41_v32 }
  0x15   :  { %698 = vmatpush3.msra.mxu0 %v84_v25  ;;  %819 = vmatprep.mubr.msk.f32.mxu1 %vm121_vm0, %v44_v34 }
  0x16   :  { %699 = vmatprep.subr.mxu0 %v99_v27 }
  0x17   :  { %700 = vmatpush3.msra.mxu0 %v83_v29 }
  0x18   :  { %701 = vmatprep.subr.mxu0 %v98_v30  ;;  %820 = vmatmul.mubr.msk.f32.gmra.mxu1 %vm121_vm0, %v47_v38 }
  0x19   :  { %702 = vmatpush3.msra.mxu0 %v82_v31 }
  0x1a   :  { %703 = vmatprep.subr.mxu0 %v97_v33 }
  0x1b   :  { %704 = vmatpush3.msra.mxu0 %v81_v35 }
  0x1c   :  { %705 = vmatprep.subr.mxu0 %v96_v36 }
  0x1d   :  { %706 = vmatpush3.msra.mxu0 %v80_v37 }
  0x1e   :  { %11 = vsyncpa [#allocation4], 0  ;;  %707 = vmatprep.subr.mxu0 %v95_v39  ;;  %v78_v43 = vld [vmem:[%s1353_s1] sm:$0xff]  ;;  %822 = vmatprep.mubr.msk.f32.mxu1 %vm121_vm0, %v50_v40  ;;  %v53_v44 = vld [vmem:[%s1352_s0 + $0xb8] sm:$0xff]  ;;  %v916_v20 = vmov 0.0   ;;  %vm917_vm1 = vmmov 0  }
  0x1f   :  { %708 = vmatpush3.msra.mxu0 %v79_v41  ;;  %v30_v45 = vld [vmem:[%s1352_s0] sm:$0xff]  ;;  %v56_v46 = vld [vmem:[%s1352_s0 + $0xd0] sm:$0xff]  ;;  %823 = vmatmul.mubr.msk.f32.gmra.mxu1 %vm121_vm0, %v53_v44  ;;  %v59_v48 = vld [vmem:[%s1352_s0 + $0xe8] sm:$0xff]  ;;  %vm28_vm2 = vcmask 517120   ;;  %vm570_vm3 = vcmask 523264   ;;  %s918_s12 = smov [#allocation3]  }
  0x20   :  { %709 = vmatprep.subr.mxu0 %v94_v42  ;;  %v34_v47 = vld [vmem:[%s1352_s0 + $0x20] sm:$0xff]  ;;  %825 = vmatprep.mubr.msk.f32.mxu1 %vm121_vm0, %v56_v46  ;;  %v33_v49 = vld [vmem:[%s1352_s0 + $0x18] sm:$0xff]  ;;  %v36_v53 = vld [vmem:[%s1352_s0 + $0x30] sm:$0xff]  ;;  %29 = vst.msk [vmem:[#allocation2] sm:$0x3] %vm28_vm2, %v916_v20  ;;  %s652_s13 = sshll.u32 %s918_s12, 4  ;;  %s653_s13 = int_to_ptr.vmem [resolvable:$true] %s652_s13 }
  0x21   :  { %710 = vmatpush3.msra.mxu0 %v78_v43  ;;  %v62_v50 = vld [vmem:[%s1352_s0 + $0x100] sm:$0xff]  ;;  %v37_v51 = vld [vmem:[%s1352_s0 + $0x38] sm:$0xff]  ;;  %v68_v54 = vld [vmem:[%s1352_s0 + $0x130] sm:$0xff]  ;;  %837 = vmatprep.subr.mxu1 %v916_v20  ;;  %vm644_vm4 = vcmask 156672   ;;  %p899_p1 = scmp.lt.s32.totalorder %s653_s13, %s653_s13 }
  0x22   :  { %235 = vmatmul.mubr.f32.vlgmr.msra.gmra.mxu0 %v30_v45  ;;  %v65_v52 = vld [vmem:[%s1352_s0 + $0x118] sm:$0xff]  ;;  %v40_v55 = vld [vmem:[%s1352_s0 + $0x50] sm:$0xff]  ;;  %v71_v56 = vld [vmem:[%s1352_s0 + $0x148] sm:$0xff] }
  0x23   :  { %239 = vmatprep.mubr.f32.mxu0 %v34_v47  ;;  %826 = vmatmul.mubr.msk.f32.gmra.mxu1 %vm121_vm0, %v59_v48  ;;  %v39_v57 = vld [vmem:[%s1352_s0 + $0x48] sm:$0xff]  ;;  %v74_v58 = vld [vmem:[%s1352_s0 + $0x160] sm:$0xff]  ;;  %v77_v60 = vld [vmem:[%s1352_s0 + $0x178] sm:$0xff] }
  0x24   :  { %828 = vmatprep.mubr.msk.f32.mxu1 %vm121_vm0, %v62_v50  ;;  %v43_v59 = vld [vmem:[%s1352_s0 + $0x68] sm:$0xff]  ;;  %v42_v61 = vld [vmem:[%s1352_s0 + $0x60] sm:$0xff]  ;;  %v45_v63 = vld [vmem:[%s1352_s0 + $0x78] sm:$0xff] }
  0x25   :  { %v46_v62 = vld [vmem:[%s1352_s0 + $0x80] sm:$0xff]  ;;  %v49_v0 = vld [vmem:[%s1352_s0 + $0x98] sm:$0xff]  ;;  %v48_v1 = vld [vmem:[%s1352_s0 + $0x90] sm:$0xff] }
  0x26   :  { %240 = vmatmul.mubr.f32.gmra.mxu0 %v33_v49  ;;  %v52_v2 = vld [vmem:[%s1352_s0 + $0xb0] sm:$0xff]  ;;  %v51_v3 = vld [vmem:[%s1352_s0 + $0xa8] sm:$0xff]  ;;  %v54_v5 = vld [vmem:[%s1352_s0 + $0xc0] sm:$0xff] }
  0x27   :  { %244 = vmatprep.mubr.f32.mxu0 %v37_v51  ;;  %829 = vmatmul.mubr.msk.f32.gmra.mxu1 %vm121_vm0, %v65_v52  ;;  %v55_v4 = vld [vmem:[%s1352_s0 + $0xc8] sm:$0xff]  ;;  %v58_v6 = vld [vmem:[%s1352_s0 + $0xe0] sm:$0xff]  ;;  %v57_v7 = vld [vmem:[%s1352_s0 + $0xd8] sm:$0xff] }
  0x28   :  { %831 = vmatprep.mubr.msk.f32.mxu1 %vm121_vm0, %v68_v54  ;;  %v61_v8 = vld [vmem:[%s1352_s0 + $0xf8] sm:$0xff]  ;;  %v60_v9 = vld [vmem:[%s1352_s0 + $0xf0] sm:$0xff]  ;;  %v63_v11 = vld [vmem:[%s1352_s0 + $0x108] sm:$0xff] }
  0x29   :  { %v64_v10 = vld [vmem:[%s1352_s0 + $0x110] sm:$0xff]  ;;  %v67_v12 = vld [vmem:[%s1352_s0 + $0x128] sm:$0xff]  ;;  %v66_v13 = vld [vmem:[%s1352_s0 + $0x120] sm:$0xff] }
  0x2a   :  { %245 = vmatmul.mubr.f32.gmra.mxu0 %v36_v53  ;;  %v70_v14 = vld [vmem:[%s1352_s0 + $0x140] sm:$0xff]  ;;  %v69_v15 = vld [vmem:[%s1352_s0 + $0x138] sm:$0xff]  ;;  %v72_v17 = vld [vmem:[%s1352_s0 + $0x150] sm:$0xff] }
  0x2b   :  { %249 = vmatprep.mubr.f32.mxu0 %v40_v55  ;;  %832 = vmatmul.mubr.msk.f32.gmra.mxu1 %vm121_vm0, %v71_v56  ;;  %v73_v16 = vld [vmem:[%s1352_s0 + $0x158] sm:$0xff]  ;;  %v76_v18 = vld [vmem:[%s1352_s0 + $0x170] sm:$0xff]  ;;  %v75_v19 = vld [vmem:[%s1352_s0 + $0x168] sm:$0xff] }
  0x2c   :  { %834 = vmatprep.mubr.msk.f32.mxu1 %vm121_vm0, %v74_v58 }
  0x2e   :  { %250 = vmatmul.mubr.f32.gmra.mxu0 %v39_v57 }
  0x2f   :  { %254 = vmatprep.mubr.f32.mxu0 %v43_v59  ;;  %835 = vmatmul.mubr.msk.f32.gmra.mxu1 %vm121_vm0, %v77_v60 }
  0x30   :  { %869 = vmatprep.mubr.msk.f32.mxu1 %vm917_vm1, %v916_v20 }
  0x32   :  { %255 = vmatmul.mubr.f32.gmra.mxu0 %v42_v61 }
  0x33   :  { %259 = vmatprep.mubr.f32.mxu0 %v46_v62 }
  0x36   :  { %260 = vmatmul.mubr.f32.gmra.mxu0 %v45_v63 }
  0x37   :  { %264 = vmatprep.mubr.f32.mxu0 %v49_v0 }
  0x3a   :  { %265 = vmatmul.mubr.f32.gmra.mxu0 %v48_v1 }
  0x3b   :  { %269 = vmatprep.mubr.f32.mxu0 %v52_v2 }
  0x3e   :  { %270 = vmatmul.mubr.f32.gmra.mxu0 %v51_v3 }
  0x3f   :  { %274 = vmatprep.mubr.f32.mxu0 %v55_v4 }
  0x42   :  { %275 = vmatmul.mubr.f32.gmra.mxu0 %v54_v5 }
  0x43   :  { %279 = vmatprep.mubr.f32.mxu0 %v58_v6 }
  0x46   :  { %280 = vmatmul.mubr.f32.gmra.mxu0 %v57_v7 }
  0x47   :  { %284 = vmatprep.mubr.f32.mxu0 %v61_v8 }
  0x4a   :  { %285 = vmatmul.mubr.f32.gmra.mxu0 %v60_v9 }
  0x4b   :  { %289 = vmatprep.mubr.f32.mxu0 %v64_v10  ;;  %v1260_v10 = vld [vmem:[%s1354_s2] ss:$0 sm:$0xff] }
  0x4e   :  { %290 = vmatmul.mubr.f32.gmra.mxu0 %v63_v11 }
  0x4f   :  { %294 = vmatprep.mubr.f32.mxu0 %v67_v12 }
  0x52   :  { %295 = vmatmul.mubr.f32.gmra.mxu0 %v66_v13 }
  0x53   :  { %299 = vmatprep.mubr.f32.mxu0 %v70_v14 }
  0x56   :  { %300 = vmatmul.mubr.f32.gmra.mxu0 %v69_v15 }
  0x57   :  { %304 = vmatprep.mubr.f32.mxu0 %v73_v16 }
  0x5a   :  { %305 = vmatmul.mubr.f32.gmra.mxu0 %v72_v17 }
  0x5b   :  { %309 = vmatprep.mubr.f32.mxu0 %v76_v18 }
  0x5e   :  { %310 = vmatmul.mubr.f32.gmra.mxu0 %v75_v19 }
  0xd0   :  { %v1235_v34 = vpop.f32.mrf.mxu1 }
  0xd2   :  { %v1241_v38 = vpop.f32.mrf.mxu1 }
  0xd4   :  { %v1245_v40 = vpop.f32.mrf.mxu1 }
  0xd6   :  { %v1247_v43 = vpop.f32.mrf.mxu1 }
  0xd8   :  { %v1249_v45 = vpop.f32.mrf.mxu1 }
  0xda   :  { %v1251_v48 = vpop.f32.mrf.mxu1 }
  0xdf   :  { %v1253_v50 = vpop.f32.mrf.mxu1 }
  0xe1   :  { %v1255_v53 = vpop.f32.mrf.mxu1 }
  0xe2   :  { %v711_v21 = vpop.f32.mrf.mxu0 }
  0xe3   :  { %v827_v55 = vpop.f32.mrf.mxu1 }
  0xe4   :  { %v712_v22 = vpop.f32.mrf.mxu0 }
  0xe5   :  { %v1227_v23 = vadd.f32 %v712_v22, %v711_v21  ;;  %v421_v58 = vpop.f32.mrf.mxu1 }
  0xe6   :  { %v714_v24 = vpop.f32.mrf.mxu0 }
  0xe7   :  { %v830_v60 = vpop.f32.mrf.mxu1 }
  0xe8   :  { %v715_v25 = vpop.f32.mrf.mxu0 }
  0xe9   :  { %v1229_v26 = vadd.f32 %v715_v25, %v714_v24  ;;  %v431_v63 = vpop.f32.mrf.mxu1 }
  0xea   :  { %v717_v27 = vpop.f32.mrf.mxu0 }
  0xeb   :  { %v833_v1 = vpop.f32.mrf.mxu1 }
  0xec   :  { %v718_v28 = vpop.f32.mrf.mxu0 }
  0xed   :  { %v1231_v29 = vadd.f32 %v718_v28, %v717_v27  ;;  %v441_v4 = vpop.f32.mrf.mxu1 }
  0xee   :  { %v720_v30 = vpop.f32.mrf.mxu0 }
  0xef   :  { %v836_v8 = vpop.f32.mrf.mxu1 }
  0xf0   :  { %v721_v31 = vpop.f32.mrf.mxu0 }
  0xf1   :  { %v1233_v32 = vadd.f32 %v721_v31, %v720_v30  ;;  %v451_v15 = vpop.f32.mrf.mxu1 }
  0xf2   :  { %v723_v33 = vpop.f32.mrf.mxu0 }
  0xf4   :  { %v724_v35 = vpop.f32.mrf.mxu0 }
  0xf5   :  { %v1237_v36 = vadd.f32 %v724_v35, %v723_v33 }
  0xf6   :  { %v1239_v37 = vpop.f32.mrf.mxu0 }
  0xf8   :  { %v1243_v39 = vpop.f32.mrf.mxu0 }
  0xfa   :  { %v729_v41 = vpop.f32.mrf.mxu0 }
  0xfc   :  { %v730_v42 = vpop.f32.mrf.mxu0 }
  0xfe   :  { %v732_v44 = vpop.f32.mrf.mxu0 }
 0x100   :  { %v733_v46 = vpop.f32.mrf.mxu0 }
 0x102   :  { %v735_v47 = vpop.f32.mrf.mxu0 }
 0x104   :  { %v736_v49 = vpop.f32.mrf.mxu0 }
 0x105   :  { %v737_v31 = vadd.f32 %v736_v49, %v735_v47  ;;  %v728_v49 = vadd.f32 %v1243_v39, %v1239_v37  ;;  %v257_v37 = vadd.f32 %v1237_v36, %v1260_v10 }
 0x106   :  { %v738_v51 = vpop.f32.mrf.mxu0 }
 0x107   :  { %v402_v36 = vadd.f32 %v1251_v48, %v257_v37 }
 0x108   :  { %v739_v52 = vpop.f32.mrf.mxu0 }
 0x109   :  { %v740_v25 = vadd.f32 %v739_v52, %v738_v51  ;;  %v731_v51 = vadd.f32 %v730_v42, %v729_v41  ;;  %v277_v52 = vadd.f32 %v737_v31, %v1260_v10 }
 0x10a   :  { %v741_v54 = vpop.f32.mrf.mxu0 }
 0x10b   :  { %v422_v41 = vadd.f32 %v421_v58, %v277_v52  ;;  %v252_v58 = vadd.f32 %v1233_v32, %v1260_v10 }
 0x10c   :  { %v742_v56 = vpop.f32.mrf.mxu0 }
 0x10d   :  { %v743_v19 = vadd.f32 %v742_v56, %v741_v54  ;;  %v282_v54 = vadd.f32 %v740_v25, %v1260_v10  ;;  %v397_v32 = vadd.f32 %v1245_v40, %v252_v58 }
 0x10e   :  { %v744_v57 = vpop.f32.mrf.mxu0 }
 0x10f   :  { %v287_v33 = vadd.f32 %v743_v19, %v1260_v10 }
 0x110   :  { %v745_v59 = vpop.f32.mrf.mxu0 }
 0x111   :  { %v746_v16 = vadd.f32 %v745_v59, %v744_v57  ;;  %v734_v57 = vadd.f32 %v733_v46, %v732_v44  ;;  %v427_v46 = vadd.f32 %v827_v55, %v282_v54  ;;  %v468_v55 = vmax.f32 %v422_v41, 0.0 }
 0x112   :  { %v747_v61 = vpop.f32.mrf.mxu0 }
 0x113   :  { %v292_v27 = vadd.f32 %v746_v16, %v1260_v10  ;;  %v272_v44 = vadd.f32 %v734_v57, %v1260_v10  ;;  %v476_v16 = vld [vmem:[#allocation2] sm:$0x3] }
 0x114   :  { %v748_v62 = vpop.f32.mrf.mxu0 }
 0x115   :  { %v749_v12 = vadd.f32 %v748_v62, %v747_v61  ;;  %v437_v56 = vadd.f32 %v830_v60, %v292_v27  ;;  %v432_v62 = vadd.f32 %v431_v63, %v287_v33  ;;  %v267_v60 = vadd.f32 %v731_v51, %v1260_v10 }
 0x116   :  { %v750_v0 = vpop.f32.mrf.mxu0  ;;  %v262_v63 = vadd.f32 %v728_v49, %v1260_v10 }
 0x117   :  { %v297_v21 = vadd.f32 %v749_v12, %v1260_v10  ;;  %v470_v42 = vmax.f32 %v432_v62, 0.0  ;;  %v412_v39 = vadd.f32 %v1255_v53, %v267_v60  ;;  %v242_v53 = vadd.f32 %v1229_v26, %v1260_v10  ;;  %v558_v12 = vld [vmem:[%s1356_s4 + $0x18] sm:$0xff] }
 0x118   :  { %v751_v2 = vpop.f32.mrf.mxu0 }
 0x119   :  { %v752_v9 = vadd.f32 %v751_v2, %v750_v0  ;;  %v442_v35 = vadd.f32 %v441_v4, %v297_v21  ;;  %v471_v0 = vmax.f32 %v437_v56, 0.0  ;;  %v469_v2 = vmax.f32 %v427_v46, 0.0 }
 0x11a   :  { %v753_v3 = vpop.f32.mrf.mxu0  ;;  %v387_v48 = vadd.f32 %v1235_v34, %v242_v53  ;;  %v477_v34 = vld [vmem:[%s1355_s3] sm:$0x3] }
 0x11b   :  { %v302_v17 = vadd.f32 %v752_v9, %v1260_v10  ;;  %v472_v47 = vmax.f32 %v442_v35, 0.0 }
 0x11c   :  { %v754_v5 = vpop.f32.mrf.mxu0  ;;  %v461_v9 = vmax.f32 %v387_v48, 0.0 }
 0x11d   :  { %v755_v6 = vadd.f32 %v754_v5, %v753_v3  ;;  %v447_v28 = vadd.f32 %v833_v1, %v302_v17  ;;  %v417_v1 = vadd.f32 %v1253_v50, %v272_v44  ;;  %v407_v3 = vadd.f32 %v1249_v45, %v262_v63 }
 0x11e   :  { %v756_v7 = vpop.f32.mrf.mxu0  ;;  %v247_v50 = vadd.f32 %v1231_v29, %v1260_v10  ;;  %v466_v5 = vmax.f32 %v412_v39, 0.0  ;;  %v237_v45 = vadd.f32 %v1227_v23, %v1260_v10 }
 0x11f   :  { %v307_v14 = vadd.f32 %v755_v6, %v1260_v10  ;;  %v473_v59 = vmax.f32 %v447_v28, 0.0  ;;  %v467_v4 = vmax.f32 %v417_v1, 0.0  ;;  %v465_v6 = vmax.f32 %v407_v3, 0.0 }
 0x120   :  { %v757_v11 = vpop.f32.mrf.mxu0  ;;  %v392_v29 = vadd.f32 %v1247_v43, %v247_v50  ;;  %v382_v26 = vadd.f32 %v1241_v38, %v237_v45  ;;  %v562_v38 = vld [vmem:[%s1356_s4 + $0x38] sm:$0xff]  ;;  %v561_v43 = vld [vmem:[%s1356_s4 + $0x30] sm:$0xff] }
 0x121   :  { %v758_v13 = vadd.f32 %v757_v11, %v756_v7  ;;  %v452_v24 = vadd.f32 %v451_v15, %v307_v14  ;;  %v464_v7 = vmax.f32 %v402_v36, 0.0  ;;  %v559_v11 = vld [vmem:[%s1356_s4 + $0x20] sm:$0xff]  ;;  %v556_v14 = vld [vmem:[%s1356_s4 + $0x8] sm:$0xff] }
 0x122   :  { %v462_v40 = vmax.f32 %v392_v29, 0.0  ;;  %v460_v23 = vmax.f32 %v382_v26, 0.0  ;;  %v555_v15 = vld [vmem:[%s1356_s4] sm:$0xff] }
 0x123   :  { %v312_v18 = vadd.f32 %v758_v13, %v1260_v10  ;;  %v474_v61 = vmax.f32 %v452_v24, 0.0  ;;  %v560_v10 = vld [vmem:[%s1356_s4 + $0x28] sm:$0xff]  ;;  %v557_v13 = vld [vmem:[%s1356_s4 + $0x10] sm:$0xff]  ;;  %s894_s4 = scalar_lea.vmem %s653_s13, 32 }
 0x124   :  { %p895_p0 = scmp.ne.s32.totalorder %s653_s13, %s894_s4  ;;  %p900_p2 = scmp.lt.s32.totalorder %s894_s4, %s894_s4 }
 0x125   :  { %v457_v22 = vadd.f32 %v836_v8, %v312_v18  ;;  %v463_v8 = vmax.f32 %v397_v32, 0.0 }
 0x126   :  { %p901_p3 = por %p900_p2, %p899_p1 }
 0x127   :  { %v475_v30 = vmax.f32 %v457_v22, 0.0  ;;  %v677_v22 = vld [vmem:[%s1357_s5] ss:$0 sm:$0xff] }
 0x128   :  { %p902_p4 = pnand %p901_p3, %p895_p0 }
 0x129   :  { %838 = vmatpush3.msra.mxu1 %v475_v30 }
 0x12a   :  { %839 = vmatprep.subr.mxu1 %v916_v20 }
 0x12b   :  { %840 = vmatpush3.msra.mxu1 %v474_v61 }
 0x12c   :  { %841 = vmatprep.subr.mxu1 %v916_v20 }
 0x12d   :  { %842 = vmatpush3.msra.mxu1 %v473_v59 }
 0x12e   :  { %843 = vmatprep.subr.mxu1 %v916_v20 }
 0x12f   :  { %844 = vmatpush3.msra.mxu1 %v472_v47 }
 0x130   :  { %845 = vmatprep.subr.mxu1 %v916_v20 }
 0x131   :  { %846 = vmatpush3.msra.mxu1 %v471_v0 }
 0x132   :  { %847 = vmatprep.subr.mxu1 %v916_v20 }
 0x133   :  { %848 = vmatpush3.msra.mxu1 %v470_v42 }
 0x134   :  { %849 = vmatprep.subr.mxu1 %v916_v20 }
 0x135   :  { %850 = vmatpush3.msra.mxu1 %v469_v2 }
 0x136   :  { %851 = vmatprep.subr.mxu1 %v916_v20 }
 0x137   :  { %852 = vmatpush3.msra.mxu1 %v468_v55 }
 0x138   :  { %853 = vmatprep.subr.mxu1 %v916_v20 }
 0x139   :  { %854 = vmatpush3.msra.mxu1 %v467_v4 }
 0x13a   :  { %855 = vmatprep.subr.mxu1 %v916_v20 }
 0x13b   :  { %856 = vmatpush3.msra.mxu1 %v466_v5 }
 0x13c   :  { %857 = vmatprep.subr.mxu1 %v916_v20 }
 0x13d   :  { %858 = vmatpush3.msra.mxu1 %v465_v6 }
 0x13e   :  { %859 = vmatprep.subr.mxu1 %v916_v20 }
 0x13f   :  { %860 = vmatpush3.msra.mxu1 %v464_v7 }
 0x140   :  { %861 = vmatprep.subr.mxu1 %v916_v20 }
 0x141   :  { %862 = vmatpush3.msra.mxu1 %v463_v8 }
 0x142   :  { %863 = vmatprep.subr.mxu1 %v916_v20 }
 0x143   :  { %864 = vmatpush3.msra.mxu1 %v462_v40 }
 0x144   :  { %865 = vmatprep.subr.mxu1 %v916_v20 }
 0x145   :  { %866 = vmatpush3.msra.mxu1 %v461_v9 }
 0x146   :  { %867 = vmatprep.subr.mxu1 %v916_v20 }
 0x147   :  { %868 = vmatpush3.msra.mxu1 %v460_v23 }
 0x148   :  { %870 = vmatmul.mubr.f32.vlgmr.msra.gmra.mxu1 %v477_v34  ;;  %872 = vmatprep.subr.mxu1 %v916_v20 }
 0x149   :  { %873 = vmatpush3.msra.mxu1 %v562_v38  ;;  %888 = vmatprep.mubr.msk.f32.mxu1 %vm917_vm1, %v916_v20 }
 0x14a   :  { %874 = vmatprep.subr.mxu1 %v916_v20 }
 0x14b   :  { %875 = vmatpush3.msra.mxu1 %v561_v43 }
 0x14c   :  { %876 = vmatprep.subr.mxu1 %v916_v20 }
 0x14d   :  { %877 = vmatpush3.msra.mxu1 %v560_v10 }
 0x14e   :  { %878 = vmatprep.subr.mxu1 %v916_v20 }
 0x14f   :  { %879 = vmatpush3.msra.mxu1 %v559_v11 }
 0x150   :  { %880 = vmatprep.subr.mxu1 %v916_v20 }
 0x151   :  { %881 = vmatpush3.msra.mxu1 %v558_v12 }
 0x152   :  { %882 = vmatprep.subr.mxu1 %v916_v20 }
 0x153   :  { %883 = vmatpush3.msra.mxu1 %v557_v13 }
 0x154   :  { %884 = vmatprep.subr.mxu1 %v916_v20 }
 0x155   :  { %885 = vmatpush3.msra.mxu1 %v556_v14 }
 0x156   :  { %886 = vmatprep.subr.mxu1 %v916_v20 }
 0x157   :  { %887 = vmatpush3.msra.mxu1 %v555_v15 }
 0x208   :  { %v544_v17 = vpop.f32.mrf.mxu1 }
 0x209   :  { %v548_v18 = vadd.f32 %v544_v17, %v476_v16 }
 0x20a   :  { %v871_v19 = vpop.f32.mrf.mxu1 }
 0x20b   :  { %550 = vst.msk [vmem:[#allocation2] sm:$0x3] %vm28_vm2, %v548_v18 }
 0x212   :  { %v554_v21 = vld [vmem:[#allocation2] sm:$0x3] }
 0x213   :  { %889 = vmatmul.mubr.msk.f32.vlgmr.msra.gmra.mxu1 %vm570_vm3, %v554_v21 }
 0x2d3   :  { %v640_v24 = vpop.f32.mrf.mxu1 }
 0x2d4   :  { %v641_v25 = vadd.f32 %v677_v22, %v640_v24 }
 0x2d5   :  { %v890_v20 = vpop.f32.mrf.mxu1 }
 0x2d6   :  { %645 = vst.msk [vmem:[#allocation3] sm:$0x3] %vm644_vm4, %v641_v25 }
 0x2d7   :  { %905 = shalt.err (!%p902_p4)
}
 0x2d8   :  { %655 = dma.vmem_to_hbm [thread:$0]  %s653_s13, 32, %s1358_s6, [#allocation4]  }
 0x2d9   :  { %914 = dma.done.wait [#allocation4], 32  }
 0x2da   :  { %915 = vsyncadd [#allocation4], 4294967264 }
 0x2db   :  { %659 = vsyncpa [#allocation4], 1 }

</bundles_post_ra>
